<compile_context>
chip_gen: v5e
topology: v5e:2x2
jax: 0.10.0
libtpu: 0.0.40
codegen_flags: <defaults>
</compile_context>

<pallas_src>
import functools

import jax
import jax.numpy as jnp
from jax.experimental import pallas as pl
from jax.experimental.pallas import tpu as pltpu

K1 = 320          # k  in the PyTorch module
K2 = 384          # k2 in the PyTorch module
K1_PAD = 384      # 320 padded up to a lane-dense 3*128
BN_EPS = 1e-5
LANE = 128


def _round_up(n, m):
    return ((n + m - 1) // m) * m


# ------------------------------ Fused kernel ------------------------------- #

def _fused_mlp_kernel(x_ref,
                      w1, b1, w2, b2, w10, b10, w11, b11,
                      w12, b12, w13, b13, w3, b3,
                      o_ref):
    """Whole forward pass for one batch tile, all operands resident in VMEM."""

    def dense(h, w_ref, b_ref):
        # Activations are kept in f32; cast to the (bf16) weight dtype right
        # before the MXU matmul, accumulate in f32.
        return jnp.dot(h.astype(w_ref.dtype), w_ref[...],
                       preferred_element_type=jnp.float32) + b_ref[...]

    x = x_ref[...]                                               # (TB, F0p) f32

    a  = jnp.maximum(dense(x,  w1,  b1),  0.0)                   # net1
    bb = jnp.maximum(dense(a,  w2,  b2),  0.0) + a               # net2(a) + a
    h1 = jnp.maximum(dense(bb, w10, b10), 0.0)                   # net10
    h2 = jnp.maximum(dense(h1, w11, b11), 0.0)                   # net11
    h3 = jnp.maximum(dense(h2, w12, b12), 0.0)                   # net12
    h4 = jnp.maximum(dense(h3, w13, b13), 0.0)                   # net13
    logits = dense(h4, w3, b3)                                   # net3 linear

    # Softmax(dim=1) in f32.  EUP exp; EUP approx reciprocal + 1 Newton step.
    logits = logits - jnp.max(logits, axis=-1, keepdims=True)
    e = jnp.exp(logits)
    s = jnp.sum(e, axis=-1, keepdims=True)
    inv = pl.reciprocal(s, approx=True)
    inv = inv * (2.0 - s * inv)                                  # Newton refine
    o_ref[...] = (e * inv).astype(o_ref.dtype)


# --------------------------- Parameter construction ------------------------ #

def _init_folded_block(key, f_in, f_out, f_in_pad, f_out_pad,
                       weight_dtype=jnp.bfloat16):
    """One BatchNorm1d(f_in) + Linear(f_in, f_out), BN folded into W/b, padded."""
    k_gamma, k_beta, k_mean, k_var, k_w, k_b = jax.random.split(key, 6)
    gamma = jax.random.uniform(k_gamma, (f_in,), jnp.float32, 0.8, 1.2)
    beta = jax.random.uniform(k_beta, (f_in,), jnp.float32, -0.1, 0.1)
    run_mean = jax.random.uniform(k_mean, (f_in,), jnp.float32, -0.5, 0.5)
    run_var = jax.random.uniform(k_var, (f_in,), jnp.float32, 0.5, 1.5)

    # PyTorch Linear default init: U(-1/sqrt(in), 1/sqrt(in)); stored as (in, out).
    bound = 1.0 / jnp.sqrt(jnp.float32(f_in))
    w = jax.random.uniform(k_w, (f_in, f_out), jnp.float32, -bound, bound)
    b = jax.random.uniform(k_b, (f_out,), jnp.float32, -bound, bound)

    # Eval-mode BN fold:  y = (x*scale + shift) @ W + b
    #                       =  x @ (scale[:,None]*W) + (shift @ W + b)
    scale = gamma / jnp.sqrt(run_var + BN_EPS)
    shift = beta - run_mean * scale
    w_fold = scale[:, None] * w
    b_fold = b + shift @ w

    # Zero-pad to lane-dense shapes (pad rows/cols contribute exactly zero).
    w_pad = jnp.zeros((f_in_pad, f_out_pad), jnp.float32)
    w_pad = w_pad.at[:f_in, :f_out].set(w_fold)
    b_pad = jnp.zeros((1, f_out_pad), jnp.float32)
    b_pad = b_pad.at[0, :f_out].set(b_fold)

    return w_pad.astype(weight_dtype), b_pad  # weights bf16, bias f32


def init_params(key, num_features, targets, weight_dtype=jnp.bfloat16):
    f0p = _round_up(num_features, LANE)
    dims = [
        (num_features, K1, f0p, K1_PAD),   # net1
        (K1, K1, K1_PAD, K1_PAD),          # net2
        (K1, K2, K1_PAD, K2),              # net10
        (K2, K2, K2, K2),                  # net11
        (K2, K1, K2, K1_PAD),              # net12
        (K1, K1, K1_PAD, K1_PAD),          # net13
        (K1, targets, K1_PAD, targets),    # net3 (narrow output stays unpadded)
    ]
    keys = jax.random.split(key, len(dims))
    flat = []
    for k, (fi, fo, fip, fop) in zip(keys, dims):
        w, b = _init_folded_block(k, fi, fo, fip, fop, weight_dtype)
        flat.extend([w, b])
    meta = dict(num_features=num_features, f0p=f0p, targets=targets)
    return flat, meta


# --------------------------------- Forward --------------------------------- #

def model_forward(flat_params, meta, x, *, max_batch_tile=256):
    batch, f0 = x.shape
    assert f0 == meta["num_features"]
    f0p, targets = meta["f0p"], meta["targets"]

    # Choose a batch tile: whole batch when small, 256-row tiles when large
    # (keeps VMEM bounded on v7x's 64 MiB and shards across its 2 TCs).
    if batch <= max_batch_tile:
        tb, bpad = batch, batch
    else:
        tb = max_batch_tile
        bpad = _round_up(batch, tb)

    # Zero-pad features (and batch, if tiling) on the host.
    x_pad = jnp.zeros((bpad, f0p), jnp.float32)
    x_pad = x_pad.at[:batch, :f0].set(x.astype(jnp.float32))

    grid = (bpad // tb,)

    in_specs = [pl.BlockSpec((tb, f0p), lambda i: (i, 0))]
    for p in flat_params:
        r, c = p.shape
        # Constant block index: weights/biases stay VMEM-resident across tiles.
        in_specs.append(pl.BlockSpec((r, c), lambda i: (0, 0)))
    out_spec = pl.BlockSpec((tb, targets), lambda i: (i, 0))

    # Advisory cost hint for XLA scheduling around the fused custom call.
    wshapes = [p.shape for p in flat_params[0::2]]
    flops = 2 * bpad * sum(r * c for (r, c) in wshapes)
    transcendentals = bpad * (targets + 2)          # exp + reciprocal
    bytes_accessed = (sum(int(p.size) * p.dtype.itemsize for p in flat_params)
                      + x_pad.size * 4 + bpad * targets * 4)
    cost = pl.CostEstimate(flops=flops, transcendentals=transcendentals,
                           bytes_accessed=bytes_accessed)

    out = pl.pallas_call(
        _fused_mlp_kernel,
        out_shape=jax.ShapeDtypeStruct((bpad, targets), jnp.float32),
        grid=grid,
        in_specs=in_specs,
        out_specs=out_spec,
        compiler_params=pltpu.CompilerParams(
            dimension_semantics=("parallel",),      # shard batch tiles across TCs
        ),
        cost_estimate=cost,
    )(x_pad, *flat_params)

    out = out[:batch]
    if out.shape[-1] == 1:    # torch .squeeze(-1) semantics
        out = out[..., 0]
    return out


# ----------------------------------- Main ----------------------------------- #

if __name__ == "__main__":
    key = jax.random.PRNGKey(0)
    k_params, k_x = jax.random.split(key)

    batch = 8
    num_features = 16      # == len(columns) - 1
    targets = 8

    flat_params, meta = init_params(k_params, num_features, targets)
    x = jax.random.normal(k_x, (batch, num_features), jnp.float32)

    fwd = jax.jit(functools.partial(model_forward, flat_params, meta))
    out = jax.block_until_ready(fwd(x))

    assert out.shape == (batch, targets)
    # Softmax rows should sum to ~1.
    assert bool(jnp.allclose(jnp.sum(out, axis=-1), 1.0, atol=1e-4))
    assert bool(jnp.all(jnp.isfinite(out)))

    print("KERNEL_OK")
</pallas_src>

<mosaic_0001>
module attributes {stable_mosaic.version = 11 : i64} {
  func.func @_fused_mlp_kernel(%arg0: i32, %arg1: memref<8x128xf32, #tpu.memory_space<vmem>>, %arg2: memref<128x384xbf16, #tpu.memory_space<vmem>>, %arg3: memref<1x384xf32, #tpu.memory_space<vmem>>, %arg4: memref<384x384xbf16, #tpu.memory_space<vmem>>, %arg5: memref<1x384xf32, #tpu.memory_space<vmem>>, %arg6: memref<384x384xbf16, #tpu.memory_space<vmem>>, %arg7: memref<1x384xf32, #tpu.memory_space<vmem>>, %arg8: memref<384x384xbf16, #tpu.memory_space<vmem>>, %arg9: memref<1x384xf32, #tpu.memory_space<vmem>>, %arg10: memref<384x384xbf16, #tpu.memory_space<vmem>>, %arg11: memref<1x384xf32, #tpu.memory_space<vmem>>, %arg12: memref<384x384xbf16, #tpu.memory_space<vmem>>, %arg13: memref<1x384xf32, #tpu.memory_space<vmem>>, %arg14: memref<384x8xbf16, #tpu.memory_space<vmem>>, %arg15: memref<1x8xf32, #tpu.memory_space<vmem>>, %arg16: memref<8x8xf32, #tpu.memory_space<vmem>>) attributes {dimension_semantics = [#tpu.dimension_semantics<parallel>], iteration_bounds = array<i64: 1>, scalar_prefetch = 0 : i64, scratch_operands = 0 : i64, tpu.core_type = #tpu.core_type<tc>, window_params = [{transform_indices = @transform_0, window_bounds = array<i64: 8, 128>}, {pipeline_mode = #tpu.pipeline_mode<synchronous>, transform_indices = @transform_1, window_bounds = array<i64: 128, 384>}, {pipeline_mode = #tpu.pipeline_mode<synchronous>, transform_indices = @transform_2, window_bounds = array<i64: 1, 384>}, {pipeline_mode = #tpu.pipeline_mode<synchronous>, transform_indices = @transform_3, window_bounds = array<i64: 384, 384>}, {pipeline_mode = #tpu.pipeline_mode<synchronous>, transform_indices = @transform_4, window_bounds = array<i64: 1, 384>}, {pipeline_mode = #tpu.pipeline_mode<synchronous>, transform_indices = @transform_5, window_bounds = array<i64: 384, 384>}, {pipeline_mode = #tpu.pipeline_mode<synchronous>, transform_indices = @transform_6, window_bounds = array<i64: 1, 384>}, {pipeline_mode = #tpu.pipeline_mode<synchronous>, transform_indices = @transform_7, window_bounds = array<i64: 384, 384>}, {pipeline_mode = #tpu.pipeline_mode<synchronous>, transform_indices = @transform_8, window_bounds = array<i64: 1, 384>}, {pipeline_mode = #tpu.pipeline_mode<synchronous>, transform_indices = @transform_9, window_bounds = array<i64: 384, 384>}, {pipeline_mode = #tpu.pipeline_mode<synchronous>, transform_indices = @transform_10, window_bounds = array<i64: 1, 384>}, {pipeline_mode = #tpu.pipeline_mode<synchronous>, transform_indices = @transform_11, window_bounds = array<i64: 384, 384>}, {pipeline_mode = #tpu.pipeline_mode<synchronous>, transform_indices = @transform_12, window_bounds = array<i64: 1, 384>}, {pipeline_mode = #tpu.pipeline_mode<synchronous>, transform_indices = @transform_13, window_bounds = array<i64: 384, 8>}, {pipeline_mode = #tpu.pipeline_mode<synchronous>, transform_indices = @transform_14, window_bounds = array<i64: 1, 8>}, {transform_indices = @transform_15, window_bounds = array<i64: 8, 8>}]} {
    %c0 = arith.constant 0 : index
    %c0_0 = arith.constant 0 : index
    %0 = vector.load %arg1[%c0, %c0_0] : memref<8x128xf32, #tpu.memory_space<vmem>>, vector<8x128xf32>
    %1 = arith.truncf %0 : vector<8x128xf32> to vector<8x128xbf16>
    %c0_1 = arith.constant 0 : index
    %c0_2 = arith.constant 0 : index
    %2 = vector.load %arg2[%c0_1, %c0_2] : memref<128x384xbf16, #tpu.memory_space<vmem>>, vector<128x384xbf16>
    %cst = arith.constant dense<0.000000e+00> : vector<8x384xf32>
    %3 = tpu.matmul %1, %2, %cst {dimension_numbers = #tpu.dot_dimension_numbers<[1], [0], [0], [1], [0, 0, 1, 1], [], []>} : vector<8x128xbf16>, vector<128x384xbf16>, vector<8x384xf32> -> vector<8x384xf32>
    %c0_3 = arith.constant 0 : index
    %c0_4 = arith.constant 0 : index
    %4 = vector.load %arg3[%c0_3, %c0_4] : memref<1x384xf32, #tpu.memory_space<vmem>>, vector<1x384xf32>
    %5 = vector.broadcast %4 : vector<1x384xf32> to vector<8x384xf32>
    %6 = arith.addf %3, %5 : vector<8x384xf32>
    %cst_5 = arith.constant 0.000000e+00 : f32
    %7 = vector.broadcast %cst_5 : f32 to vector<8x384xf32>
    %8 = arith.maximumf %6, %7 : vector<8x384xf32>
    %9 = arith.truncf %8 : vector<8x384xf32> to vector<8x384xbf16>
    %c0_6 = arith.constant 0 : index
    %c0_7 = arith.constant 0 : index
    %10 = vector.load %arg4[%c0_6, %c0_7] : memref<384x384xbf16, #tpu.memory_space<vmem>>, vector<384x384xbf16>
    %cst_8 = arith.constant dense<0.000000e+00> : vector<8x384xf32>
    %11 = tpu.matmul %9, %10, %cst_8 {dimension_numbers = #tpu.dot_dimension_numbers<[1], [0], [0], [1], [0, 0, 1, 1], [], []>} : vector<8x384xbf16>, vector<384x384xbf16>, vector<8x384xf32> -> vector<8x384xf32>
    %c0_9 = arith.constant 0 : index
    %c0_10 = arith.constant 0 : index
    %12 = vector.load %arg5[%c0_9, %c0_10] : memref<1x384xf32, #tpu.memory_space<vmem>>, vector<1x384xf32>
    %13 = vector.broadcast %12 : vector<1x384xf32> to vector<8x384xf32>
    %14 = arith.addf %11, %13 : vector<8x384xf32>
    %cst_11 = arith.constant 0.000000e+00 : f32
    %15 = vector.broadcast %cst_11 : f32 to vector<8x384xf32>
    %16 = arith.maximumf %14, %15 : vector<8x384xf32>
    %17 = arith.addf %16, %8 : vector<8x384xf32>
    %18 = arith.truncf %17 : vector<8x384xf32> to vector<8x384xbf16>
    %c0_12 = arith.constant 0 : index
    %c0_13 = arith.constant 0 : index
    %19 = vector.load %arg6[%c0_12, %c0_13] : memref<384x384xbf16, #tpu.memory_space<vmem>>, vector<384x384xbf16>
    %cst_14 = arith.constant dense<0.000000e+00> : vector<8x384xf32>
    %20 = tpu.matmul %18, %19, %cst_14 {dimension_numbers = #tpu.dot_dimension_numbers<[1], [0], [0], [1], [0, 0, 1, 1], [], []>} : vector<8x384xbf16>, vector<384x384xbf16>, vector<8x384xf32> -> vector<8x384xf32>
    %c0_15 = arith.constant 0 : index
    %c0_16 = arith.constant 0 : index
    %21 = vector.load %arg7[%c0_15, %c0_16] : memref<1x384xf32, #tpu.memory_space<vmem>>, vector<1x384xf32>
    %22 = vector.broadcast %21 : vector<1x384xf32> to vector<8x384xf32>
    %23 = arith.addf %20, %22 : vector<8x384xf32>
    %cst_17 = arith.constant 0.000000e+00 : f32
    %24 = vector.broadcast %cst_17 : f32 to vector<8x384xf32>
    %25 = arith.maximumf %23, %24 : vector<8x384xf32>
    %26 = arith.truncf %25 : vector<8x384xf32> to vector<8x384xbf16>
    %c0_18 = arith.constant 0 : index
    %c0_19 = arith.constant 0 : index
    %27 = vector.load %arg8[%c0_18, %c0_19] : memref<384x384xbf16, #tpu.memory_space<vmem>>, vector<384x384xbf16>
    %cst_20 = arith.constant dense<0.000000e+00> : vector<8x384xf32>
    %28 = tpu.matmul %26, %27, %cst_20 {dimension_numbers = #tpu.dot_dimension_numbers<[1], [0], [0], [1], [0, 0, 1, 1], [], []>} : vector<8x384xbf16>, vector<384x384xbf16>, vector<8x384xf32> -> vector<8x384xf32>
    %c0_21 = arith.constant 0 : index
    %c0_22 = arith.constant 0 : index
    %29 = vector.load %arg9[%c0_21, %c0_22] : memref<1x384xf32, #tpu.memory_space<vmem>>, vector<1x384xf32>
    %30 = vector.broadcast %29 : vector<1x384xf32> to vector<8x384xf32>
    %31 = arith.addf %28, %30 : vector<8x384xf32>
    %cst_23 = arith.constant 0.000000e+00 : f32
    %32 = vector.broadcast %cst_23 : f32 to vector<8x384xf32>
    %33 = arith.maximumf %31, %32 : vector<8x384xf32>
    %34 = arith.truncf %33 : vector<8x384xf32> to vector<8x384xbf16>
    %c0_24 = arith.constant 0 : index
    %c0_25 = arith.constant 0 : index
    %35 = vector.load %arg10[%c0_24, %c0_25] : memref<384x384xbf16, #tpu.memory_space<vmem>>, vector<384x384xbf16>
    %cst_26 = arith.constant dense<0.000000e+00> : vector<8x384xf32>
    %36 = tpu.matmul %34, %35, %cst_26 {dimension_numbers = #tpu.dot_dimension_numbers<[1], [0], [0], [1], [0, 0, 1, 1], [], []>} : vector<8x384xbf16>, vector<384x384xbf16>, vector<8x384xf32> -> vector<8x384xf32>
    %c0_27 = arith.constant 0 : index
    %c0_28 = arith.constant 0 : index
    %37 = vector.load %arg11[%c0_27, %c0_28] : memref<1x384xf32, #tpu.memory_space<vmem>>, vector<1x384xf32>
    %38 = vector.broadcast %37 : vector<1x384xf32> to vector<8x384xf32>
    %39 = arith.addf %36, %38 : vector<8x384xf32>
    %cst_29 = arith.constant 0.000000e+00 : f32
    %40 = vector.broadcast %cst_29 : f32 to vector<8x384xf32>
    %41 = arith.maximumf %39, %40 : vector<8x384xf32>
    %42 = arith.truncf %41 : vector<8x384xf32> to vector<8x384xbf16>
    %c0_30 = arith.constant 0 : index
    %c0_31 = arith.constant 0 : index
    %43 = vector.load %arg12[%c0_30, %c0_31] : memref<384x384xbf16, #tpu.memory_space<vmem>>, vector<384x384xbf16>
    %cst_32 = arith.constant dense<0.000000e+00> : vector<8x384xf32>
    %44 = tpu.matmul %42, %43, %cst_32 {dimension_numbers = #tpu.dot_dimension_numbers<[1], [0], [0], [1], [0, 0, 1, 1], [], []>} : vector<8x384xbf16>, vector<384x384xbf16>, vector<8x384xf32> -> vector<8x384xf32>
    %c0_33 = arith.constant 0 : index
    %c0_34 = arith.constant 0 : index
    %45 = vector.load %arg13[%c0_33, %c0_34] : memref<1x384xf32, #tpu.memory_space<vmem>>, vector<1x384xf32>
    %46 = vector.broadcast %45 : vector<1x384xf32> to vector<8x384xf32>
    %47 = arith.addf %44, %46 : vector<8x384xf32>
    %cst_35 = arith.constant 0.000000e+00 : f32
    %48 = vector.broadcast %cst_35 : f32 to vector<8x384xf32>
    %49 = arith.maximumf %47, %48 : vector<8x384xf32>
    %50 = arith.truncf %49 : vector<8x384xf32> to vector<8x384xbf16>
    %c0_36 = arith.constant 0 : index
    %c0_37 = arith.constant 0 : index
    %51 = vector.load %arg14[%c0_36, %c0_37] : memref<384x8xbf16, #tpu.memory_space<vmem>>, vector<384x8xbf16>
    %cst_38 = arith.constant dense<0.000000e+00> : vector<8x8xf32>
    %52 = tpu.matmul %50, %51, %cst_38 {dimension_numbers = #tpu.dot_dimension_numbers<[1], [0], [0], [1], [0, 0, 1, 1], [], []>} : vector<8x384xbf16>, vector<384x8xbf16>, vector<8x8xf32> -> vector<8x8xf32>
    %c0_39 = arith.constant 0 : index
    %c0_40 = arith.constant 0 : index
    %53 = vector.load %arg15[%c0_39, %c0_40] : memref<1x8xf32, #tpu.memory_space<vmem>>, vector<1x8xf32>
    %54 = vector.broadcast %53 : vector<1x8xf32> to vector<8x8xf32>
    %55 = arith.addf %52, %54 : vector<8x8xf32>
    %cst_41 = arith.constant dense<0xFF800000> : vector<8xf32>
    %56 = vector.multi_reduction <maximumf>, %55, %cst_41 [1] : vector<8x8xf32> to vector<8xf32>
    %57 = vector.shape_cast %56 : vector<8xf32> to vector<8x1xf32>
    %58 = vector.broadcast %57 : vector<8x1xf32> to vector<8x8xf32>
    %59 = arith.subf %55, %58 : vector<8x8xf32>
    %60 = math.exp %59 : vector<8x8xf32>
    %cst_42 = arith.constant dense<0.000000e+00> : vector<8xf32>
    %61 = vector.multi_reduction <add>, %60, %cst_42 [1] : vector<8x8xf32> to vector<8xf32>
    %62 = vector.shape_cast %61 : vector<8xf32> to vector<8x1xf32>
    %63 = tpu.reciprocal %62 {approx = true} : vector<8x1xf32> -> vector<8x1xf32>
    %64 = arith.mulf %62, %63 : vector<8x1xf32>
    %cst_43 = arith.constant 2.000000e+00 : f32
    %65 = vector.broadcast %cst_43 : f32 to vector<8x1xf32>
    %66 = arith.subf %65, %64 : vector<8x1xf32>
    %67 = arith.mulf %63, %66 : vector<8x1xf32>
    %68 = vector.broadcast %67 : vector<8x1xf32> to vector<8x8xf32>
    %69 = arith.mulf %60, %68 : vector<8x8xf32>
    %c0_44 = arith.constant 0 : index
    %c0_45 = arith.constant 0 : index
    %70 = vector.load %arg16[%c0_44, %c0_45] : memref<8x8xf32, #tpu.memory_space<vmem>>, vector<8x8xf32>
    tpu.vector_store %arg16[%c0_44, %c0_45], %69 {strides = array<i32>} : memref<8x8xf32, #tpu.memory_space<vmem>>, vector<8x8xf32>,
    return
  }
  func.func @transform_0(%arg0: i32) -> (i32, i32) {
    %c0_i32 = arith.constant 0 : i32
    %c0_i32_0 = arith.constant 0 : i32
    return %arg0, %c0_i32 : i32, i32
  }
  func.func @transform_1(%arg0: i32) -> (i32, i32) {
    %c0_i32 = arith.constant 0 : i32
    %c0_i32_0 = arith.constant 0 : i32
    %c0_i32_1 = arith.constant 0 : i32
    return %c0_i32, %c0_i32_0 : i32, i32
  }
  func.func @transform_2(%arg0: i32) -> (i32, i32) {
    %c0_i32 = arith.constant 0 : i32
    %c0_i32_0 = arith.constant 0 : i32
    %c0_i32_1 = arith.constant 0 : i32
    return %c0_i32, %c0_i32_0 : i32, i32
  }
  func.func @transform_3(%arg0: i32) -> (i32, i32) {
    %c0_i32 = arith.constant 0 : i32
    %c0_i32_0 = arith.constant 0 : i32
    %c0_i32_1 = arith.constant 0 : i32
    return %c0_i32, %c0_i32_0 : i32, i32
  }
  func.func @transform_4(%arg0: i32) -> (i32, i32) {
    %c0_i32 = arith.constant 0 : i32
    %c0_i32_0 = arith.constant 0 : i32
    %c0_i32_1 = arith.constant 0 : i32
    return %c0_i32, %c0_i32_0 : i32, i32
  }
  func.func @transform_5(%arg0: i32) -> (i32, i32) {
    %c0_i32 = arith.constant 0 : i32
    %c0_i32_0 = arith.constant 0 : i32
    %c0_i32_1 = arith.constant 0 : i32
    return %c0_i32, %c0_i32_0 : i32, i32
  }
  func.func @transform_6(%arg0: i32) -> (i32, i32) {
    %c0_i32 = arith.constant 0 : i32
    %c0_i32_0 = arith.constant 0 : i32
    %c0_i32_1 = arith.constant 0 : i32
    return %c0_i32, %c0_i32_0 : i32, i32
  }
  func.func @transform_7(%arg0: i32) -> (i32, i32) {
    %c0_i32 = arith.constant 0 : i32
    %c0_i32_0 = arith.constant 0 : i32
    %c0_i32_1 = arith.constant 0 : i32
    return %c0_i32, %c0_i32_0 : i32, i32
  }
  func.func @transform_8(%arg0: i32) -> (i32, i32) {
    %c0_i32 = arith.constant 0 : i32
    %c0_i32_0 = arith.constant 0 : i32
    %c0_i32_1 = arith.constant 0 : i32
    return %c0_i32, %c0_i32_0 : i32, i32
  }
  func.func @transform_9(%arg0: i32) -> (i32, i32) {
    %c0_i32 = arith.constant 0 : i32
    %c0_i32_0 = arith.constant 0 : i32
    %c0_i32_1 = arith.constant 0 : i32
    return %c0_i32, %c0_i32_0 : i32, i32
  }
  func.func @transform_10(%arg0: i32) -> (i32, i32) {
    %c0_i32 = arith.constant 0 : i32
    %c0_i32_0 = arith.constant 0 : i32
    %c0_i32_1 = arith.constant 0 : i32
    return %c0_i32, %c0_i32_0 : i32, i32
  }
  func.func @transform_11(%arg0: i32) -> (i32, i32) {
    %c0_i32 = arith.constant 0 : i32
    %c0_i32_0 = arith.constant 0 : i32
    %c0_i32_1 = arith.constant 0 : i32
    return %c0_i32, %c0_i32_0 : i32, i32
  }
  func.func @transform_12(%arg0: i32) -> (i32, i32) {
    %c0_i32 = arith.constant 0 : i32
    %c0_i32_0 = arith.constant 0 : i32
    %c0_i32_1 = arith.constant 0 : i32
    return %c0_i32, %c0_i32_0 : i32, i32
  }
  func.func @transform_13(%arg0: i32) -> (i32, i32) {
    %c0_i32 = arith.constant 0 : i32
    %c0_i32_0 = arith.constant 0 : i32
    %c0_i32_1 = arith.constant 0 : i32
    return %c0_i32, %c0_i32_0 : i32, i32
  }
  func.func @transform_14(%arg0: i32) -> (i32, i32) {
    %c0_i32 = arith.constant 0 : i32
    %c0_i32_0 = arith.constant 0 : i32
    %c0_i32_1 = arith.constant 0 : i32
    return %c0_i32, %c0_i32_0 : i32, i32
  }
  func.func @transform_15(%arg0: i32) -> (i32, i32) {
    %c0_i32 = arith.constant 0 : i32
    %c0_i32_0 = arith.constant 0 : i32
    return %arg0, %c0_i32 : i32, i32
  }
}

</mosaic_0001>

<bundles_post_ra>
// kernel: model_forward.1
= control target key start
LH: loop header
LB: loop body
LE: loop exit
PB: predicated region body
PF: predicated region fallthrough
CT: control target
= control target key end

     0   :  { %20 = vsyncpa [#allocation3], 0  ;;  %s6213_s0 = inlined_call_operand.vmem [shape: f32[8,128], index: 0, kind: input, shape index: {}]   ;;  %s6214_s1 = inlined_call_operand.hbm [shape: bf16[128,384], index: 1, kind: input, shape index: {}]   ;;  %s6215_s2 = inlined_call_operand.vmem [shape: f32[1,384], index: 2, kind: input, shape index: {}]   ;;  %s6216_s3 = inlined_call_operand.hbm [shape: bf16[384,384], index: 3, kind: input, shape index: {}]   ;;  %s6217_s4 = inlined_call_operand.vmem [shape: f32[1,384], index: 4, kind: input, shape index: {}]   ;;  %s6218_s5 = inlined_call_operand.hbm [shape: bf16[384,384], index: 5, kind: input, shape index: {}]   ;;  %s6219_s6 = inlined_call_operand.vmem [shape: f32[1,384], index: 6, kind: input, shape index: {}]   ;;  %s6220_s7 = inlined_call_operand.hbm [shape: bf16[384,384], index: 7, kind: input, shape index: {}]   ;;  %s6221_s8 = inlined_call_operand.vmem [shape: f32[1,384], index: 8, kind: input, shape index: {}]   ;;  %s6222_s9 = inlined_call_operand.hbm [shape: bf16[384,384], index: 9, kind: input, shape index: {}]   ;;  %s6223_s10 = inlined_call_operand.vmem [shape: f32[1,384], index: 10, kind: input, shape index: {}]   ;;  %s6224_s11 = inlined_call_operand.hbm [shape: bf16[384,384], index: 11, kind: input, shape index: {}]   ;;  %s6225_s12 = inlined_call_operand.vmem [shape: f32[1,384], index: 12, kind: input, shape index: {}]   ;;  %s6226_s13 = inlined_call_operand.hbm [shape: bf16[384,8], index: 13, kind: input, shape index: {}]   ;;  %s6227_s14 = inlined_call_operand.vmem [shape: f32[1,8], index: 14, kind: input, shape index: {}]   ;;  %s6228_s15 = inlined_call_operand.hbm [shape: f32[8,8], index: 15, kind: output, shape index: {}]  }
   0x1   :  { %21 = vsyncpa [#allocation6], 0 }
   0x2   :  { %22 = vsyncpa [#allocation9], 0 }
   0x3   :  { %23 = vsyncpa [#allocation12], 0 }
   0x4   :  { %24 = vsyncpa [#allocation4], 0  ;;  %s46_s20 = sshll.u32 %s6216_s3, 4  ;;  %s5963_s21 = smov [#allocation5]   ;;  %s47_s20 = int_to_ptr.hbm [resolvable:$true] %s46_s20 }
   0x5   :  { %s48_s22 = sshll.u32 %s5963_s21, 4  ;;  %s76_s25 = sshll.u32 %s6220_s7, 4  ;;  %s49_s22 = int_to_ptr.vmem [resolvable:$true] %s48_s22  ;;  %s77_s25 = int_to_ptr.hbm [resolvable:$true] %s76_s25 }
   0x6   :  { %s5964_s26 = smov 192   ;;  %s5965_s27 = smov 12  }
   0x7   :  { %54 = dma.hbm_to_vmem [thread:$0]  %s47_s20, 9216, %s49_s22, [#allocation6], %s5964_s26, %s5964_s26, %s5965_s27  }
   0x8   :  { %s5966_s28 = smov [#allocation8]   ;;  %s106_s3 = sshll.u32 %s6224_s11, 4  ;;  %s107_s3 = int_to_ptr.hbm [resolvable:$true] %s106_s3 }
   0x9   :  { %s78_s29 = sshll.u32 %s5966_s28, 4  ;;  %s31_s18 = sshll.u32 %s6214_s1, 4  ;;  %s79_s29 = int_to_ptr.vmem [resolvable:$true] %s78_s29  ;;  %s32_s18 = int_to_ptr.hbm [resolvable:$true] %s31_s18 }
   0xa   :  { %84 = dma.hbm_to_vmem [thread:$0]  %s77_s25, 9216, %s79_s29, [#allocation9], %s5964_s26, %s5964_s26, %s5965_s27  }
   0xb   :  { %s5967_s19 = smov [#allocation11]   ;;  %s5968_s20 = smov [#allocation2]  }
   0xc   :  { %s108_s21 = sshll.u32 %s5967_s19, 4  ;;  %s33_s11 = sshll.u32 %s5968_s20, 4  ;;  %s109_s21 = int_to_ptr.vmem [resolvable:$true] %s108_s21  ;;  %s34_s11 = int_to_ptr.vmem [resolvable:$true] %s33_s11 }
   0xd   :  { %114 = dma.hbm_to_vmem [thread:$0]  %s107_s3, 9216, %s109_s21, [#allocation12], %s5964_s26, %s5964_s26, %s5965_s27  }
   0xe   :  { %s61_s24 = sshll.u32 %s6218_s5, 4  ;;  %s91_s28 = sshll.u32 %s6222_s9, 4  ;;  %s62_s24 = int_to_ptr.hbm [resolvable:$true] %s61_s24  ;;  %s92_s28 = int_to_ptr.hbm [resolvable:$true] %s91_s28 }
   0xf   :  { %39 = dma.hbm_to_vmem [thread:$0]  %s32_s18, 3072, %s34_s11, [#allocation3], %s5964_s26, %s5964_s26, %s5965_s27  }
  0x10   :  { %s5969_s29 = smov [#allocation7]   ;;  %s5970_s16 = smov [#allocation10]  }
  0x11   :  { %s63_s30 = sshll.u32 %s5969_s29, 4  ;;  %s93_s5 = sshll.u32 %s5970_s16, 4  ;;  %s64_s30 = int_to_ptr.vmem [resolvable:$true] %s63_s30  ;;  %s94_s5 = int_to_ptr.vmem [resolvable:$true] %s93_s5 }
  0x12   :  { %69 = dma.hbm_to_vmem [thread:$0]  %s62_s24, 9216, %s64_s30, [#allocation6], %s5964_s26, %s5964_s26, %s5965_s27  }
  0x13   :  { %s121_s17 = sshll.u32 %s6226_s13, 4  ;;  %s5971_s9 = smov [#allocation13]   ;;  %s122_s17 = int_to_ptr.hbm [resolvable:$true] %s121_s17 }
  0x14   :  { %99 = dma.hbm_to_vmem [thread:$0]  %s92_s28, 9216, %s94_s5, [#allocation9], %s5964_s26, %s5964_s26, %s5965_s27  }
  0x15   :  { %s123_s18 = sshll.u32 %s5971_s9, 4  ;;  %s5972_s19 = smov 64   ;;  %s124_s18 = int_to_ptr.vmem [resolvable:$true] %s123_s18 }
  0x16   :  { %s5973_s21 = smov 4  }
  0x17   :  { %129 = dma.hbm_to_vmem [thread:$0]  %s122_s17, 3072, %s124_s18, [#allocation12], %s5972_s19, %s5972_s19, %s5973_s21  }
  0x18   :  { %5953 = dma.done.wait [#allocation3], 3072  }
  0x19   :  { %5954 = vsyncadd [#allocation3], 4294964224 }
  0x1a   :  { %5955 = dma.done.wait [#allocation6], 18432  }
  0x1b   :  { %5956 = vsyncadd [#allocation6], 4294948864 }
  0x1c   :  { %5957 = dma.done.wait [#allocation9], 18432  }
  0x1d   :  { %5958 = vsyncadd [#allocation9], 4294948864 }
  0x1e   :  { %5959 = dma.done.wait [#allocation12], 12288  }
  0x1f   :  { %5960 = vsyncadd [#allocation12], 4294955008  ;;  %v3790_v0 = vld [vmem:[#allocation2 + $0xa8] sm:$0xf]  ;;  %v5358_v1 = vld [vmem:[#allocation2 + $0xb0] sm:$0xf0] }
  0x20   :  { %v5357_v2 = vld [vmem:[#allocation2 + $0xac] sm:$0xf]  ;;  %v3791_v3 = vor.u32 %v5358_v1, %v3790_v0  ;;  %v3792_v4 = vld [vmem:[#allocation2 + $0xb4] sm:$0xf0]  ;;  %v3798_v5 = vld [vmem:[#allocation2 + $0xb0] sm:$0xf] }
  0x21   :  { %v5359_v6 = vld [vmem:[#allocation2 + $0xb8] sm:$0xf0]  ;;  %v3795_v7 = vor.u32 %v5357_v2, %v3792_v4  ;;  %v3778_v9 = vld [vmem:[#allocation2 + $0x90] sm:$0xf]  ;;  %v5354_v11 = vld [vmem:[#allocation2 + $0x94] sm:$0xf] }
  0x22   :  { %v3799_v8 = vor.u32 %v5359_v6, %v3798_v5  ;;  %v5355_v10 = vld [vmem:[#allocation2 + $0x98] sm:$0xf0]  ;;  %330 = vmatpush.bf16.msra.mxu0 %v3791_v3  ;;  %v3780_v13 = vld [vmem:[#allocation2 + $0x9c] sm:$0xf0]  ;;  %v3786_v14 = vld [vmem:[#allocation2 + $0x98] sm:$0xf] }
  0x23   :  { %v3779_v12 = vor.u32 %v5355_v10, %v3778_v9  ;;  %v5356_v15 = vld [vmem:[#allocation2 + $0xa0] sm:$0xf0]  ;;  %343 = vmatpush.bf16.msra.mxu1 %v3795_v7  ;;  %v3783_v16 = vor.u32 %v5354_v11, %v3780_v13  ;;  %v3766_v18 = vld [vmem:[#allocation2 + $0x78] sm:$0xf]  ;;  %v5351_v20 = vld [vmem:[#allocation2 + $0x7c] sm:$0xf] }
  0x24   :  { %356 = vmatpush.bf16.msra.mxu2 %v3799_v8  ;;  %v3787_v17 = vor.u32 %v5356_v15, %v3786_v14  ;;  %v5352_v19 = vld [vmem:[#allocation2 + $0x80] sm:$0xf0]  ;;  %v3768_v21 = vld [vmem:[#allocation2 + $0x84] sm:$0xf0]  ;;  %v3774_v22 = vld [vmem:[#allocation2 + $0x80] sm:$0xf] }
  0x25   :  { %v5353_v23 = vld [vmem:[#allocation2 + $0x88] sm:$0xf0]  ;;  %v3767_v24 = vor.u32 %v5352_v19, %v3766_v18  ;;  %v3771_v25 = vor.u32 %v5351_v20, %v3768_v21  ;;  %v3754_v27 = vld [vmem:[#allocation2 + $0x60] sm:$0xf]  ;;  %v5348_v29 = vld [vmem:[#allocation2 + $0x64] sm:$0xf] }
  0x26   :  { %331 = vmatpush.bf16.msra.mxu0 %v3779_v12  ;;  %v3775_v26 = vor.u32 %v5353_v23, %v3774_v22  ;;  %v5349_v28 = vld [vmem:[#allocation2 + $0x68] sm:$0xf0]  ;;  %v3756_v30 = vld [vmem:[#allocation2 + $0x6c] sm:$0xf0]  ;;  %v3762_v31 = vld [vmem:[#allocation2 + $0x68] sm:$0xf] }
  0x27   :  { %344 = vmatpush.bf16.msra.mxu1 %v3783_v16  ;;  %v5350_v32 = vld [vmem:[#allocation2 + $0x70] sm:$0xf0]  ;;  %v3755_v33 = vor.u32 %v5349_v28, %v3754_v27  ;;  %v3759_v34 = vor.u32 %v5348_v29, %v3756_v30  ;;  %v3742_v36 = vld [vmem:[#allocation2 + $0x48] sm:$0xf]  ;;  %v5345_v38 = vld [vmem:[#allocation2 + $0x4c] sm:$0xf] }
  0x28   :  { %357 = vmatpush.bf16.msra.mxu2 %v3787_v17  ;;  %v3763_v35 = vor.u32 %v5350_v32, %v3762_v31  ;;  %v5346_v37 = vld [vmem:[#allocation2 + $0x50] sm:$0xf0]  ;;  %v3744_v39 = vld [vmem:[#allocation2 + $0x54] sm:$0xf0]  ;;  %v3750_v40 = vld [vmem:[#allocation2 + $0x50] sm:$0xf] }
  0x29   :  { %v5347_v41 = vld [vmem:[#allocation2 + $0x58] sm:$0xf0]  ;;  %v3730_v42 = vld [vmem:[#allocation2 + $0x30] sm:$0xf]  ;;  %v3743_v43 = vor.u32 %v5346_v37, %v3742_v36  ;;  %v5342_v45 = vld [vmem:[#allocation2 + $0x34] sm:$0xf]  ;;  %v3747_v47 = vor.u32 %v5345_v38, %v3744_v39 }
  0x2a   :  { %332 = vmatpush.bf16.msra.mxu0 %v3767_v24  ;;  %v5343_v44 = vld [vmem:[#allocation2 + $0x38] sm:$0xf0]  ;;  %v3732_v46 = vld [vmem:[#allocation2 + $0x3c] sm:$0xf0]  ;;  %v3751_v48 = vor.u32 %v5347_v41, %v3750_v40  ;;  %v3738_v49 = vld [vmem:[#allocation2 + $0x38] sm:$0xf] }
  0x2b   :  { %345 = vmatpush.bf16.msra.mxu1 %v3771_v25  ;;  %v3886_v50 = vld [vmem:[#allocation5 + $0xa8] sm:$0xf]  ;;  %v5382_v51 = vld [vmem:[#allocation5 + $0xb0] sm:$0xf0]  ;;  %v5344_v52 = vld [vmem:[#allocation2 + $0x40] sm:$0xf0]  ;;  %v3731_v56 = vor.u32 %v5343_v44, %v3730_v42  ;;  %v3735_v60 = vor.u32 %v5342_v45, %v3732_v46 }
  0x2c   :  { %358 = vmatpush.bf16.msra.mxu2 %v3775_v26  ;;  %v3887_v53 = vor.u32 %v5382_v51, %v3886_v50  ;;  %v3874_v54 = vld [vmem:[#allocation5 + $0x90] sm:$0xf]  ;;  %v5379_v55 = vld [vmem:[#allocation5 + $0x98] sm:$0xf0]  ;;  %v3718_v57 = vld [vmem:[#allocation2 + $0x18] sm:$0xf]  ;;  %v3739_v61 = vor.u32 %v5344_v52, %v3738_v49 }
  0x2d   :  { %v5340_v58 = vld [vmem:[#allocation2 + $0x20] sm:$0xf0]  ;;  %v3875_v59 = vor.u32 %v5379_v55, %v3874_v54  ;;  %v5339_v62 = vld [vmem:[#allocation2 + $0x1c] sm:$0xf]  ;;  %v3862_v63 = vld [vmem:[#allocation5 + $0x78] sm:$0xf] }
  0x2e   :  { %333 = vmatpush.bf16.msra.mxu0 %v3755_v33  ;;  %863 = vmatpush.bf16.msra.mxu3 %v3887_v53  ;;  %v5376_v0 = vld [vmem:[#allocation5 + $0x80] sm:$0xf0]  ;;  %v3720_v1 = vld [vmem:[#allocation2 + $0x24] sm:$0xf0]  ;;  %v3726_v2 = vld [vmem:[#allocation2 + $0x20] sm:$0xf]  ;;  %v3719_v4 = vor.u32 %v5340_v58, %v3718_v57 }
  0x2f   :  { %346 = vmatpush.bf16.msra.mxu1 %v3759_v34  ;;  %v5341_v3 = vld [vmem:[#allocation2 + $0x28] sm:$0xf0]  ;;  %v3706_v5 = vld [vmem:[#allocation2] sm:$0xf]  ;;  %v5336_v7 = vld [vmem:[#allocation2 + $0x4] sm:$0xf]  ;;  %v3863_v8 = vor.u32 %v5376_v0, %v3862_v63  ;;  %v3723_v9 = vor.u32 %v5339_v62, %v3720_v1 }
  0x30   :  { %359 = vmatpush.bf16.msra.mxu2 %v3763_v35  ;;  %v5337_v6 = vld [vmem:[#allocation2 + $0x8] sm:$0xf0]  ;;  %v3727_v10 = vor.u32 %v5341_v3, %v3726_v2  ;;  %v3708_v11 = vld [vmem:[#allocation2 + $0xc] sm:$0xf0]  ;;  %v3850_v12 = vld [vmem:[#allocation5 + $0x60] sm:$0xf] }
  0x31   :  { %v5373_v13 = vld [vmem:[#allocation5 + $0x68] sm:$0xf0]  ;;  %v3714_v14 = vld [vmem:[#allocation2 + $0x8] sm:$0xf]  ;;  %v5338_v15 = vld [vmem:[#allocation2 + $0x10] sm:$0xf0]  ;;  %v3707_v20 = vor.u32 %v5337_v6, %v3706_v5  ;;  %v3711_v25 = vor.u32 %v5336_v7, %v3708_v11 }
  0x32   :  { %334 = vmatpush.bf16.msra.mxu0 %v3743_v43  ;;  %864 = vmatpush.bf16.msra.mxu3 %v3875_v59  ;;  %v3982_v16 = vld [vmem:[#allocation5 + $0x168] sm:$0xf]  ;;  %v5406_v17 = vld [vmem:[#allocation5 + $0x170] sm:$0xf0]  ;;  %v5381_v18 = vld [vmem:[#allocation5 + $0xac] sm:$0xf]  ;;  %v3851_v22 = vor.u32 %v5373_v13, %v3850_v12  ;;  %v3715_v26 = vor.u32 %v5338_v15, %v3714_v14 }
  0x33   :  { %347 = vmatpush.bf16.msra.mxu1 %v3747_v47  ;;  %v3888_v19 = vld [vmem:[#allocation5 + $0xb4] sm:$0xf0]  ;;  %v160_v21 = vld [vmem:[%s6213_s0] sm:$0xff]  ;;  %v4078_v23 = vld [vmem:[#allocation5 + $0x228] sm:$0xf]  ;;  %v3983_v27 = vor.u32 %v5406_v17, %v3982_v16  ;;  %vm3668_vm0 = vcmask 64512  }
  0x34   :  { %360 = vmatpush.bf16.msra.mxu2 %v3751_v48  ;;  %v5430_v24 = vld [vmem:[#allocation5 + $0x230] sm:$0xf0]  ;;  %v3891_v28 = vor.u32 %v5381_v18, %v3888_v19  ;;  %v3838_v29 = vld [vmem:[#allocation5 + $0x48] sm:$0xf]  ;;  %v3970_v31 = vld [vmem:[#allocation5 + $0x150] sm:$0xf]  ;;  %v161_v32 = vpack.c.bf16 %v160_v21, %v160_v21 }
  0x35   :  { %v5370_v30 = vld [vmem:[#allocation5 + $0x50] sm:$0xf0]  ;;  %v5403_v33 = vld [vmem:[#allocation5 + $0x158] sm:$0xf0]  ;;  %v3876_v35 = vld [vmem:[#allocation5 + $0x9c] sm:$0xf0]  ;;  %v4079_v36 = vor.u32 %v5430_v24, %v4078_v23 }
  0x36   :  { %335 = vmatpush.bf16.msra.mxu0 %v3731_v56  ;;  %865 = vmatpush.bf16.msra.mxu3 %v3863_v8  ;;  %v5378_v34 = vld [vmem:[#allocation5 + $0x94] sm:$0xf]  ;;  %v4066_v37 = vld [vmem:[#allocation5 + $0x210] sm:$0xf]  ;;  %v5427_v38 = vld [vmem:[#allocation5 + $0x218] sm:$0xf0]  ;;  %v3839_v39 = vor.u32 %v5370_v30, %v3838_v29  ;;  %v3971_v40 = vor.u32 %v5403_v33, %v3970_v31 }
  0x37   :  { %348 = vmatpush.bf16.msra.mxu1 %v3735_v60  ;;  %v3879_v41 = vor.u32 %v5378_v34, %v3876_v35  ;;  %v3826_v42 = vld [vmem:[#allocation5 + $0x30] sm:$0xf]  ;;  %v5367_v43 = vld [vmem:[#allocation5 + $0x38] sm:$0xf0]  ;;  %v3958_v44 = vld [vmem:[#allocation5 + $0x138] sm:$0xf]  ;;  %v4067_v48 = vor.u32 %v5427_v38, %v4066_v37 }
  0x38   :  { %361 = vmatpush.bf16.msra.mxu2 %v3739_v61  ;;  %v5400_v45 = vld [vmem:[#allocation5 + $0x140] sm:$0xf0]  ;;  %v5375_v46 = vld [vmem:[#allocation5 + $0x7c] sm:$0xf]  ;;  %v3864_v47 = vld [vmem:[#allocation5 + $0x84] sm:$0xf0]  ;;  %v3827_v51 = vor.u32 %v5367_v43, %v3826_v42 }
  0x39   :  { %v4054_v49 = vld [vmem:[#allocation5 + $0x1f8] sm:$0xf]  ;;  %v5424_v50 = vld [vmem:[#allocation5 + $0x200] sm:$0xf0]  ;;  %v3959_v52 = vor.u32 %v5400_v45, %v3958_v44  ;;  %v3867_v53 = vor.u32 %v5375_v46, %v3864_v47  ;;  %v3946_v56 = vld [vmem:[#allocation5 + $0x120] sm:$0xf] }
  0x3a   :  { %336 = vmatpush.bf16.msra.mxu0 %v3719_v4  ;;  %866 = vmatpush.bf16.msra.mxu3 %v3851_v22  ;;  %v3814_v54 = vld [vmem:[#allocation5 + $0x18] sm:$0xf]  ;;  %v5364_v55 = vld [vmem:[#allocation5 + $0x20] sm:$0xf0]  ;;  %v5397_v57 = vld [vmem:[#allocation5 + $0x128] sm:$0xf0]  ;;  %v4055_v60 = vor.u32 %v5424_v50, %v4054_v49 }
  0x3b   :  { %349 = vmatpush.bf16.msra.mxu1 %v3723_v9  ;;  %v5372_v58 = vld [vmem:[#allocation5 + $0x64] sm:$0xf]  ;;  %v3852_v59 = vld [vmem:[#allocation5 + $0x6c] sm:$0xf0]  ;;  %v4042_v61 = vld [vmem:[#allocation5 + $0x1e0] sm:$0xf]  ;;  %v3815_v63 = vor.u32 %v5364_v55, %v3814_v54  ;;  %v3947_v1 = vor.u32 %v5397_v57, %v3946_v56 }
  0x3c   :  { %362 = vmatpush.bf16.msra.mxu2 %v3727_v10  ;;  %v5421_v62 = vld [vmem:[#allocation5 + $0x1e8] sm:$0xf0]  ;;  %v3802_v0 = vld [vmem:[#allocation5] sm:$0xf]  ;;  %v3855_v2 = vor.u32 %v5372_v58, %v3852_v59  ;;  %v3934_v4 = vld [vmem:[#allocation5 + $0x108] sm:$0xf] }
  0x3d   :  { %v5361_v3 = vld [vmem:[#allocation5 + $0x8] sm:$0xf0]  ;;  %v5394_v5 = vld [vmem:[#allocation5 + $0x110] sm:$0xf0]  ;;  %v3840_v7 = vld [vmem:[#allocation5 + $0x54] sm:$0xf0]  ;;  %v4043_v9 = vor.u32 %v5421_v62, %v4042_v61 }
  0x3e   :  { %337 = vmatpush.bf16.msra.mxu0 %v3707_v20  ;;  %867 = vmatpush.bf16.msra.mxu3 %v3839_v39  ;;  %v5369_v6 = vld [vmem:[#allocation5 + $0x4c] sm:$0xf]  ;;  %v3984_v10 = vld [vmem:[#allocation5 + $0x174] sm:$0xf0]  ;;  %v4030_v11 = vld [vmem:[#allocation5 + $0x1c8] sm:$0xf]  ;;  %v3803_v13 = vor.u32 %v5361_v3, %v3802_v0  ;;  %v3935_v14 = vor.u32 %v5394_v5, %v3934_v4 }
  0x3f   :  { %350 = vmatpush.bf16.msra.mxu1 %v3711_v25  ;;  %v5405_v8 = vld [vmem:[#allocation5 + $0x16c] sm:$0xf]  ;;  %v5418_v12 = vld [vmem:[#allocation5 + $0x1d0] sm:$0xf0]  ;;  %v3843_v15 = vor.u32 %v5369_v6, %v3840_v7  ;;  %v3922_v16 = vld [vmem:[#allocation5 + $0xf0] sm:$0xf] }
  0x40   :  { %363 = vmatpush.bf16.msra.mxu2 %v3715_v26  ;;  %v5391_v17 = vld [vmem:[#allocation5 + $0xf8] sm:$0xf0]  ;;  %v3987_v18 = vor.u32 %v5405_v8, %v3984_v10  ;;  %v5366_v19 = vld [vmem:[#allocation5 + $0x34] sm:$0xf]  ;;  %v3828_v20 = vld [vmem:[#allocation5 + $0x3c] sm:$0xf0]  ;;  %v4031_v22 = vor.u32 %v5418_v12, %v4030_v11 }
  0x41   :  { %338 = vmatmul.bf16.vlgmr.msra.gmra.mxu0 %v161_v32  ;;  %v5402_v21 = vld [vmem:[#allocation5 + $0x154] sm:$0xf]  ;;  %v3972_v23 = vld [vmem:[#allocation5 + $0x15c] sm:$0xf0]  ;;  %v4018_v24 = vld [vmem:[#allocation5 + $0x1b0] sm:$0xf]  ;;  %v3923_v26 = vor.u32 %v5391_v17, %v3922_v16 }
  0x42   :  { %876 = vmatpush.bf16.msrb.mxu0 %v3983_v27  ;;  %351 = vmatmul.bf16.vlgmr.msra.gmra.mxu1 %v161_v32  ;;  %v5415_v25 = vld [vmem:[#allocation5 + $0x1b8] sm:$0xf0]  ;;  %v3831_v27 = vor.u32 %v5366_v19, %v3828_v20  ;;  %v5388_v29 = vld [vmem:[#allocation5 + $0xe0] sm:$0xf0]  ;;  %v3975_v30 = vor.u32 %v5402_v21, %v3972_v23  ;;  %v3960_v35 = vld [vmem:[#allocation5 + $0x144] sm:$0xf0] }
  0x43   :  { %889 = vmatpush.bf16.msrb.mxu1 %v4079_v36  ;;  %364 = vmatmul.bf16.vlgmr.msra.gmra.mxu2 %v161_v32  ;;  %v5363_v31 = vld [vmem:[#allocation5 + $0x1c] sm:$0xf]  ;;  %v3816_v32 = vld [vmem:[#allocation5 + $0x24] sm:$0xf0]  ;;  %v4019_v34 = vor.u32 %v5415_v25, %v4018_v24  ;;  %v4006_v36 = vld [vmem:[#allocation5 + $0x198] sm:$0xf] }
  0x44   :  { %902 = vmatpush.bf16.msrb.mxu2 %v3891_v28  ;;  %868 = vmatpush.bf16.msra.mxu3 %v3827_v51  ;;  %v3910_v28 = vld [vmem:[#allocation5 + $0xd8] sm:$0xf]  ;;  %v5399_v33 = vld [vmem:[#allocation5 + $0x13c] sm:$0xf]  ;;  %v5412_v37 = vld [vmem:[#allocation5 + $0x1a0] sm:$0xf0]  ;;  %v3819_v39 = vor.u32 %v5363_v31, %v3816_v32 }
  0x45   :  { %v3911_v38 = vor.u32 %v5388_v29, %v3910_v28  ;;  %v5360_v42 = vld [vmem:[#allocation5 + $0x4] sm:$0xf]  ;;  %v3963_v43 = vor.u32 %v5399_v33, %v3960_v35  ;;  %v3804_v44 = vld [vmem:[#allocation5 + $0xc] sm:$0xf0]  ;;  %v4007_v47 = vor.u32 %v5412_v37, %v4006_v36  ;;  %v4080_v49 = vld [vmem:[#allocation5 + $0x234] sm:$0xf0] }
  0x46   :  { %877 = vmatpush.bf16.msrb.mxu0 %v3971_v40  ;;  %v3898_v40 = vld [vmem:[#allocation5 + $0xc0] sm:$0xf]  ;;  %v5396_v45 = vld [vmem:[#allocation5 + $0x124] sm:$0xf]  ;;  %v3948_v46 = vld [vmem:[#allocation5 + $0x12c] sm:$0xf0]  ;;  %v3807_v55 = vor.u32 %v5360_v42, %v3804_v44 }
  0x47   :  { %890 = vmatpush.bf16.msrb.mxu1 %v4067_v48  ;;  %v5429_v48 = vld [vmem:[#allocation5 + $0x22c] sm:$0xf]  ;;  %v3990_v50 = vld [vmem:[#allocation5 + $0x170] sm:$0xf]  ;;  %v5407_v51 = vld [vmem:[#allocation5 + $0x178] sm:$0xf0]  ;;  %v3951_v58 = vor.u32 %v5396_v45, %v3948_v46 }
  0x48   :  { %903 = vmatpush.bf16.msrb.mxu2 %v3879_v41  ;;  %869 = vmatpush.bf16.msra.mxu3 %v3815_v63  ;;  %v5385_v41 = vld [vmem:[#allocation5 + $0xc8] sm:$0xf0]  ;;  %v3894_v56 = vld [vmem:[#allocation5 + $0xb0] sm:$0xf]  ;;  %v5383_v57 = vld [vmem:[#allocation5 + $0xb8] sm:$0xf0]  ;;  %v4083_v59 = vor.u32 %v5429_v48, %v4080_v49  ;;  %v3991_v61 = vor.u32 %v5407_v51, %v3990_v50 }
  0x49   :  { %v3899_v54 = vor.u32 %v5385_v41, %v3898_v40  ;;  %v3936_v62 = vld [vmem:[#allocation5 + $0x114] sm:$0xf0]  ;;  %v5426_v63 = vld [vmem:[#allocation5 + $0x214] sm:$0xf]  ;;  %v4068_v0 = vld [vmem:[#allocation5 + $0x21c] sm:$0xf0]  ;;  %v3895_v4 = vor.u32 %v5383_v57, %v3894_v56 }
  0x4a   :  { %878 = vmatpush.bf16.msrb.mxu0 %v3959_v52  ;;  %v3994_v52 = vld [vmem:[#allocation5 + $0x180] sm:$0xf]  ;;  %v5404_v3 = vld [vmem:[#allocation5 + $0x160] sm:$0xf0]  ;;  %v4071_v6 = vor.u32 %v5426_v63, %v4068_v0  ;;  %v5390_v8 = vld [vmem:[#allocation5 + $0xf4] sm:$0xf] }
  0x4b   :  { %891 = vmatpush.bf16.msrb.mxu1 %v4055_v60  ;;  %v5393_v60 = vld [vmem:[#allocation5 + $0x10c] sm:$0xf]  ;;  %v5423_v11 = vld [vmem:[#allocation5 + $0x1fc] sm:$0xf]  ;;  %v4056_v12 = vld [vmem:[#allocation5 + $0x204] sm:$0xf0] }
  0x4c   :  { %904 = vmatpush.bf16.msrb.mxu2 %v3867_v53  ;;  %870 = vmatpush.bf16.msra.mxu3 %v3803_v13  ;;  %v5409_v53 = vld [vmem:[#allocation5 + $0x188] sm:$0xf0]  ;;  %v3939_v5 = vor.u32 %v5393_v60, %v3936_v62  ;;  %v3966_v13 = vld [vmem:[#allocation5 + $0x140] sm:$0xf]  ;;  %v3882_v17 = vld [vmem:[#allocation5 + $0x98] sm:$0xf] }
  0x4d   :  { %v5387_v20 = vld [vmem:[#allocation5 + $0xdc] sm:$0xf]  ;;  %v3912_v21 = vld [vmem:[#allocation5 + $0xe4] sm:$0xf0]  ;;  %v5420_v23 = vld [vmem:[#allocation5 + $0x1e4] sm:$0xf] }
  0x4e   :  { %879 = vmatpush.bf16.msrb.mxu0 %v3947_v1  ;;  %v3995_v1 = vor.u32 %v5409_v53, %v3994_v52  ;;  %v4044_v24 = vld [vmem:[#allocation5 + $0x1ec] sm:$0xf0]  ;;  %v3954_v25 = vld [vmem:[#allocation5 + $0x128] sm:$0xf]  ;;  %v3870_v29 = vld [vmem:[#allocation5 + $0x80] sm:$0xf] }
  0x4f   :  { %892 = vmatpush.bf16.msrb.mxu1 %v4043_v9  ;;  %v3924_v9 = vld [vmem:[#allocation5 + $0xfc] sm:$0xf0]  ;;  %v5384_v32 = vld [vmem:[#allocation5 + $0xc4] sm:$0xf]  ;;  %v3900_v33 = vld [vmem:[#allocation5 + $0xcc] sm:$0xf0] }
  0x50   :  { %905 = vmatpush.bf16.msrb.mxu2 %v3855_v2  ;;  %915 = vmatpush.bf16.msrb.mxu3 %v3987_v18  ;;  %v3978_v2 = vld [vmem:[#allocation5 + $0x158] sm:$0xf]  ;;  %v3927_v10 = vor.u32 %v5390_v8, %v3924_v9  ;;  %v5380_v18 = vld [vmem:[#allocation5 + $0xa0] sm:$0xf0]  ;;  %v5417_v35 = vld [vmem:[#allocation5 + $0x1cc] sm:$0xf] }
  0x51   :  { %v3979_v7 = vor.u32 %v5404_v3, %v3978_v2  ;;  %v3883_v19 = vor.u32 %v5380_v18, %v3882_v17  ;;  %v4032_v36 = vld [vmem:[#allocation5 + $0x1d4] sm:$0xf0]  ;;  %v3858_v41 = vld [vmem:[#allocation5 + $0x68] sm:$0xf]  ;;  %v5374_v42 = vld [vmem:[#allocation5 + $0x70] sm:$0xf0] }
  0x52   :  { %880 = vmatpush.bf16.msrb.mxu0 %v3935_v14  ;;  %v4059_v14 = vor.u32 %v5423_v11, %v4056_v12  ;;  %v4035_v37 = vor.u32 %v5417_v35, %v4032_v36  ;;  %v5414_v44 = vld [vmem:[#allocation5 + $0x1b4] sm:$0xf]  ;;  %v4020_v45 = vld [vmem:[#allocation5 + $0x1bc] sm:$0xf0]  ;;  %v3930_v46 = vld [vmem:[#allocation5 + $0xf8] sm:$0xf] }
  0x53   :  { %893 = vmatpush.bf16.msrb.mxu1 %v4031_v22  ;;  %v3915_v22 = vor.u32 %v5387_v20, %v3912_v21  ;;  %v5392_v48 = vld [vmem:[#allocation5 + $0x100] sm:$0xf0]  ;;  %v3846_v50 = vld [vmem:[#allocation5 + $0x50] sm:$0xf]  ;;  %v5371_v51 = vld [vmem:[#allocation5 + $0x58] sm:$0xf0] }
  0x54   :  { %906 = vmatpush.bf16.msrb.mxu2 %v3843_v15  ;;  %916 = vmatpush.bf16.msrb.mxu3 %v3975_v30  ;;  %v5401_v15 = vld [vmem:[#allocation5 + $0x148] sm:$0xf0]  ;;  %v3931_v49 = vor.u32 %v5392_v48, %v3930_v46  ;;  %v3847_v52 = vor.u32 %v5371_v51, %v3846_v50  ;;  %v5411_v53 = vld [vmem:[#allocation5 + $0x19c] sm:$0xf]  ;;  %v5368_v60 = vld [vmem:[#allocation5 + $0x40] sm:$0xf0] }
  0x55   :  { %v3967_v16 = vor.u32 %v5401_v15, %v3966_v13  ;;  %v5377_v30 = vld [vmem:[#allocation5 + $0x88] sm:$0xf0]  ;;  %v3996_v63 = vld [vmem:[#allocation5 + $0x18c] sm:$0xf0]  ;;  %v3906_v0 = vld [vmem:[#allocation5 + $0xc8] sm:$0xf] }
  0x56   :  { %881 = vmatpush.bf16.msrb.mxu0 %v3923_v26  ;;  %v4047_v26 = vor.u32 %v5420_v23, %v4044_v24  ;;  %v3871_v31 = vor.u32 %v5377_v30, %v3870_v29  ;;  %v5389_v57 = vld [vmem:[#allocation5 + $0xe8] sm:$0xf0]  ;;  %v5362_v8 = vld [vmem:[#allocation5 + $0x10] sm:$0xf0]  ;;  %v5431_v17 = vld [vmem:[#allocation5 + $0x238] sm:$0xf0] }
  0x57   :  { %894 = vmatpush.bf16.msrb.mxu1 %v4019_v34  ;;  %v3903_v34 = vor.u32 %v5384_v32, %v3900_v33  ;;  %v4074_v24 = vld [vmem:[#allocation5 + $0x218] sm:$0xf]  ;;  %v5454_v29 = vld [vmem:[#allocation7 + $0xb0] sm:$0xf0]  ;;  %v4162_v30 = vld [vmem:[#allocation7 + $0x90] sm:$0xf] }
  0x58   :  { %907 = vmatpush.bf16.msrb.mxu2 %v3831_v27  ;;  %917 = vmatpush.bf16.msrb.mxu3 %v3963_v43  ;;  %v5398_v27 = vld [vmem:[#allocation5 + $0x130] sm:$0xf0]  ;;  %v3859_v43 = vor.u32 %v5374_v42, %v3858_v41  ;;  %v5451_v35 = vld [vmem:[#allocation7 + $0x98] sm:$0xf0]  ;;  %v4150_v41 = vld [vmem:[#allocation7 + $0x78] sm:$0xf] }
  0x59   :  { %v3955_v28 = vor.u32 %v5398_v27, %v3954_v25  ;;  %v5428_v25 = vld [vmem:[#allocation5 + $0x220] sm:$0xf0]  ;;  %v5422_v46 = vld [vmem:[#allocation5 + $0x1f0] sm:$0xf0]  ;;  %v5445_v50 = vld [vmem:[#allocation7 + $0x68] sm:$0xf0] }
  0x5a   :  { %882 = vmatpush.bf16.msrb.mxu0 %v3911_v38  ;;  %v3942_v38 = vld [vmem:[#allocation5 + $0x110] sm:$0xf]  ;;  %v4075_v33 = vor.u32 %v5428_v25, %v4074_v24  ;;  %v5448_v42 = vld [vmem:[#allocation7 + $0x80] sm:$0xf0]  ;;  %v5433_v24 = vld [vmem:[#allocation7 + $0x8] sm:$0xf0] }
  0x5b   :  { %895 = vmatpush.bf16.msrb.mxu1 %v4007_v47  ;;  %v4023_v47 = vor.u32 %v5414_v44, %v4020_v45  ;;  %v4050_v45 = vld [vmem:[#allocation5 + $0x1e8] sm:$0xf]  ;;  %s3691_s30 = sshll.u32 %s6228_s15, 4  ;;  %s3692_s30 = int_to_ptr.hbm [resolvable:$true] %s3691_s30 }
  0x5c   :  { %908 = vmatpush.bf16.msrb.mxu2 %v3819_v39  ;;  %918 = vmatpush.bf16.msrb.mxu3 %v3951_v58  ;;  %v5395_v39 = vld [vmem:[#allocation5 + $0x118] sm:$0xf0]  ;;  %v4051_v51 = vor.u32 %v5422_v46, %v4050_v45 }
  0x5d   :  { %v3943_v40 = vor.u32 %v5395_v39, %v3942_v38  ;;  %v5425_v38 = vld [vmem:[#allocation5 + $0x208] sm:$0xf0] }
  0x5e   :  { %883 = vmatpush.bf16.msrb.mxu0 %v3899_v54  ;;  %v4008_v54 = vld [vmem:[#allocation5 + $0x1a4] sm:$0xf0] }
  0x5f   :  { %896 = vmatpush.bf16.msrb.mxu1 %v3995_v1  ;;  %v4011_v56 = vor.u32 %v5411_v53, %v4008_v54  ;;  %v5386_v1 = vld [vmem:[#allocation5 + $0xd0] sm:$0xf0]  ;;  %v5419_v53 = vld [vmem:[#allocation5 + $0x1d8] sm:$0xf0]  ;;  %v4270_v54 = vld [vmem:[#allocation7 + $0x168] sm:$0xf] }
  0x60   :  { %909 = vmatpush.bf16.msrb.mxu2 %v3807_v55  ;;  %919 = vmatpush.bf16.msrb.mxu3 %v3939_v5  ;;  %v3918_v55 = vld [vmem:[#allocation5 + $0xe0] sm:$0xf]  ;;  %v3907_v3 = vor.u32 %v5386_v1, %v3906_v0  ;;  %v5365_v5 = vld [vmem:[#allocation5 + $0x28] sm:$0xf0]  ;;  %v5475_v1 = vld [vmem:[#allocation7 + $0x158] sm:$0xf0] }
  0x61   :  { %v3919_v58 = vor.u32 %v5389_v57, %v3918_v55  ;;  %v5478_v55 = vld [vmem:[#allocation7 + $0x170] sm:$0xf0] }
  0x62   :  { %928 = vmatpush.bf16.msra.mxu0 %v4083_v59  ;;  %v3834_v59 = vld [vmem:[#allocation5 + $0x38] sm:$0xf]  ;;  %v4271_v57 = vor.u32 %v5478_v55, %v4270_v54  ;;  %v4234_v55 = vld [vmem:[#allocation7 + $0x120] sm:$0xf] }
  0x63   :  { %941 = vmatpush.bf16.msra.mxu1 %v3895_v4  ;;  %v3835_v62 = vor.u32 %v5368_v60, %v3834_v59  ;;  %v3822_v4 = vld [vmem:[#allocation5 + $0x20] sm:$0xf]  ;;  %v5442_v59 = vld [vmem:[#allocation7 + $0x50] sm:$0xf0] }
  0x64   :  { %954 = vmatpush.bf16.msra.mxu2 %v3991_v61  ;;  %920 = vmatpush.bf16.msrb.mxu3 %v3927_v10  ;;  %v5408_v61 = vld [vmem:[#allocation5 + $0x184] sm:$0xf]  ;;  %v194_v10 = vld [vmem:[%s6215_s2] sm:$0x7] }
  0x65   :  { %v3999_v2 = vor.u32 %v5408_v61, %v3996_v63  ;;  %v196_v11 = vperm.slane %v194_v10, 0  ;;  %v197_v12 = vperm.slane %v194_v10, 1  ;;  %v198_v21 = vperm.slane %v194_v10, 2  ;;  %v4026_v61 = vld [vmem:[#allocation5 + $0x1b8] sm:$0xf] }
  0x66   :  { %929 = vmatpush.bf16.msra.mxu0 %v4071_v6  ;;  %v3823_v6 = vor.u32 %v5365_v5, %v3822_v4  ;;  %v4258_v63 = vld [vmem:[#allocation7 + $0x150] sm:$0xf]  ;;  %v5472_v10 = vld [vmem:[#allocation7 + $0x140] sm:$0xf0] }
  0x67   :  { %942 = vmatpush.bf16.msra.mxu1 %v3883_v19  ;;  %v4259_v4 = vor.u32 %v5475_v1, %v4258_v63  ;;  %v5468_v63 = vld [vmem:[#allocation7 + $0x124] sm:$0xf] }
  0x68   :  { %955 = vmatpush.bf16.msra.mxu2 %v3979_v7  ;;  %921 = vmatpush.bf16.msrb.mxu3 %v3915_v22  ;;  %v3810_v7 = vld [vmem:[#allocation5 + $0x8] sm:$0xf] }
  0x69   :  { %v3811_v9 = vor.u32 %v5362_v8, %v3810_v7  ;;  %v5413_v7 = vld [vmem:[#allocation5 + $0x1a8] sm:$0xf0]  ;;  %v4246_v8 = vld [vmem:[#allocation7 + $0x138] sm:$0xf] }
  0x6a   :  { %930 = vmatpush.bf16.msra.mxu0 %v4059_v14 }
  0x6b   :  { %943 = vmatpush.bf16.msra.mxu1 %v3871_v31 }
  0x6c   :  { %956 = vmatpush.bf16.msra.mxu2 %v3967_v16  ;;  %922 = vmatpush.bf16.msrb.mxu3 %v3903_v34  ;;  %v4086_v16 = vld [vmem:[#allocation5 + $0x230] sm:$0xf] }
  0x6d   :  { %v4087_v22 = vor.u32 %v5431_v17, %v4086_v16  ;;  %v5410_v16 = vld [vmem:[#allocation5 + $0x190] sm:$0xf0]  ;;  %v5453_v17 = vld [vmem:[#allocation7 + $0xac] sm:$0xf] }
  0x6e   :  { %931 = vmatpush.bf16.msra.mxu0 %v4047_v26 }
  0x6f   :  { %944 = vmatpush.bf16.msra.mxu1 %v3859_v43 }
  0x70   :  { %957 = vmatpush.bf16.msra.mxu2 %v3955_v28  ;;  %v4174_v28 = vld [vmem:[#allocation7 + $0xa8] sm:$0xf] }
  0x71   :  { %v4175_v34 = vor.u32 %v5454_v29, %v4174_v28  ;;  %v5450_v29 = vld [vmem:[#allocation7 + $0x94] sm:$0xf] }
  0x72   :  { %932 = vmatpush.bf16.msra.mxu0 %v4035_v37  ;;  %v4062_v37 = vld [vmem:[#allocation5 + $0x200] sm:$0xf] }
  0x73   :  { %945 = vmatpush.bf16.msra.mxu1 %v3847_v52  ;;  %v4063_v44 = vor.u32 %v5425_v38, %v4062_v37  ;;  %v4038_v52 = vld [vmem:[#allocation5 + $0x1d0] sm:$0xf]  ;;  %v5471_v38 = vld [vmem:[#allocation7 + $0x13c] sm:$0xf] }
  0x74   :  { %958 = vmatpush.bf16.msra.mxu2 %v3943_v40  ;;  %v4163_v40 = vor.u32 %v5451_v35, %v4162_v30  ;;  %v4039_v60 = vor.u32 %v5419_v53, %v4038_v52  ;;  %v4164_v30 = vld [vmem:[#allocation7 + $0x9c] sm:$0xf0]  ;;  %v5447_v35 = vld [vmem:[#allocation7 + $0x7c] sm:$0xf]  ;;  %v4104_v53 = vld [vmem:[#allocation7 + $0x24] sm:$0xf0] }
  0x75   :  { %v5435_v52 = vld [vmem:[#allocation7 + $0x1c] sm:$0xf] }
  0x76   :  { %933 = vmatpush.bf16.msra.mxu0 %v4023_v47  ;;  %v4151_v47 = vor.u32 %v5448_v42, %v4150_v41  ;;  %v5444_v42 = vld [vmem:[#allocation7 + $0x64] sm:$0xf]  ;;  %v4107_v54 = vor.u32 %v5435_v52, %v4104_v53  ;;  %v5490_v52 = vld [vmem:[#allocation7 + $0x1d0] sm:$0xf0] }
  0x77   :  { %946 = vmatpush.bf16.msra.mxu1 %v3835_v62  ;;  %v5416_v62 = vld [vmem:[#allocation5 + $0x1c0] sm:$0xf0] }
  0x78   :  { %959 = vmatpush.bf16.msra.mxu2 %v3931_v49  ;;  %v4138_v49 = vld [vmem:[#allocation7 + $0x60] sm:$0xf]  ;;  %v4027_v5 = vor.u32 %v5416_v62, %v4026_v61  ;;  %v4092_v62 = vld [vmem:[#allocation7 + $0xc] sm:$0xf0]  ;;  %v5456_v53 = vld [vmem:[#allocation7 + $0xc4] sm:$0xf] }
  0x7a   :  { %934 = vmatpush.bf16.msra.mxu0 %v4011_v56  ;;  %v4139_v56 = vor.u32 %v5445_v50, %v4138_v49  ;;  %v5438_v50 = vld [vmem:[#allocation7 + $0x34] sm:$0xf] }
  0x7b   :  { %947 = vmatpush.bf16.msra.mxu1 %v3823_v6  ;;  %v4014_v6 = vld [vmem:[#allocation5 + $0x1a0] sm:$0xf] }
  0x7c   :  { %960 = vmatpush.bf16.msra.mxu2 %v3919_v58  ;;  %v4126_v58 = vld [vmem:[#allocation7 + $0x48] sm:$0xf] }
  0x7d   :  { %v4127_v0 = vor.u32 %v5442_v59, %v4126_v58  ;;  %v4366_v58 = vld [vmem:[#allocation7 + $0x228] sm:$0xf]  ;;  %v5502_v59 = vld [vmem:[#allocation7 + $0x230] sm:$0xf0] }
  0x7e   :  { %935 = vmatpush.bf16.msra.mxu0 %v3999_v2  ;;  %v4114_v2 = vld [vmem:[#allocation7 + $0x30] sm:$0xf]  ;;  %v4367_v61 = vor.u32 %v5502_v59, %v4366_v58 }
  0x7f   :  { %948 = vmatpush.bf16.msra.mxu1 %v3811_v9 }
  0x80   :  { %961 = vmatpush.bf16.msra.mxu2 %v3907_v3  ;;  %v5439_v3 = vld [vmem:[#allocation7 + $0x38] sm:$0xf0] }
  0x81   :  { %v4115_v9 = vor.u32 %v5439_v3, %v4114_v2  ;;  %v4278_v3 = vld [vmem:[#allocation7 + $0x170] sm:$0xf] }
  0xbe   :  { %v339_v13 = vpop.f32.mrf.mxu0 }
  0xbf   :  { %v340_v14 = vadd.f32 %v339_v13, %v196_v11  ;;  %v352_v15 = vpop.f32.mrf.mxu1  ;;  %v4102_v11 = vld [vmem:[#allocation7 + $0x18] sm:$0xf]  ;;  %v4247_v13 = vor.u32 %v5472_v10, %v4246_v8  ;;  %v5499_v10 = vld [vmem:[#allocation7 + $0x218] sm:$0xf0] }
  0xc0   :  { %v353_v18 = vadd.f32 %v352_v15, %v197_v12  ;;  %v5436_v12 = vld [vmem:[#allocation7 + $0x20] sm:$0xf0]  ;;  %v4002_v15 = vld [vmem:[#allocation5 + $0x188] sm:$0xf] }
  0xc1   :  { %v6100_v19 = vmax.f32 %v340_v14, 0.0  ;;  %v4015_v14 = vor.u32 %v5413_v7, %v4014_v6  ;;  %v4003_v25 = vor.u32 %v5410_v16, %v4002_v15  ;;  %v5466_v7 = vld [vmem:[#allocation7 + $0x110] sm:$0xf0]  ;;  %v4266_v15 = vld [vmem:[#allocation7 + $0x158] sm:$0xf] }
  0xc2   :  { %v6102_v20 = vmax.f32 %v353_v18, 0.0  ;;  %v4176_v18 = vld [vmem:[#allocation7 + $0xb4] sm:$0xf0]  ;;  %v5476_v16 = vld [vmem:[#allocation7 + $0x160] sm:$0xf0] }
  0xc3   :  { %v6106_v23 = vpack.c.bf16 %v6100_v19, %v6100_v19  ;;  %v4179_v28 = vor.u32 %v5453_v17, %v4176_v18  ;;  %v4210_v17 = vld [vmem:[#allocation7 + $0xf0] sm:$0xf]  ;;  %v4267_v18 = vor.u32 %v5476_v16, %v4266_v15 }
  0xc4   :  { %v373_v26 = vpack.c.bf16 %v6102_v20, %v6102_v20  ;;  %v4332_v15 = vld [vmem:[#allocation7 + $0x1ec] sm:$0xf0] }
  0xc5   :  { %871 = vmatmul.bf16.vlgmr.msra.gmra.mxu3 %v6106_v23  ;;  %910 = vmatmul.bf16.vlgmr.msrb.gmra.mxu2 %v6106_v23 }
  0xc6   :  { %v365_v27 = vpop.f32.mrf.mxu2  ;;  %884 = vmatmul.bf16.vlgmr.msrb.gmra.mxu0 %v373_v26  ;;  %v341_v32 = vpop.f32.mrf.mxu0  ;;  %967 = vmatpush.bf16.msra.mxu3 %v4087_v22  ;;  %v4090_v22 = vld [vmem:[#allocation7] sm:$0xf] }
  0xc7   :  { %v366_v31 = vadd.f32 %v365_v27, %v198_v21  ;;  %v354_v36 = vpop.f32.mrf.mxu1  ;;  %1477 = vmatpush.bf16.msrb.mxu0 %v4175_v34  ;;  %v4103_v21 = vor.u32 %v5436_v12, %v4102_v11  ;;  %v4272_v27 = vld [vmem:[#allocation7 + $0x174] sm:$0xf0]  ;;  %v4260_v34 = vld [vmem:[#allocation7 + $0x15c] sm:$0xf0]  ;;  %1503 = vmatpush.bf16.msrb.mxu2 %v4367_v61  ;;  %v5465_v12 = vld [vmem:[#allocation7 + $0x10c] sm:$0xf] }
  0xc8   :  { %v4152_v36 = vld [vmem:[#allocation7 + $0x84] sm:$0xf0]  ;;  %v4356_v61 = vld [vmem:[#allocation7 + $0x21c] sm:$0xf0] }
  0xc9   :  { %v6112_v39 = vmax.f32 %v366_v31, 0.0  ;;  %v4091_v31 = vor.u32 %v5433_v24, %v4090_v22  ;;  %v4155_v41 = vor.u32 %v5447_v35, %v4152_v36  ;;  %v4342_v24 = vld [vmem:[#allocation7 + $0x1f8] sm:$0xf]  ;;  %v4330_v35 = vld [vmem:[#allocation7 + $0x1e0] sm:$0xf] }
  0xca   :  { %968 = vmatpush.bf16.msra.mxu3 %v4075_v33  ;;  %v5474_v33 = vld [vmem:[#allocation7 + $0x154] sm:$0xf]  ;;  %v5493_v36 = vld [vmem:[#allocation7 + $0x1e8] sm:$0xf0] }
  0xcb   :  { %v6116_v43 = vpack.c.bf16 %v6112_v39, %v6112_v39  ;;  %1478 = vmatpush.bf16.msrb.mxu0 %v4163_v40  ;;  %v4263_v37 = vor.u32 %v5474_v33, %v4260_v34  ;;  %v4248_v40 = vld [vmem:[#allocation7 + $0x144] sm:$0xf0]  ;;  %v4198_v33 = vld [vmem:[#allocation7 + $0xd8] sm:$0xf]  ;;  %v5460_v34 = vld [vmem:[#allocation7 + $0xe0] sm:$0xf0] }
  0xcc   :  { %v4251_v45 = vor.u32 %v5471_v38, %v4248_v40  ;;  %v4331_v38 = vor.u32 %v5493_v36, %v4330_v35  ;;  %v4200_v40 = vld [vmem:[#allocation7 + $0xe4] sm:$0xf0] }
  0xcd   :  { %897 = vmatmul.bf16.vlgmr.msrb.gmra.mxu1 %v6116_v43 }
  0xce   :  { %v367_v48 = vpop.f32.mrf.mxu2  ;;  %969 = vmatpush.bf16.msra.mxu3 %v4063_v44  ;;  %1490 = vmatpush.bf16.msrb.mxu1 %v4271_v57  ;;  %v4140_v44 = vld [vmem:[#allocation7 + $0x6c] sm:$0xf0] }
  0xcf   :  { %1479 = vmatpush.bf16.msrb.mxu0 %v4151_v47  ;;  %v4143_v46 = vor.u32 %v5444_v42, %v4140_v44  ;;  %v5441_v47 = vld [vmem:[#allocation7 + $0x4c] sm:$0xf]  ;;  %v4128_v48 = vld [vmem:[#allocation7 + $0x54] sm:$0xf0]  ;;  %v5470_v42 = vld [vmem:[#allocation7 + $0x130] sm:$0xf0] }
  0xd0   :  { %v4131_v49 = vor.u32 %v5441_v47, %v4128_v48  ;;  %v5457_v47 = vld [vmem:[#allocation7 + $0xc8] sm:$0xf0] }
  0xd2   :  { %970 = vmatpush.bf16.msra.mxu3 %v4051_v51  ;;  %1491 = vmatpush.bf16.msrb.mxu1 %v4259_v4  ;;  %v4116_v51 = vld [vmem:[#allocation7 + $0x3c] sm:$0xf0]  ;;  %v5479_v4 = vld [vmem:[#allocation7 + $0x178] sm:$0xf0] }
  0xd3   :  { %1480 = vmatpush.bf16.msrb.mxu0 %v4139_v56  ;;  %v5469_v56 = vld [vmem:[#allocation7 + $0x128] sm:$0xf0]  ;;  %v4279_v6 = vor.u32 %v5479_v4, %v4278_v3  ;;  %v5464_v3 = vld [vmem:[#allocation7 + $0x100] sm:$0xf0] }
  0xd4   :  { %v4235_v57 = vor.u32 %v5469_v56, %v4234_v55  ;;  %v4188_v55 = vld [vmem:[#allocation7 + $0xcc] sm:$0xf0] }
  0xd5   :  { %923 = vmatmul.bf16.vlgmr.msrb.gmra.mxu3 %v373_v26  ;;  %962 = vmatmul.bf16.vlgmr.msra.gmra.mxu2 %v373_v26  ;;  %v5477_v26 = vld [vmem:[#allocation7 + $0x16c] sm:$0xf]  ;;  %v4230_v56 = vld [vmem:[#allocation7 + $0x110] sm:$0xf]  ;;  %v4191_v58 = vor.u32 %v5456_v53, %v4188_v55  ;;  %v4146_v53 = vld [vmem:[#allocation7 + $0x68] sm:$0xf] }
  0xd6   :  { %936 = vmatmul.bf16.vlgmr.msra.gmra.mxu0 %v6116_v43  ;;  %971 = vmatpush.bf16.msra.mxu3 %v4039_v60  ;;  %v4275_v32 = vor.u32 %v5477_v26, %v4272_v27  ;;  %v5432_v60 = vld [vmem:[#allocation7 + $0x4] sm:$0xf]  ;;  %v5462_v26 = vld [vmem:[#allocation7 + $0xf4] sm:$0xf] }
  0xd7   :  { %1481 = vmatpush.bf16.msrb.mxu0 %v4127_v0  ;;  %1492 = vmatpush.bf16.msrb.mxu1 %v4247_v13  ;;  %v4236_v0 = vld [vmem:[#allocation7 + $0x12c] sm:$0xf0]  ;;  %v4095_v1 = vor.u32 %v5432_v60, %v4092_v62  ;;  %v4224_v13 = vld [vmem:[#allocation7 + $0x114] sm:$0xf0]  ;;  %v5498_v60 = vld [vmem:[#allocation7 + $0x214] sm:$0xf] }
  0xd8   :  { %v4239_v2 = vor.u32 %v5468_v63, %v4236_v0  ;;  %v4359_v62 = vor.u32 %v5498_v60, %v4356_v61  ;;  %v4306_v63 = vld [vmem:[#allocation7 + $0x1b0] sm:$0xf]  ;;  %v5487_v0 = vld [vmem:[#allocation7 + $0x1b8] sm:$0xf0] }
  0xd9   :  { %v4374_v60 = vld [vmem:[#allocation7 + $0x230] sm:$0xf]  ;;  %v5503_v61 = vld [vmem:[#allocation7 + $0x238] sm:$0xf0] }
  0xda   :  { %972 = vmatpush.bf16.msra.mxu3 %v4027_v5  ;;  %v4222_v5 = vld [vmem:[#allocation7 + $0x108] sm:$0xf] }
  0xdb   :  { %1482 = vmatpush.bf16.msrb.mxu0 %v4115_v9  ;;  %1493 = vmatpush.bf16.msrb.mxu1 %v4235_v57  ;;  %v4223_v8 = vor.u32 %v5466_v7, %v4222_v5  ;;  %v4354_v9 = vld [vmem:[#allocation7 + $0x210] sm:$0xf]  ;;  %v5467_v57 = vld [vmem:[#allocation7 + $0x118] sm:$0xf0] }
  0xdc   :  { %v4355_v11 = vor.u32 %v5499_v10, %v4354_v9  ;;  %v4231_v59 = vor.u32 %v5467_v57, %v4230_v56  ;;  %v5495_v5 = vld [vmem:[#allocation7 + $0x1fc] sm:$0xf]  ;;  %v5484_v9 = vld [vmem:[#allocation7 + $0x1a0] sm:$0xf0] }
  0xdd   :  { %949 = vmatmul.bf16.vlgmr.msra.gmra.mxu1 %v6106_v23  ;;  %v4167_v23 = vor.u32 %v5450_v29, %v4164_v30  ;;  %v4254_v29 = vld [vmem:[#allocation7 + $0x140] sm:$0xf]  ;;  %v5473_v30 = vld [vmem:[#allocation7 + $0x148] sm:$0xf0]  ;;  %v5480_v57 = vld [vmem:[#allocation7 + $0x184] sm:$0xf] }
  0xde   :  { %973 = vmatpush.bf16.msra.mxu3 %v4015_v14  ;;  %v4227_v14 = vor.u32 %v5465_v12, %v4224_v13  ;;  %1504 = vmatpush.bf16.msrb.mxu2 %v4355_v11  ;;  %v4206_v11 = vld [vmem:[#allocation7 + $0xe0] sm:$0xf]  ;;  %v5461_v12 = vld [vmem:[#allocation7 + $0xe8] sm:$0xf0] }
  0xdf   :  { %1483 = vmatpush.bf16.msrb.mxu0 %v4103_v21  ;;  %1494 = vmatpush.bf16.msrb.mxu1 %v4223_v8  ;;  %v5463_v21 = vld [vmem:[#allocation7 + $0xf8] sm:$0xf0]  ;;  %v4294_v8 = vld [vmem:[#allocation7 + $0x198] sm:$0xf]  ;;  %v4207_v13 = vor.u32 %v5461_v12, %v4206_v11  ;;  %v5500_v11 = vld [vmem:[#allocation7 + $0x220] sm:$0xf0] }
  0xe0   :  { %v4211_v22 = vor.u32 %v5463_v21, %v4210_v17  ;;  %v4295_v10 = vor.u32 %v5484_v9, %v4294_v8  ;;  %v4282_v17 = vld [vmem:[#allocation7 + $0x180] sm:$0xf]  ;;  %v4122_v12 = vld [vmem:[#allocation7 + $0x38] sm:$0xf] }
  0xe2   :  { %974 = vmatpush.bf16.msra.mxu3 %v4003_v25  ;;  %v5496_v25 = vld [vmem:[#allocation7 + $0x200] sm:$0xf0] }
  0xe3   :  { %1484 = vmatpush.bf16.msrb.mxu0 %v4091_v31  ;;  %v4343_v27 = vor.u32 %v5496_v25, %v4342_v24  ;;  %1495 = vmatpush.bf16.msrb.mxu1 %v4211_v22  ;;  %v4182_v22 = vld [vmem:[#allocation7 + $0xb0] sm:$0xf]  ;;  %v5455_v24 = vld [vmem:[#allocation7 + $0xb8] sm:$0xf0]  ;;  %v4194_v25 = vld [vmem:[#allocation7 + $0xc8] sm:$0xf] }
  0xe5   :  { %975 = vmatmul.bf16.vlgmr.msra.gmra.mxu3 %v6116_v43  ;;  %v4119_v43 = vor.u32 %v5438_v50, %v4116_v51  ;;  %1505 = vmatpush.bf16.msrb.mxu2 %v4343_v27  ;;  %v4368_v50 = vld [vmem:[#allocation7 + $0x234] sm:$0xf0]  ;;  %v5458_v27 = vld [vmem:[#allocation7 + $0xd0] sm:$0xf0] }
  0xe6   :  { %1516 = vmatpush.bf16.msrb.mxu3 %v4179_v28  ;;  %v4212_v28 = vld [vmem:[#allocation7 + $0xfc] sm:$0xf0] }
  0xe7   :  { %1529 = vmatpush.bf16.msra.mxu0 %v4275_v32  ;;  %v4215_v31 = vor.u32 %v5462_v26, %v4212_v28  ;;  %v4255_v32 = vor.u32 %v5473_v30, %v4254_v29  ;;  %v4183_v26 = vor.u32 %v5455_v24, %v4182_v22  ;;  %v6125_v28 = vld [vmem:[%s6217_s4] sm:$0x7]  ;;  %v4195_v29 = vor.u32 %v5458_v27, %v4194_v25  ;;  %v5489_v30 = vld [vmem:[#allocation7 + $0x1cc] sm:$0xf]  ;;  %v5434_v27 = vld [vmem:[#allocation7 + $0x10] sm:$0xf0] }
  0xe8   :  { %v473_v35 = vperm.slane %v6125_v28, 0  ;;  %v474_v8 = vperm.slane %v6125_v28, 1 }
  0xe9   :  { %1506 = vmatpush.bf16.msrb.mxu2 %v4331_v38  ;;  %v4308_v38 = vld [vmem:[#allocation7 + $0x1bc] sm:$0xf0] }
  0xea   :  { %1517 = vmatpush.bf16.msrb.mxu3 %v4167_v23  ;;  %v4199_v23 = vor.u32 %v5460_v34, %v4198_v33  ;;  %v4170_v34 = vld [vmem:[#allocation7 + $0x98] sm:$0xf] }
  0xeb   :  { %1530 = vmatpush.bf16.msra.mxu0 %v4263_v37  ;;  %v5459_v37 = vld [vmem:[#allocation7 + $0xdc] sm:$0xf] }
  0xec   :  { %1496 = vmatpush.bf16.msrb.mxu1 %v4199_v23  ;;  %v4203_v44 = vor.u32 %v5459_v37, %v4200_v40  ;;  %v5452_v23 = vld [vmem:[#allocation7 + $0xa0] sm:$0xf0]  ;;  %v5486_v37 = vld [vmem:[#allocation7 + $0x1b4] sm:$0xf] }
  0xed   :  { %v4171_v36 = vor.u32 %v5452_v23, %v4170_v34  ;;  %v4311_v40 = vor.u32 %v5486_v37, %v4308_v38  ;;  %v4338_v34 = vld [vmem:[#allocation7 + $0x1e8] sm:$0xf]  ;;  %v5494_v23 = vld [vmem:[#allocation7 + $0x1f0] sm:$0xf0] }
  0xee   :  { %1518 = vmatpush.bf16.msrb.mxu3 %v4155_v41  ;;  %v4242_v41 = vld [vmem:[#allocation7 + $0x128] sm:$0xf]  ;;  %v4339_v37 = vor.u32 %v5494_v23, %v4338_v34  ;;  %v4390_v34 = vld [vmem:[#allocation8 + $0x18] sm:$0xf]  ;;  %v5508_v23 = vld [vmem:[#allocation8 + $0x20] sm:$0xf0] }
  0xef   :  { %1531 = vmatpush.bf16.msra.mxu0 %v4251_v45  ;;  %v4243_v45 = vor.u32 %v5470_v42, %v4242_v41 }
  0xf2   :  { %1519 = vmatpush.bf16.msrb.mxu3 %v4143_v46  ;;  %v4186_v46 = vld [vmem:[#allocation7 + $0xc0] sm:$0xf] }
  0xf3   :  { %1532 = vmatpush.bf16.msra.mxu0 %v4239_v2  ;;  %v4187_v48 = vor.u32 %v5457_v47, %v4186_v46  ;;  %v4218_v2 = vld [vmem:[#allocation7 + $0xf8] sm:$0xf] }
  0xf4   :  { %v4219_v4 = vor.u32 %v5464_v3, %v4218_v2  ;;  %v5443_v2 = vld [vmem:[#allocation7 + $0x58] sm:$0xf0] }
  0xf5   :  { %1497 = vmatpush.bf16.msrb.mxu1 %v4187_v48 }
  0xf6   :  { %1520 = vmatpush.bf16.msrb.mxu3 %v4131_v49  ;;  %v5501_v49 = vld [vmem:[#allocation7 + $0x22c] sm:$0xf] }
  0xf7   :  { %1533 = vmatpush.bf16.msra.mxu0 %v4227_v14  ;;  %v4371_v51 = vor.u32 %v5501_v49, %v4368_v50  ;;  %v5492_v14 = vld [vmem:[#allocation7 + $0x1e4] sm:$0xf]  ;;  %v5483_v49 = vld [vmem:[#allocation7 + $0x19c] sm:$0xf]  ;;  %v4296_v50 = vld [vmem:[#allocation7 + $0x1a4] sm:$0xf0] }
  0xf8   :  { %v4335_v16 = vor.u32 %v5492_v14, %v4332_v15  ;;  %v5437_v15 = vld [vmem:[#allocation7 + $0x28] sm:$0xf0] }
  0xf9   :  { %1542 = vmatpush.bf16.msra.mxu1 %v4371_v51 }
  0xfa   :  { %1521 = vmatpush.bf16.msrb.mxu3 %v4119_v43  ;;  %v4318_v43 = vld [vmem:[#allocation7 + $0x1c8] sm:$0xf] }
  0xfb   :  { %1534 = vmatpush.bf16.msra.mxu0 %v4215_v31  ;;  %v4320_v31 = vld [vmem:[#allocation7 + $0x1d4] sm:$0xf0] }
  0xfc   :  { %v4323_v33 = vor.u32 %v5489_v30, %v4320_v31 }
  0xfd   :  { %1543 = vmatpush.bf16.msra.mxu1 %v4359_v62 }
  0xfe   :  { %1522 = vmatpush.bf16.msrb.mxu3 %v4107_v54  ;;  %v4319_v54 = vor.u32 %v5490_v52, %v4318_v43  ;;  %v4299_v52 = vor.u32 %v5483_v49, %v4296_v50  ;;  %v5526_v49 = vld [vmem:[#allocation8 + $0xb0] sm:$0xf0]  ;;  %v4450_v50 = vld [vmem:[#allocation8 + $0x90] sm:$0xf] }
  0xff   :  { %1535 = vmatpush.bf16.msra.mxu0 %v4203_v44  ;;  %v4158_v44 = vld [vmem:[#allocation7 + $0x80] sm:$0xf] }
 0x100   :  { %1507 = vmatpush.bf16.msrb.mxu2 %v4319_v54  ;;  %v5446_v54 = vld [vmem:[#allocation7 + $0x70] sm:$0xf0] }
 0x101   :  { %v4147_v56 = vor.u32 %v5446_v54, %v4146_v53  ;;  %v4314_v54 = vld [vmem:[#allocation7 + $0x1b8] sm:$0xf] }
 0x102   :  { %1523 = vmatpush.bf16.msrb.mxu3 %v4095_v1  ;;  %v4307_v1 = vor.u32 %v5487_v0, %v4306_v63 }
 0x103   :  { %1536 = vmatpush.bf16.msra.mxu0 %v4191_v58  ;;  %v4284_v58 = vld [vmem:[#allocation7 + $0x18c] sm:$0xf0] }
 0x104   :  { %1508 = vmatpush.bf16.msrb.mxu2 %v4307_v1  ;;  %v4287_v62 = vor.u32 %v5480_v57, %v4284_v58  ;;  %v4134_v1 = vld [vmem:[#allocation7 + $0x50] sm:$0xf] }
 0x106   :  { %1568 = vmatpush.bf16.msra.mxu3 %v4279_v6  ;;  %v4344_v6 = vld [vmem:[#allocation7 + $0x204] sm:$0xf0] }
 0x107   :  { %v4347_v7 = vor.u32 %v5495_v5, %v4344_v6  ;;  %v4135_v5 = vor.u32 %v5443_v2, %v4134_v1  ;;  %v4375_v6 = vor.u32 %v5503_v61, %v4374_v60  ;;  %v5485_v60 = vld [vmem:[#allocation7 + $0x1a8] sm:$0xf0] }
 0x108   :  { %1509 = vmatpush.bf16.msrb.mxu2 %v4295_v10  ;;  %v4362_v10 = vld [vmem:[#allocation7 + $0x218] sm:$0xf]  ;;  %v5517_v1 = vld [vmem:[#allocation8 + $0x68] sm:$0xf0] }
 0x109   :  { %1544 = vmatpush.bf16.msra.mxu1 %v4347_v7 }
 0x10a   :  { %1569 = vmatpush.bf16.msra.mxu3 %v4267_v18  ;;  %v5481_v18 = vld [vmem:[#allocation7 + $0x188] sm:$0xf0] }
 0x10b   :  { %v4283_v21 = vor.u32 %v5481_v18, %v4282_v17  ;;  %v4350_v18 = vld [vmem:[#allocation7 + $0x200] sm:$0xf] }
 0x10d   :  { %1545 = vmatpush.bf16.msra.mxu1 %v4335_v16  ;;  %1510 = vmatpush.bf16.msrb.mxu2 %v4283_v21  ;;  %v4363_v16 = vor.u32 %v5500_v11, %v4362_v10  ;;  %v5497_v21 = vld [vmem:[#allocation7 + $0x208] sm:$0xf0] }
 0x10e   :  { %1570 = vmatpush.bf16.msra.mxu3 %v4255_v32  ;;  %v4351_v31 = vor.u32 %v5497_v21, %v4350_v18  ;;  %v5550_v18 = vld [vmem:[#allocation8 + $0x170] sm:$0xf0] }
 0x10f   :  { %v5522_v21 = vld [vmem:[#allocation8 + $0x94] sm:$0xf] }
 0x111   :  { %1555 = vmatpush.bf16.msra.mxu2 %v4183_v26  ;;  %1546 = vmatpush.bf16.msra.mxu1 %v4323_v33  ;;  %v4098_v26 = vld [vmem:[#allocation7 + $0x8] sm:$0xf] }
 0x112   :  { %1571 = vmatpush.bf16.msra.mxu3 %v4243_v45  ;;  %v5449_v45 = vld [vmem:[#allocation7 + $0x88] sm:$0xf0] }
 0x113   :  { %v4159_v48 = vor.u32 %v5449_v45, %v4158_v44 }
 0x115   :  { %1556 = vmatpush.bf16.msra.mxu2 %v4171_v36  ;;  %1547 = vmatpush.bf16.msra.mxu1 %v4311_v40  ;;  %v475_v40 = vperm.slane %v6125_v28, 2 }
 0x116   :  { %1572 = vmatpush.bf16.msra.mxu3 %v4231_v59 }
 0x119   :  { %1557 = vmatpush.bf16.msra.mxu2 %v4159_v48  ;;  %1548 = vmatpush.bf16.msra.mxu1 %v4299_v52  ;;  %v4462_v48 = vld [vmem:[#allocation8 + $0xa8] sm:$0xf]  ;;  %v5523_v52 = vld [vmem:[#allocation8 + $0x98] sm:$0xf0] }
 0x11a   :  { %1573 = vmatpush.bf16.msra.mxu3 %v4219_v4  ;;  %v4451_v28 = vor.u32 %v5523_v52, %v4450_v50  ;;  %v4560_v52 = vld [vmem:[#allocation8 + $0x174] sm:$0xf0] }
 0x11d   :  { %1558 = vmatpush.bf16.msra.mxu2 %v4147_v56  ;;  %1549 = vmatpush.bf16.msra.mxu1 %v4287_v62  ;;  %v5520_v56 = vld [vmem:[#allocation8 + $0x80] sm:$0xf0] }
 0x11e   :  { %1574 = vmatpush.bf16.msra.mxu3 %v4207_v13  ;;  %v5440_v13 = vld [vmem:[#allocation7 + $0x40] sm:$0xf0] }
 0x11f   :  { %v4123_v14 = vor.u32 %v5440_v13, %v4122_v12 }
 0x121   :  { %1559 = vmatpush.bf16.msra.mxu2 %v4135_v5  ;;  %v5482_v5 = vld [vmem:[#allocation7 + $0x190] sm:$0xf0] }
 0x122   :  { %1575 = vmatpush.bf16.msra.mxu3 %v4195_v29 }
 0x125   :  { %1560 = vmatpush.bf16.msra.mxu2 %v4123_v14 }
 0x143   :  { %v885_v32 = vpop.f32.mrf.mxu0 }
 0x148   :  { %v872_v41 = vpop.f32.mrf.mxu3  ;;  %v911_v42 = vpop.f32.mrf.mxu2 }
 0x149   :  { %v873_v46 = vadd.f32 %v872_v41, %v473_v35  ;;  %v912_v17 = vadd.f32 %v911_v42, %v474_v8  ;;  %v4099_v35 = vor.u32 %v5434_v27, %v4098_v26  ;;  %v4326_v41 = vld [vmem:[#allocation7 + $0x1d0] sm:$0xf]  ;;  %v5491_v42 = vld [vmem:[#allocation7 + $0x1d8] sm:$0xf0]  ;;  %v5525_v8 = vld [vmem:[#allocation8 + $0xac] sm:$0xf] }
 0x14a   :  { %v898_v47 = vpop.f32.mrf.mxu1  ;;  %v5511_v26 = vld [vmem:[#allocation8 + $0x38] sm:$0xf0]  ;;  %v4546_v27 = vld [vmem:[#allocation8 + $0x150] sm:$0xf] }
 0x14b   :  { %v886_v51 = vadd.f32 %v885_v32, %v873_v46  ;;  %v887_v43 = vpop.f32.mrf.mxu0 }
 0x14c   :  { %v4463_v43 = vor.u32 %v5526_v49, %v4462_v48  ;;  %v5541_v48 = vld [vmem:[#allocation8 + $0x128] sm:$0xf0] }
 0x14d   :  { %v899_v55 = vadd.f32 %v898_v47, %v886_v51  ;;  %v4327_v51 = vor.u32 %v5491_v42, %v4326_v41  ;;  %v4428_v41 = vld [vmem:[#allocation8 + $0x6c] sm:$0xf0]  ;;  %v4378_v42 = vld [vmem:[#allocation8] sm:$0xf]  ;;  %v5513_v49 = vld [vmem:[#allocation8 + $0x4c] sm:$0xf] }
 0x14f   :  { %v980_v59 = vmax.f32 %v899_v55, 0.0  ;;  %v4438_v55 = vld [vmem:[#allocation8 + $0x78] sm:$0xf] }
 0x150   :  { %v874_v63 = vpop.f32.mrf.mxu3  ;;  %v913_v0 = vpop.f32.mrf.mxu2  ;;  %v4439_v62 = vor.u32 %v5520_v56, %v4438_v55  ;;  %v4654_v55 = vld [vmem:[#allocation8 + $0x228] sm:$0xf] }
 0x151   :  { %v983_v3 = vadd.f32 %v980_v59, %v6100_v19  ;;  %v4110_v19 = vld [vmem:[#allocation7 + $0x20] sm:$0xf] }
 0x152   :  { %v900_v4 = vpop.f32.mrf.mxu1  ;;  %v4111_v22 = vor.u32 %v5437_v15, %v4110_v19  ;;  %v4302_v59 = vld [vmem:[#allocation7 + $0x1a0] sm:$0xf]  ;;  %v4414_v19 = vld [vmem:[#allocation8 + $0x48] sm:$0xf]  ;;  %v5514_v15 = vld [vmem:[#allocation8 + $0x50] sm:$0xf0] }
 0x153   :  { %v6129_v7 = vpack.c.bf16 %v983_v3, %v983_v3  ;;  %v937_v9 = vpop.f32.mrf.mxu0  ;;  %v4426_v0 = vld [vmem:[#allocation8 + $0x60] sm:$0xf]  ;;  %v4303_v2 = vor.u32 %v5485_v60, %v4302_v59  ;;  %v4290_v4 = vld [vmem:[#allocation7 + $0x188] sm:$0xf] }
 0x154   :  { %1561 = vmatpush.bf16.msra.mxu2 %v4111_v22  ;;  %v4291_v11 = vor.u32 %v5482_v5, %v4290_v4  ;;  %v4452_v22 = vld [vmem:[#allocation8 + $0x9c] sm:$0xf0]  ;;  %v5571_v4 = vld [vmem:[#allocation8 + $0x218] sm:$0xf0] }
 0x155   :  { %1485 = vmatmul.bf16.vlgmr.msrb.gmra.mxu0 %v6129_v7  ;;  %1524 = vmatmul.bf16.vlgmr.msrb.gmra.mxu3 %v6129_v7  ;;  %v4404_v59 = vld [vmem:[#allocation8 + $0x3c] sm:$0xf0] }
 0x156   :  { %1581 = vmatpush.bf16.msrb.mxu0 %v4375_v6  ;;  %v4427_v6 = vor.u32 %v5517_v1, %v4426_v0  ;;  %v4498_v0 = vld [vmem:[#allocation8 + $0xf0] sm:$0xf] }
 0x158   :  { %v924_v24 = vpop.f32.mrf.mxu3  ;;  %v963_v25 = vpop.f32.mrf.mxu2  ;;  %1562 = vmatpush.bf16.msra.mxu2 %v4099_v35  ;;  %v4391_v35 = vor.u32 %v5508_v23, %v4390_v34  ;;  %v5565_v34 = vld [vmem:[#allocation8 + $0x1e8] sm:$0xf0] }
 0x159   :  { %v925_v29 = vadd.f32 %v924_v24, %v912_v17  ;;  %v4558_v17 = vld [vmem:[#allocation8 + $0x168] sm:$0xf]  ;;  %v4455_v24 = vor.u32 %v5522_v21, %v4452_v22  ;;  %v4380_v21 = vld [vmem:[#allocation8 + $0xc] sm:$0xf0]  ;;  %v5537_v23 = vld [vmem:[#allocation8 + $0x10c] sm:$0xf] }
 0x15a   :  { %v950_v30 = vpop.f32.mrf.mxu1  ;;  %1582 = vmatpush.bf16.msrb.mxu0 %v4363_v16  ;;  %v4415_v16 = vor.u32 %v5514_v15, %v4414_v19  ;;  %v5532_v19 = vld [vmem:[#allocation8 + $0xe0] sm:$0xf0]  ;;  %v4630_v15 = vld [vmem:[#allocation8 + $0x1f8] sm:$0xf] }
 0x15b   :  { %v938_v32 = vadd.f32 %v937_v9, %v925_v29  ;;  %v939_v33 = vpop.f32.mrf.mxu0  ;;  %v951_v53 = vadd.f32 %v950_v30, %v475_v40  ;;  %v4464_v9 = vld [vmem:[#allocation8 + $0xb4] sm:$0xf0]  ;;  %v5547_v30 = vld [vmem:[#allocation8 + $0x158] sm:$0xf0] }
 0x15c   :  { %v4467_v13 = vor.u32 %v5525_v8, %v4464_v9  ;;  %v5507_v8 = vld [vmem:[#allocation8 + $0x1c] sm:$0xf]  ;;  %v4392_v9 = vld [vmem:[#allocation8 + $0x24] sm:$0xf0] }
 0x15d   :  { %v981_v36 = vmax.f32 %v938_v32, 0.0  ;;  %v964_v58 = vadd.f32 %v963_v25, %v951_v53  ;;  %v4402_v25 = vld [vmem:[#allocation8 + $0x30] sm:$0xf]  ;;  %v4440_v32 = vld [vmem:[#allocation8 + $0x84] sm:$0xf0] }
 0x15e   :  { %1583 = vmatpush.bf16.msrb.mxu0 %v4351_v31  ;;  %v4403_v29 = vor.u32 %v5511_v26, %v4402_v25  ;;  %v5519_v31 = vld [vmem:[#allocation8 + $0x7c] sm:$0xf]  ;;  %v4524_v25 = vld [vmem:[#allocation8 + $0x12c] sm:$0xf0] }
 0x15f   :  { %v984_v38 = vadd.f32 %v981_v36, %v6102_v20  ;;  %v5488_v20 = vld [vmem:[#allocation7 + $0x1c0] sm:$0xf0]  ;;  %v4443_v33 = vor.u32 %v5519_v31, %v4440_v32  ;;  %v4534_v36 = vld [vmem:[#allocation8 + $0x138] sm:$0xf]  ;;  %v4566_v26 = vld [vmem:[#allocation8 + $0x170] sm:$0xf] }
 0x160   :  { %v926_v44 = vpop.f32.mrf.mxu3  ;;  %v965_v45 = vpop.f32.mrf.mxu2  ;;  %v4315_v57 = vor.u32 %v5488_v20, %v4314_v54  ;;  %v4510_v20 = vld [vmem:[#allocation8 + $0x108] sm:$0xf]  ;;  %v5529_v31 = vld [vmem:[#allocation8 + $0xc8] sm:$0xf0] }
 0x161   :  { %v987_v46 = vpack.c.bf16 %v984_v38, %v984_v38  ;;  %v5516_v38 = vld [vmem:[#allocation8 + $0x64] sm:$0xf]  ;;  %v5505_v44 = vld [vmem:[#allocation8 + $0x8] sm:$0xf0] }
 0x162   :  { %v952_v47 = vpop.f32.mrf.mxu1  ;;  %1584 = vmatpush.bf16.msrb.mxu0 %v4339_v37  ;;  %v5544_v37 = vld [vmem:[#allocation8 + $0x140] sm:$0xf0]  ;;  %v4431_v45 = vor.u32 %v5516_v38, %v4428_v41  ;;  %v4656_v38 = vld [vmem:[#allocation8 + $0x234] sm:$0xf0] }
 0x163   :  { %1498 = vmatmul.bf16.vlgmr.msrb.gmra.mxu1 %v987_v46  ;;  %v4535_v40 = vor.u32 %v5544_v37, %v4534_v36  ;;  %v4522_v47 = vld [vmem:[#allocation8 + $0x120] sm:$0xf]  ;;  %v4512_v36 = vld [vmem:[#allocation8 + $0x114] sm:$0xf0]  ;;  %v5573_v37 = vld [vmem:[#allocation8 + $0x22c] sm:$0xf] }
 0x164   :  { %2088 = vmatpush.bf16.msrb.mxu1 %v4463_v43  ;;  %v4523_v50 = vor.u32 %v5541_v48, %v4522_v47  ;;  %v5549_v43 = vld [vmem:[#allocation8 + $0x16c] sm:$0xf]  ;;  %v4659_v41 = vor.u32 %v5573_v37, %v4656_v38  ;;  %v5562_v47 = vld [vmem:[#allocation8 + $0x1d0] sm:$0xf0]  ;;  %v5524_v38 = vld [vmem:[#allocation8 + $0xa0] sm:$0xf0] }
 0x165   :  { %1537 = vmatmul.bf16.vlgmr.msra.gmra.mxu0 %v987_v46  ;;  %1576 = vmatmul.bf16.vlgmr.msra.gmra.mxu3 %v987_v46  ;;  %v4379_v46 = vor.u32 %v5505_v44, %v4378_v42  ;;  %v4563_v54 = vor.u32 %v5549_v43, %v4560_v52  ;;  %v4554_v42 = vld [vmem:[#allocation8 + $0x158] sm:$0xf]  ;;  %v5548_v44 = vld [vmem:[#allocation8 + $0x160] sm:$0xf0]  ;;  %v5534_v48 = vld [vmem:[#allocation8 + $0xf4] sm:$0xf] }
 0x166   :  { %1585 = vmatpush.bf16.msrb.mxu0 %v4327_v51  ;;  %v4416_v51 = vld [vmem:[#allocation8 + $0x54] sm:$0xf0]  ;;  %v5570_v43 = vld [vmem:[#allocation8 + $0x214] sm:$0xf]  ;;  %v4644_v52 = vld [vmem:[#allocation8 + $0x21c] sm:$0xf0] }
 0x167   :  { %v4419_v53 = vor.u32 %v5513_v49, %v4416_v51  ;;  %v4500_v51 = vld [vmem:[#allocation8 + $0xfc] sm:$0xf0] }
 0x168   :  { %v976_v61 = vpop.f32.mrf.mxu3  ;;  %2089 = vmatpush.bf16.msrb.mxu1 %v4451_v28  ;;  %v5538_v28 = vld [vmem:[#allocation8 + $0x110] sm:$0xf0] }
 0x169   :  { %v977_v63 = vadd.f32 %v976_v61, %v964_v58  ;;  %v4511_v56 = vor.u32 %v5538_v28, %v4510_v20  ;;  %v5510_v58 = vld [vmem:[#allocation8 + $0x34] sm:$0xf]  ;;  %v4542_v20 = vld [vmem:[#allocation8 + $0x140] sm:$0xf]  ;;  %v5545_v28 = vld [vmem:[#allocation8 + $0x148] sm:$0xf0] }
 0x16a   :  { %1586 = vmatpush.bf16.msrb.mxu0 %v4315_v57  ;;  %v5574_v57 = vld [vmem:[#allocation8 + $0x230] sm:$0xf0]  ;;  %v4407_v61 = vor.u32 %v5510_v58, %v4404_v59  ;;  %v5531_v58 = vld [vmem:[#allocation8 + $0xdc] sm:$0xf] }
 0x16b   :  { %v982_v3 = vmax.f32 %v977_v63, 0.0  ;;  %v4655_v60 = vor.u32 %v5574_v57, %v4654_v55  ;;  %v4548_v63 = vld [vmem:[#allocation8 + $0x15c] sm:$0xf0]  ;;  %v4543_v55 = vor.u32 %v5545_v28, %v4542_v20  ;;  %v5559_v57 = vld [vmem:[#allocation8 + $0x1b8] sm:$0xf0] }
 0x16c   :  { %2090 = vmatpush.bf16.msrb.mxu1 %v4439_v62  ;;  %v5546_v62 = vld [vmem:[#allocation8 + $0x154] sm:$0xf] }
 0x16d   :  { %v985_v10 = vadd.f32 %v982_v3, %v6112_v39  ;;  %v4559_v39 = vor.u32 %v5550_v18, %v4558_v17  ;;  %v4551_v1 = vor.u32 %v5546_v62, %v4548_v63  ;;  %v4642_v3 = vld [vmem:[#allocation8 + $0x210] sm:$0xf]  ;;  %2114 = vmatpush.bf16.msrb.mxu3 %v4655_v60  ;;  %v5568_v17 = vld [vmem:[#allocation8 + $0x200] sm:$0xf0]  ;;  %v4488_v60 = vld [vmem:[#allocation8 + $0xe4] sm:$0xf0] }
 0x16e   :  { %1587 = vmatpush.bf16.msrb.mxu0 %v4303_v2  ;;  %v5535_v2 = vld [vmem:[#allocation8 + $0xf8] sm:$0xf0]  ;;  %v5504_v18 = vld [vmem:[#allocation8 + $0x4] sm:$0xf]  ;;  %v4632_v62 = vld [vmem:[#allocation8 + $0x204] sm:$0xf0]  ;;  %v4491_v63 = vor.u32 %v5531_v58, %v4488_v60 }
 0x16f   :  { %v988_v12 = vpack.c.bf16 %v985_v10, %v985_v10  ;;  %v4499_v5 = vor.u32 %v5535_v2, %v4498_v0  ;;  %v5543_v10 = vld [vmem:[#allocation8 + $0x13c] sm:$0xf]  ;;  %v4383_v22 = vor.u32 %v5504_v18, %v4380_v21  ;;  %v5542_v2 = vld [vmem:[#allocation8 + $0x130] sm:$0xf0]  ;;  %v4570_v18 = vld [vmem:[#allocation8 + $0x180] sm:$0xf] }
 0x170   :  { %v978_v14 = vpop.f32.mrf.mxu3  ;;  %2091 = vmatpush.bf16.msrb.mxu1 %v4427_v6  ;;  %v4643_v6 = vor.u32 %v5571_v4, %v4642_v3  ;;  %v5553_v21 = vld [vmem:[#allocation8 + $0x188] sm:$0xf0]  ;;  %v4572_v58 = vld [vmem:[#allocation8 + $0x18c] sm:$0xf0] }
 0x171   :  { %1511 = vmatmul.bf16.vlgmr.msrb.gmra.mxu2 %v988_v12  ;;  %v4486_v14 = vld [vmem:[#allocation8 + $0xd8] sm:$0xf] }
 0x172   :  { %1588 = vmatpush.bf16.msrb.mxu0 %v4291_v11  ;;  %2101 = vmatpush.bf16.msrb.mxu2 %v4559_v39  ;;  %v4395_v11 = vor.u32 %v5507_v8, %v4392_v9  ;;  %v4631_v39 = vor.u32 %v5568_v17, %v4630_v15  ;;  %v5528_v8 = vld [vmem:[#allocation8 + $0xc4] sm:$0xf]  ;;  %v4518_v15 = vld [vmem:[#allocation8 + $0x110] sm:$0xf] }
 0x173   :  { %1550 = vmatmul.bf16.vlgmr.msra.gmra.mxu1 %v988_v12  ;;  %2115 = vmatpush.bf16.msrb.mxu3 %v4643_v6  ;;  %v5556_v6 = vld [vmem:[#allocation8 + $0x1a0] sm:$0xf0] }
 0x174   :  { %2092 = vmatpush.bf16.msrb.mxu1 %v4415_v16  ;;  %v4487_v16 = vor.u32 %v5532_v19, %v4486_v14 }
 0x175   :  { %1589 = vmatmul.bf16.vlgmr.msrb.gmra.mxu0 %v988_v12  ;;  %v4536_v12 = vld [vmem:[#allocation8 + $0x144] sm:$0xf0] }
 0x176   :  { %2127 = vmatpush.bf16.msra.mxu0 %v4467_v13  ;;  %v4539_v13 = vor.u32 %v5543_v10, %v4536_v12  ;;  %v5564_v12 = vld [vmem:[#allocation8 + $0x1e4] sm:$0xf] }
 0x177   :  { %2116 = vmatpush.bf16.msrb.mxu3 %v4631_v39  ;;  %v4571_v39 = vor.u32 %v5553_v21, %v4570_v18 }
 0x178   :  { %2093 = vmatpush.bf16.msrb.mxu1 %v4403_v29  ;;  %v5551_v29 = vld [vmem:[#allocation8 + $0x178] sm:$0xf0] }
 0x179   :  { %v4567_v32 = vor.u32 %v5551_v29, %v4566_v26  ;;  %v4506_v29 = vld [vmem:[#allocation8 + $0xf8] sm:$0xf] }
 0x17a   :  { %2128 = vmatpush.bf16.msra.mxu0 %v4455_v24  ;;  %v5540_v24 = vld [vmem:[#allocation8 + $0x124] sm:$0xf] }
 0x17c   :  { %2094 = vmatpush.bf16.msrb.mxu1 %v4391_v35 }
 0x17e   :  { %2129 = vmatpush.bf16.msra.mxu0 %v4443_v33  ;;  %v4618_v33 = vld [vmem:[#allocation8 + $0x1e0] sm:$0xf] }
 0x17f   :  { %v4619_v35 = vor.u32 %v5565_v34, %v4618_v33 }
 0x180   :  { %2095 = vmatpush.bf16.msrb.mxu1 %v4379_v46  ;;  %v4606_v46 = vld [vmem:[#allocation8 + $0x1c8] sm:$0xf] }
 0x181   :  { %1563 = vmatmul.bf16.vlgmr.msra.gmra.mxu2 %v6129_v7  ;;  %v4547_v7 = vor.u32 %v5547_v30, %v4546_v27  ;;  %v4527_v27 = vor.u32 %v5540_v24, %v4524_v25  ;;  %v4474_v30 = vld [vmem:[#allocation8 + $0xc0] sm:$0xf]  ;;  %2117 = vmatpush.bf16.msrb.mxu3 %v4619_v35  ;;  %v4608_v24 = vld [vmem:[#allocation8 + $0x1d4] sm:$0xf0]  ;;  %v4470_v25 = vld [vmem:[#allocation8 + $0xb0] sm:$0xf] }
 0x182   :  { %2130 = vmatpush.bf16.msra.mxu0 %v4431_v45  ;;  %v4555_v45 = vor.u32 %v5548_v44, %v4554_v42  ;;  %v4596_v35 = vld [vmem:[#allocation8 + $0x1bc] sm:$0xf0] }
 0x183   :  { %2102 = vmatpush.bf16.msrb.mxu2 %v4547_v7  ;;  %v4475_v7 = vor.u32 %v5529_v31, %v4474_v30  ;;  %v5536_v30 = vld [vmem:[#allocation8 + $0x100] sm:$0xf0] }
 0x184   :  { %2140 = vmatpush.bf16.msra.mxu1 %v4563_v54  ;;  %v4647_v54 = vor.u32 %v5570_v43, %v4644_v52  ;;  %v5530_v43 = vld [vmem:[#allocation8 + $0xd0] sm:$0xf0]  ;;  %v6145_v52 = vld [vmem:[%s6219_s6] sm:$0x7] }
 0x186   :  { %2131 = vmatpush.bf16.msra.mxu0 %v4419_v53  ;;  %v4503_v53 = vor.u32 %v5534_v48, %v4500_v51  ;;  %v4482_v51 = vld [vmem:[#allocation8 + $0xc8] sm:$0xf] }
 0x187   :  { %2103 = vmatpush.bf16.msrb.mxu2 %v4535_v40  ;;  %v4515_v40 = vor.u32 %v5537_v23, %v4512_v36  ;;  %v5558_v23 = vld [vmem:[#allocation8 + $0x1b4] sm:$0xf]  ;;  %v4458_v36 = vld [vmem:[#allocation8 + $0x98] sm:$0xf]  ;;  %v4483_v28 = vor.u32 %v5530_v43, %v4482_v51  ;;  %v5592_v51 = vld [vmem:[#allocation10 + $0x80] sm:$0xf0] }
 0x188   :  { %2141 = vmatpush.bf16.msra.mxu1 %v4551_v1  ;;  %v4530_v1 = vld [vmem:[#allocation8 + $0x128] sm:$0xf]  ;;  %v4599_v37 = vor.u32 %v5558_v23, %v4596_v35  ;;  %v4459_v42 = vor.u32 %v5524_v38, %v4458_v36  ;;  %v4638_v35 = vld [vmem:[#allocation8 + $0x200] sm:$0xf]  ;;  %v5569_v36 = vld [vmem:[#allocation8 + $0x208] sm:$0xf0] }
 0x189   :  { %v4531_v4 = vor.u32 %v5542_v2, %v4530_v1  ;;  %v4422_v1 = vld [vmem:[#allocation8 + $0x50] sm:$0xf]  ;;  %v5515_v2 = vld [vmem:[#allocation8 + $0x58] sm:$0xf0]  ;;  %v5598_v38 = vld [vmem:[#allocation10 + $0xb0] sm:$0xf0] }
 0x18a   :  { %2132 = vmatpush.bf16.msra.mxu0 %v4407_v61  ;;  %v5567_v61 = vld [vmem:[#allocation8 + $0x1fc] sm:$0xf] }
 0x18b   :  { %2104 = vmatpush.bf16.msrb.mxu2 %v4523_v50  ;;  %v4607_v50 = vor.u32 %v5562_v47, %v4606_v46  ;;  %v4635_v0 = vor.u32 %v5567_v61, %v4632_v62  ;;  %v4584_v46 = vld [vmem:[#allocation8 + $0x1a4] sm:$0xf0]  ;;  %v4446_v47 = vld [vmem:[#allocation8 + $0x80] sm:$0xf]  ;;  %v5518_v61 = vld [vmem:[#allocation8 + $0x70] sm:$0xf0] }
 0x18c   :  { %2142 = vmatpush.bf16.msra.mxu1 %v4539_v13  ;;  %v4620_v13 = vld [vmem:[#allocation8 + $0x1ec] sm:$0xf0] }
 0x18d   :  { %2118 = vmatpush.bf16.msrb.mxu3 %v4607_v50  ;;  %v4623_v19 = vor.u32 %v5564_v12, %v4620_v13  ;;  %v5521_v50 = vld [vmem:[#allocation8 + $0x88] sm:$0xf0] }
 0x18e   :  { %2133 = vmatpush.bf16.msra.mxu0 %v4395_v11  ;;  %v4476_v11 = vld [vmem:[#allocation8 + $0xcc] sm:$0xf0]  ;;  %v4447_v20 = vor.u32 %v5521_v50, %v4446_v47  ;;  %v5566_v47 = vld [vmem:[#allocation8 + $0x1f0] sm:$0xf0]  ;;  %v4726_v50 = vld [vmem:[#allocation10 + $0x78] sm:$0xf] }
 0x18f   :  { %2105 = vmatpush.bf16.msrb.mxu2 %v4511_v56  ;;  %v4594_v56 = vld [vmem:[#allocation8 + $0x1b0] sm:$0xf]  ;;  %v4479_v14 = vor.u32 %v5528_v8, %v4476_v11 }
 0x190   :  { %2143 = vmatpush.bf16.msra.mxu1 %v4527_v27  ;;  %v4595_v59 = vor.u32 %v5559_v57, %v4594_v56  ;;  %v5527_v27 = vld [vmem:[#allocation8 + $0xb8] sm:$0xf0]  ;;  %v5552_v57 = vld [vmem:[#allocation8 + $0x184] sm:$0xf] }
 0x191   :  { %v4471_v31 = vor.u32 %v5527_v27, %v4470_v25  ;;  %v4575_v60 = vor.u32 %v5552_v57, %v4572_v58  ;;  %v4714_v58 = vld [vmem:[#allocation10 + $0x60] sm:$0xf] }
 0x192   :  { %2134 = vmatpush.bf16.msra.mxu0 %v4383_v22  ;;  %2119 = vmatpush.bf16.msrb.mxu3 %v4595_v59  ;;  %v5561_v22 = vld [vmem:[#allocation8 + $0x1cc] sm:$0xf]  ;;  %v4434_v59 = vld [vmem:[#allocation8 + $0x68] sm:$0xf] }
 0x193   :  { %2106 = vmatpush.bf16.msrb.mxu2 %v4499_v5  ;;  %v4582_v5 = vld [vmem:[#allocation8 + $0x198] sm:$0xf]  ;;  %v4611_v26 = vor.u32 %v5561_v22, %v4608_v24  ;;  %v4435_v62 = vor.u32 %v5518_v61, %v4434_v59  ;;  %v5575_v22 = vld [vmem:[#allocation8 + $0x238] sm:$0xf0]  ;;  %v5589_v59 = vld [vmem:[#allocation10 + $0x68] sm:$0xf0] }
 0x194   :  { %2144 = vmatpush.bf16.msra.mxu1 %v4515_v40  ;;  %v4583_v10 = vor.u32 %v5556_v6, %v4582_v5  ;;  %v4494_v40 = vld [vmem:[#allocation8 + $0xe0] sm:$0xf]  ;;  %v4423_v5 = vor.u32 %v5515_v2, %v4422_v1  ;;  %v4715_v1 = vor.u32 %v5589_v59, %v4714_v58  ;;  %v5582_v58 = vld [vmem:[#allocation10 + $0x34] sm:$0xf] }
 0x195   :  { %v4692_v59 = vld [vmem:[#allocation10 + $0x3c] sm:$0xf0] }
 0x196   :  { %2179 = vmatpush.bf16.msrb.mxu0 %v4567_v32  ;;  %2120 = vmatpush.bf16.msrb.mxu3 %v4583_v10  ;;  %v4507_v32 = vor.u32 %v5536_v30, %v4506_v29  ;;  %v5512_v10 = vld [vmem:[#allocation8 + $0x40] sm:$0xf0]  ;;  %v4650_v29 = vld [vmem:[#allocation8 + $0x218] sm:$0xf] }
 0x197   :  { %2107 = vmatpush.bf16.msrb.mxu2 %v4487_v16  ;;  %v5539_v16 = vld [vmem:[#allocation8 + $0x118] sm:$0xf0]  ;;  %v5572_v30 = vld [vmem:[#allocation8 + $0x220] sm:$0xf0] }
 0x198   :  { %2145 = vmatpush.bf16.msra.mxu1 %v4503_v53  ;;  %v4519_v17 = vor.u32 %v5539_v16, %v4518_v15  ;;  %v4651_v23 = vor.u32 %v5572_v30, %v4650_v29  ;;  %v5591_v30 = vld [vmem:[#allocation10 + $0x7c] sm:$0xf] }
 0x19a   :  { %2180 = vmatpush.bf16.msrb.mxu0 %v4555_v45  ;;  %2121 = vmatpush.bf16.msrb.mxu3 %v4571_v39  ;;  %v5555_v45 = vld [vmem:[#allocation8 + $0x19c] sm:$0xf]  ;;  %v4662_v39 = vld [vmem:[#allocation8 + $0x230] sm:$0xf] }
 0x19b   :  { %2108 = vmatpush.bf16.msrb.mxu2 %v4475_v7  ;;  %v4587_v48 = vor.u32 %v5555_v45, %v4584_v46  ;;  %v4663_v27 = vor.u32 %v5575_v22, %v4662_v39  ;;  %v1089_v45 = vperm.slane %v6145_v52, 2  ;;  %v4626_v46 = vld [vmem:[#allocation8 + $0x1e8] sm:$0xf]  ;;  %v4752_v39 = vld [vmem:[#allocation10 + $0xb4] sm:$0xf0] }
 0x19c   :  { %2146 = vmatpush.bf16.msra.mxu1 %v4491_v63  ;;  %v1087_v63 = vperm.slane %v6145_v52, 0 }
 0x19e   :  { %2181 = vmatpush.bf16.msrb.mxu0 %v4543_v55  ;;  %2166 = vmatpush.bf16.msra.mxu3 %v4471_v31  ;;  %v1088_v55 = vperm.slane %v6145_v52, 1 }
 0x19f   :  { %2153 = vmatpush.bf16.msra.mxu2 %v4659_v41  ;;  %v5533_v41 = vld [vmem:[#allocation8 + $0xe8] sm:$0xf0] }
 0x1a0   :  { %2147 = vmatpush.bf16.msra.mxu1 %v4479_v14  ;;  %v4495_v44 = vor.u32 %v5533_v41, %v4494_v40  ;;  %v4738_v40 = vld [vmem:[#allocation10 + $0x90] sm:$0xf]  ;;  %v4639_v41 = vor.u32 %v5569_v36, %v4638_v35  ;;  %v5616_v35 = vld [vmem:[#allocation10 + $0x140] sm:$0xf0] }
 0x1a1   :  { %v5588_v36 = vld [vmem:[#allocation10 + $0x64] sm:$0xf] }
 0x1a2   :  { %2182 = vmatpush.bf16.msrb.mxu0 %v4531_v4  ;;  %2167 = vmatpush.bf16.msra.mxu3 %v4459_v42 }
 0x1a3   :  { %2154 = vmatpush.bf16.msra.mxu2 %v4647_v54 }
 0x1a6   :  { %2183 = vmatpush.bf16.msrb.mxu0 %v4519_v17  ;;  %2168 = vmatpush.bf16.msra.mxu3 %v4447_v20  ;;  %v5509_v17 = vld [vmem:[#allocation8 + $0x28] sm:$0xf0] }
 0x1a7   :  { %2155 = vmatpush.bf16.msra.mxu2 %v4635_v0 }
 0x1aa   :  { %2184 = vmatpush.bf16.msrb.mxu0 %v4507_v32  ;;  %2169 = vmatpush.bf16.msra.mxu3 %v4435_v62  ;;  %v4386_v32 = vld [vmem:[#allocation8 + $0x8] sm:$0xf]  ;;  %v5560_v62 = vld [vmem:[#allocation8 + $0x1c0] sm:$0xf0] }
 0x1ab   :  { %2156 = vmatpush.bf16.msra.mxu2 %v4623_v19 }
 0x1ae   :  { %2185 = vmatpush.bf16.msrb.mxu0 %v4495_v44  ;;  %2170 = vmatpush.bf16.msra.mxu3 %v4423_v5  ;;  %v5595_v44 = vld [vmem:[#allocation10 + $0x98] sm:$0xf0]  ;;  %v5586_v5 = vld [vmem:[#allocation10 + $0x50] sm:$0xf0] }
 0x1af   :  { %2157 = vmatpush.bf16.msra.mxu2 %v4611_v26 }
 0x1b2   :  { %2186 = vmatpush.bf16.msrb.mxu0 %v4483_v28  ;;  %v4614_v28 = vld [vmem:[#allocation8 + $0x1d0] sm:$0xf] }
 0x1b3   :  { %2158 = vmatpush.bf16.msra.mxu2 %v4599_v37  ;;  %v4750_v37 = vld [vmem:[#allocation10 + $0xa8] sm:$0xf] }
 0x1b4   :  { %v4751_v42 = vor.u32 %v5598_v38, %v4750_v37  ;;  %v4716_v38 = vld [vmem:[#allocation10 + $0x6c] sm:$0xf0] }
 0x1b7   :  { %2159 = vmatpush.bf16.msra.mxu2 %v4587_v48  ;;  %v4739_v48 = vor.u32 %v5595_v44, %v4738_v40  ;;  %v4719_v40 = vor.u32 %v5588_v36, %v4716_v38  ;;  %v4944_v36 = vld [vmem:[#allocation10 + $0x234] sm:$0xf0] }
 0x1bb   :  { %2160 = vmatpush.bf16.msra.mxu2 %v4575_v60  ;;  %v4602_v60 = vld [vmem:[#allocation8 + $0x1b8] sm:$0xf] }
 0x1d2   :  { %v6138_v49 = vpop.f32.mrf.mxu0 }
 0x1d3   :  { %v1487_v11 = vadd.f32 %v6138_v49, %v1087_v63  ;;  %v4846_v63 = vld [vmem:[#allocation10 + $0x168] sm:$0xf] }
 0x1d8   :  { %v6140_v3 = vpop.f32.mrf.mxu3 }
 0x1d9   :  { %v1526_v0 = vadd.f32 %v6140_v3, %v1088_v55  ;;  %v4398_v3 = vld [vmem:[#allocation8 + $0x20] sm:$0xf]  ;;  %v5563_v55 = vld [vmem:[#allocation8 + $0x1d8] sm:$0xf0] }
 0x1da   :  { %v1488_v9 = vpop.f32.mrf.mxu0  ;;  %v4399_v24 = vor.u32 %v5509_v17, %v4398_v3  ;;  %v4615_v52 = vor.u32 %v5563_v55, %v4614_v28  ;;  %v4578_v17 = vld [vmem:[#allocation8 + $0x188] sm:$0xf]  ;;  %v5610_v28 = vld [vmem:[#allocation10 + $0x110] sm:$0xf0] }
 0x1db   :  { %v4410_v9 = vld [vmem:[#allocation8 + $0x38] sm:$0xf]  ;;  %v4942_v55 = vld [vmem:[#allocation10 + $0x228] sm:$0xf] }
 0x1dc   :  { %v4411_v14 = vor.u32 %v5512_v10, %v4410_v9 }
 0x1de   :  { %2171 = vmatpush.bf16.msra.mxu3 %v4411_v14  ;;  %v5619_v14 = vld [vmem:[#allocation10 + $0x158] sm:$0xf0] }
 0x1e0   :  { %v1499_v7 = vpop.f32.mrf.mxu1  ;;  %v1527_v33 = vpop.f32.mrf.mxu3 }
 0x1e1   :  { %v1500_v19 = vadd.f32 %v1499_v7, %v1487_v11  ;;  %v5506_v7 = vld [vmem:[#allocation8 + $0x10] sm:$0xf0]  ;;  %v5557_v11 = vld [vmem:[#allocation8 + $0x1a8] sm:$0xf0] }
 0x1e2   :  { %v1538_v34 = vpop.f32.mrf.mxu0  ;;  %2172 = vmatpush.bf16.msra.mxu3 %v4399_v24  ;;  %v4387_v33 = vor.u32 %v5506_v7, %v4386_v32  ;;  %v4678_v7 = vld [vmem:[#allocation10 + $0x18] sm:$0xf] }
 0x1e3   :  { %v1539_v4 = vadd.f32 %v1538_v34, %v1526_v0  ;;  %v5622_v0 = vld [vmem:[#allocation10 + $0x170] sm:$0xf0] }
 0x1e4   :  { %v4847_v9 = vor.u32 %v5622_v0, %v4846_v63  ;;  %v4786_v0 = vld [vmem:[#allocation10 + $0xf0] sm:$0xf] }
 0x1e6   :  { %2173 = vmatpush.bf16.msra.mxu3 %v4387_v33  ;;  %v5580_v33 = vld [vmem:[#allocation10 + $0x20] sm:$0xf0] }
 0x1e8   :  { %v1501_v53 = vpop.f32.mrf.mxu1  ;;  %v6147_v54 = vpop.f32.mrf.mxu3 }
 0x1e9   :  { %v4627_v53 = vor.u32 %v5566_v47, %v4626_v46  ;;  %v5613_v46 = vld [vmem:[#allocation10 + $0x128] sm:$0xf0] }
 0x1ea   :  { %v1540_v56 = vpop.f32.mrf.mxu0  ;;  %v5585_v47 = vld [vmem:[#allocation10 + $0x4c] sm:$0xf] }
 0x1eb   :  { %v4727_v56 = vor.u32 %v5592_v51, %v4726_v50  ;;  %v5621_v50 = vld [vmem:[#allocation10 + $0x16c] sm:$0xf]  ;;  %v4848_v51 = vld [vmem:[#allocation10 + $0x174] sm:$0xf0] }
 0x1f0   :  { %v1551_v6 = vpop.f32.mrf.mxu1  ;;  %v1579_v8 = vpop.f32.mrf.mxu3 }
 0x1f1   :  { %v1552_v12 = vadd.f32 %v1551_v6, %v1539_v4  ;;  %v4702_v4 = vld [vmem:[#allocation10 + $0x48] sm:$0xf]  ;;  %v4603_v8 = vor.u32 %v5560_v62, %v4602_v60  ;;  %v4695_v60 = vor.u32 %v5582_v58, %v4692_v59  ;;  %v4836_v62 = vld [vmem:[#allocation10 + $0x15c] sm:$0xf0] }
 0x1f2   :  { %v1590_v13 = vpop.f32.mrf.mxu0  ;;  %v4776_v59 = vld [vmem:[#allocation10 + $0xe4] sm:$0xf0] }
 0x1f3   :  { %v1595_v15 = vmax.f32 %v1552_v12, 0.0  ;;  %v4834_v12 = vld [vmem:[#allocation10 + $0x150] sm:$0xf] }
 0x1f4   :  { %v1512_v16 = vpop.f32.mrf.mxu2  ;;  %v4835_v3 = vor.u32 %v5619_v14, %v4834_v12  ;;  %v4774_v14 = vld [vmem:[#allocation10 + $0xd8] sm:$0xf] }
 0x1f5   :  { %v1598_v18 = vpack.c.bf16 %v1595_v15, %v1595_v15  ;;  %v1513_v21 = vadd.f32 %v1512_v16, %v1500_v19  ;;  %v4690_v19 = vld [vmem:[#allocation10 + $0x30] sm:$0xf]  ;;  %v5583_v15 = vld [vmem:[#allocation10 + $0x38] sm:$0xf0] }
 0x1f6   :  { %v4691_v22 = vor.u32 %v5583_v15, %v4690_v19  ;;  %v4918_v19 = vld [vmem:[#allocation10 + $0x1f8] sm:$0xf] }
 0x1f7   :  { %v1594_v25 = vmax.f32 %v1513_v21, 0.0  ;;  %2109 = vmatmul.bf16.vlgmr.msrb.gmra.mxu2 %v1598_v18  ;;  %v5597_v21 = vld [vmem:[#allocation10 + $0xac] sm:$0xf] }
 0x1f8   :  { %v1553_v26 = vpop.f32.mrf.mxu1  ;;  %2699 = vmatpush.bf16.msrb.mxu2 %v4751_v42  ;;  %v5577_v42 = vld [vmem:[#allocation10 + $0x8] sm:$0xf0] }
 0x1f9   :  { %v6153_v49 = vpack.c.bf16 %v1594_v25, %v1594_v25  ;;  %v4755_v25 = vor.u32 %v5597_v21, %v4752_v39  ;;  %v5594_v26 = vld [vmem:[#allocation10 + $0x94] sm:$0xf]  ;;  %v5612_v39 = vld [vmem:[#allocation10 + $0x124] sm:$0xf] }
 0x1fa   :  { %v1592_v31 = vpop.f32.mrf.mxu0 }
 0x1fb   :  { %2096 = vmatmul.bf16.vlgmr.msrb.gmra.mxu1 %v6153_v49  ;;  %2135 = vmatmul.bf16.vlgmr.msra.gmra.mxu0 %v6153_v49  ;;  %v4728_v31 = vld [vmem:[#allocation10 + $0x84] sm:$0xf0] }
 0x1fc   :  { %v1514_v34 = vpop.f32.mrf.mxu2  ;;  %2192 = vmatpush.bf16.msrb.mxu1 %v4663_v27  ;;  %2700 = vmatpush.bf16.msrb.mxu2 %v4739_v48  ;;  %v4740_v27 = vld [vmem:[#allocation10 + $0x9c] sm:$0xf0]  ;;  %v4731_v32 = vor.u32 %v5591_v30, %v4728_v31  ;;  %v4704_v48 = vld [vmem:[#allocation10 + $0x54] sm:$0xf0] }
 0x1fd   :  { %v4743_v29 = vor.u32 %v5594_v26, %v4740_v27  ;;  %v4679_v34 = vor.u32 %v5580_v33, %v4678_v7  ;;  %v5623_v26 = vld [vmem:[#allocation10 + $0x178] sm:$0xf0]  ;;  %v4762_v27 = vld [vmem:[#allocation10 + $0xc0] sm:$0xf]  ;;  %v5637_v7 = vld [vmem:[#allocation10 + $0x1e8] sm:$0xf0] }
 0x1fe   :  { %v5609_v33 = vld [vmem:[#allocation10 + $0x10c] sm:$0xf] }
 0x200   :  { %2193 = vmatpush.bf16.msrb.mxu1 %v4651_v23  ;;  %2701 = vmatpush.bf16.msrb.mxu2 %v4727_v56  ;;  %v4822_v23 = vld [vmem:[#allocation10 + $0x138] sm:$0xf] }
 0x201   :  { %v4823_v37 = vor.u32 %v5616_v35, %v4822_v23  ;;  %v4800_v23 = vld [vmem:[#allocation10 + $0x114] sm:$0xf0]  ;;  %v5645_v35 = vld [vmem:[#allocation10 + $0x22c] sm:$0xf] }
 0x202   :  { %v4947_v38 = vor.u32 %v5645_v35, %v4944_v36  ;;  %v5596_v35 = vld [vmem:[#allocation10 + $0xa0] sm:$0xf0]  ;;  %v4782_v36 = vld [vmem:[#allocation10 + $0xe0] sm:$0xf] }
 0x204   :  { %v1564_v43 = vpop.f32.mrf.mxu2  ;;  %2194 = vmatpush.bf16.msrb.mxu1 %v4639_v41  ;;  %2702 = vmatpush.bf16.msrb.mxu2 %v4715_v1  ;;  %v4666_v41 = vld [vmem:[#allocation10] sm:$0xf]  ;;  %v5607_v1 = vld [vmem:[#allocation10 + $0xf8] sm:$0xf0] }
 0x205   :  { %v1565_v20 = vadd.f32 %v1564_v43, %v1089_v45  ;;  %v4667_v44 = vor.u32 %v5577_v42, %v4666_v41  ;;  %v4810_v45 = vld [vmem:[#allocation10 + $0x120] sm:$0xf]  ;;  %v4707_v43 = vor.u32 %v5585_v47, %v4704_v48  ;;  %v5620_v41 = vld [vmem:[#allocation10 + $0x160] sm:$0xf0]  ;;  %v5642_v48 = vld [vmem:[#allocation10 + $0x214] sm:$0xf] }
 0x207   :  { %v1578_v57 = vadd.f32 %v6147_v54, %v1565_v20  ;;  %v4590_v54 = vld [vmem:[#allocation8 + $0x1a0] sm:$0xf]  ;;  %v4798_v20 = vld [vmem:[#allocation10 + $0x108] sm:$0xf] }
 0x208   :  { %2195 = vmatpush.bf16.msrb.mxu1 %v4627_v53  ;;  %v4591_v16 = vor.u32 %v5557_v11, %v4590_v54  ;;  %v4851_v53 = vor.u32 %v5621_v50, %v4848_v51  ;;  %v4799_v56 = vor.u32 %v5610_v28, %v4798_v20  ;;  %v4824_v11 = vld [vmem:[#allocation10 + $0x144] sm:$0xf0]  ;;  %v4932_v50 = vld [vmem:[#allocation10 + $0x21c] sm:$0xf0]  ;;  %v5617_v20 = vld [vmem:[#allocation10 + $0x148] sm:$0xf0] }
 0x209   :  { %v1591_v61 = vadd.f32 %v1590_v13, %v1578_v57  ;;  %v4703_v13 = vor.u32 %v5586_v5, %v4702_v4  ;;  %v5646_v57 = vld [vmem:[#allocation10 + $0x230] sm:$0xf0]  ;;  %v4787_v4 = vor.u32 %v5607_v1, %v4786_v0  ;;  %v5643_v5 = vld [vmem:[#allocation10 + $0x218] sm:$0xf0] }
 0x20a   :  { %v5614_v0 = vld [vmem:[#allocation10 + $0x130] sm:$0xf0] }
 0x20b   :  { %v1596_v2 = vmax.f32 %v1591_v61, 0.0  ;;  %2148 = vmatmul.bf16.vlgmr.msra.gmra.mxu1 %v1598_v18  ;;  %2187 = vmatmul.bf16.vlgmr.msrb.gmra.mxu0 %v1598_v18  ;;  %v5554_v18 = vld [vmem:[#allocation8 + $0x190] sm:$0xf0] }
 0x20c   :  { %v1566_v6 = vpop.f32.mrf.mxu2  ;;  %2196 = vmatpush.bf16.msrb.mxu1 %v4615_v52  ;;  %2703 = vmatpush.bf16.msrb.mxu2 %v4703_v13  ;;  %v4579_v24 = vor.u32 %v5554_v18, %v4578_v17  ;;  %v4943_v52 = vor.u32 %v5646_v57, %v4942_v55  ;;  %v5618_v61 = vld [vmem:[#allocation10 + $0x154] sm:$0xf]  ;;  %v5604_v13 = vld [vmem:[#allocation10 + $0xe0] sm:$0xf0]  ;;  %v4668_v17 = vld [vmem:[#allocation10 + $0xc] sm:$0xf0] }
 0x20d   :  { %v1599_v10 = vpack.c.bf16 %v1596_v2, %v1596_v2  ;;  %v4839_v63 = vor.u32 %v5618_v61, %v4836_v62  ;;  %v4930_v2 = vld [vmem:[#allocation10 + $0x210] sm:$0xf]  ;;  %v5579_v6 = vld [vmem:[#allocation10 + $0x1c] sm:$0xf]  ;;  %v4775_v15 = vor.u32 %v5604_v13, %v4774_v14 }
 0x20e   :  { %2725 = vmatpush.bf16.msra.mxu0 %v4943_v52  ;;  %v4931_v54 = vor.u32 %v5643_v5, %v4930_v2  ;;  %v4882_v55 = vld [vmem:[#allocation10 + $0x1b0] sm:$0xf]  ;;  %v5603_v57 = vld [vmem:[#allocation10 + $0xdc] sm:$0xf]  ;;  %v4870_v2 = vld [vmem:[#allocation10 + $0x198] sm:$0xf] }
 0x20f   :  { %2122 = vmatmul.bf16.vlgmr.msrb.gmra.mxu3 %v1599_v10  ;;  %2161 = vmatmul.bf16.vlgmr.msra.gmra.mxu2 %v1599_v10  ;;  %v5639_v52 = vld [vmem:[#allocation10 + $0x1fc] sm:$0xf]  ;;  %v4779_v61 = vor.u32 %v5603_v57, %v4776_v59  ;;  %v5600_v5 = vld [vmem:[#allocation10 + $0xc4] sm:$0xf]  ;;  %v4806_v13 = vld [vmem:[#allocation10 + $0x110] sm:$0xf] }
 0x210   :  { %2197 = vmatpush.bf16.msrb.mxu1 %v4603_v8  ;;  %2712 = vmatpush.bf16.msrb.mxu3 %v4847_v9  ;;  %v4680_v8 = vld [vmem:[#allocation10 + $0x24] sm:$0xf0]  ;;  %v5590_v59 = vld [vmem:[#allocation10 + $0x70] sm:$0xf0] }
 0x211   :  { %2704 = vmatpush.bf16.msrb.mxu2 %v4691_v22  ;;  %v4683_v9 = vor.u32 %v5579_v6, %v4680_v8  ;;  %v4812_v22 = vld [vmem:[#allocation10 + $0x12c] sm:$0xf0] }
 0x212   :  { %2726 = vmatpush.bf16.msra.mxu0 %v4931_v54 }
 0x214   :  { %2198 = vmatpush.bf16.msrb.mxu1 %v4591_v16  ;;  %2713 = vmatpush.bf16.msrb.mxu3 %v4835_v3  ;;  %v5640_v16 = vld [vmem:[#allocation10 + $0x200] sm:$0xf0] }
 0x215   :  { %2705 = vmatpush.bf16.msrb.mxu2 %v4679_v34  ;;  %v5576_v3 = vld [vmem:[#allocation10 + $0x4] sm:$0xf]  ;;  %v4919_v18 = vor.u32 %v5640_v16, %v4918_v19  ;;  %v5611_v19 = vld [vmem:[#allocation10 + $0x118] sm:$0xf0] }
 0x216   :  { %v4671_v21 = vor.u32 %v5576_v3, %v4668_v17  ;;  %v4807_v16 = vor.u32 %v5611_v19, %v4806_v13  ;;  %v4858_v3 = vld [vmem:[#allocation10 + $0x180] sm:$0xf]  ;;  %v5625_v17 = vld [vmem:[#allocation10 + $0x188] sm:$0xf0] }
 0x217   :  { %2727 = vmatpush.bf16.msra.mxu0 %v4919_v18  ;;  %v4859_v18 = vor.u32 %v5625_v17, %v4858_v3  ;;  %v4686_v13 = vld [vmem:[#allocation10 + $0x20] sm:$0xf]  ;;  %v5581_v19 = vld [vmem:[#allocation10 + $0x28] sm:$0xf0]  ;;  %v4950_v17 = vld [vmem:[#allocation10 + $0x230] sm:$0xf] }
 0x218   :  { %2199 = vmatpush.bf16.msrb.mxu1 %v4579_v24  ;;  %2714 = vmatpush.bf16.msrb.mxu3 %v4823_v37  ;;  %v4854_v24 = vld [vmem:[#allocation10 + $0x170] sm:$0xf]  ;;  %v4803_v37 = vor.u32 %v5609_v33, %v4800_v23  ;;  %v4884_v33 = vld [vmem:[#allocation10 + $0x1bc] sm:$0xf0]  ;;  %v4746_v23 = vld [vmem:[#allocation10 + $0x98] sm:$0xf] }
 0x219   :  { %2706 = vmatpush.bf16.msrb.mxu2 %v4667_v44  ;;  %v4855_v30 = vor.u32 %v5623_v26, %v4854_v24  ;;  %v4894_v44 = vld [vmem:[#allocation10 + $0x1c8] sm:$0xf]  ;;  %v4794_v26 = vld [vmem:[#allocation10 + $0xf8] sm:$0xf] }
 0x21b   :  { %2200 = vmatmul.bf16.vlgmr.msrb.gmra.mxu1 %v1599_v10  ;;  %v5615_v10 = vld [vmem:[#allocation10 + $0x13c] sm:$0xf] }
 0x21c   :  { %2738 = vmatpush.bf16.msra.mxu1 %v4755_v25  ;;  %v4827_v12 = vor.u32 %v5615_v10, %v4824_v11  ;;  %v4815_v25 = vor.u32 %v5612_v39, %v4812_v22  ;;  %v5636_v10 = vld [vmem:[#allocation10 + $0x1e4] sm:$0xf]  ;;  %v4908_v11 = vld [vmem:[#allocation10 + $0x1ec] sm:$0xf0]  ;;  %v4896_v39 = vld [vmem:[#allocation10 + $0x1d4] sm:$0xf0] }
 0x21d   :  { %2751 = vmatpush.bf16.msra.mxu2 %v4851_v53  ;;  %v4830_v53 = vld [vmem:[#allocation10 + $0x140] sm:$0xf]  ;;  %v4911_v14 = vor.u32 %v5636_v10, %v4908_v11  ;;  %v4758_v22 = vld [vmem:[#allocation10 + $0xb0] sm:$0xf] }
 0x21e   :  { %v4831_v28 = vor.u32 %v5617_v20, %v4830_v53 }
 0x21f   :  { %2174 = vmatmul.bf16.vlgmr.msra.gmra.mxu3 %v6153_v49  ;;  %v4811_v49 = vor.u32 %v5613_v46, %v4810_v45  ;;  %v5634_v45 = vld [vmem:[#allocation10 + $0x1d0] sm:$0xf0] }
 0x220   :  { %2739 = vmatpush.bf16.msra.mxu1 %v4743_v29  ;;  %v5601_v29 = vld [vmem:[#allocation10 + $0xc8] sm:$0xf0]  ;;  %v5606_v46 = vld [vmem:[#allocation10 + $0xf4] sm:$0xf]  ;;  %v4895_v47 = vor.u32 %v5634_v45, %v4894_v44  ;;  %v4872_v44 = vld [vmem:[#allocation10 + $0x1a4] sm:$0xf0] }
 0x221   :  { %2715 = vmatpush.bf16.msrb.mxu3 %v4811_v49  ;;  %2752 = vmatpush.bf16.msra.mxu2 %v4839_v63  ;;  %v4763_v31 = vor.u32 %v5601_v29, %v4762_v27  ;;  %v4788_v49 = vld [vmem:[#allocation10 + $0xfc] sm:$0xf0]  ;;  %v4818_v63 = vld [vmem:[#allocation10 + $0x128] sm:$0xf]  ;;  %v5608_v27 = vld [vmem:[#allocation10 + $0x100] sm:$0xf0] }
 0x222   :  { %v4791_v51 = vor.u32 %v5606_v46, %v4788_v49  ;;  %v4819_v1 = vor.u32 %v5614_v0, %v4818_v63  ;;  %v4734_v45 = vld [vmem:[#allocation10 + $0x80] sm:$0xf]  ;;  %v4770_v49 = vld [vmem:[#allocation10 + $0xc8] sm:$0xf] }
 0x224   :  { %2740 = vmatpush.bf16.msra.mxu1 %v4731_v32  ;;  %v4906_v32 = vld [vmem:[#allocation10 + $0x1e0] sm:$0xf] }
 0x225   :  { %2716 = vmatpush.bf16.msrb.mxu3 %v4799_v56  ;;  %2753 = vmatpush.bf16.msra.mxu2 %v4827_v12  ;;  %v4907_v34 = vor.u32 %v5637_v7, %v4906_v32  ;;  %v5631_v56 = vld [vmem:[#allocation10 + $0x1b8] sm:$0xf0]  ;;  %v5630_v7 = vld [vmem:[#allocation10 + $0x1b4] sm:$0xf] }
 0x226   :  { %v4883_v58 = vor.u32 %v5631_v56, %v4882_v55  ;;  %v4860_v55 = vld [vmem:[#allocation10 + $0x18c] sm:$0xf0]  ;;  %v4722_v56 = vld [vmem:[#allocation10 + $0x68] sm:$0xf] }
 0x227   :  { %2728 = vmatpush.bf16.msra.mxu0 %v4907_v34  ;;  %v4887_v34 = vor.u32 %v5630_v7, %v4884_v33  ;;  %v4926_v33 = vld [vmem:[#allocation10 + $0x200] sm:$0xf] }
 0x228   :  { %2741 = vmatpush.bf16.msra.mxu1 %v4719_v40  ;;  %v4842_v40 = vld [vmem:[#allocation10 + $0x158] sm:$0xf] }
 0x229   :  { %2717 = vmatpush.bf16.msrb.mxu3 %v4787_v4  ;;  %2754 = vmatpush.bf16.msra.mxu2 %v4815_v25  ;;  %v4843_v42 = vor.u32 %v5620_v41, %v4842_v40  ;;  %v5628_v4 = vld [vmem:[#allocation10 + $0x1a0] sm:$0xf0]  ;;  %v5599_v25 = vld [vmem:[#allocation10 + $0xb8] sm:$0xf0]  ;;  %v5605_v40 = vld [vmem:[#allocation10 + $0xe8] sm:$0xf0] }
 0x22a   :  { %v4871_v54 = vor.u32 %v5628_v4, %v4870_v2  ;;  %v4759_v29 = vor.u32 %v5599_v25, %v4758_v22  ;;  %v4783_v41 = vor.u32 %v5605_v40, %v4782_v36  ;;  %v5584_v2 = vld [vmem:[#allocation10 + $0x40] sm:$0xf0]  ;;  %v4938_v25 = vld [vmem:[#allocation10 + $0x218] sm:$0xf]  ;;  %v5026_v36 = vld [vmem:[#allocation11 + $0x90] sm:$0xf] }
 0x22b   :  { %2729 = vmatpush.bf16.msra.mxu0 %v4895_v47  ;;  %v5593_v47 = vld [vmem:[#allocation10 + $0x88] sm:$0xf0]  ;;  %v5667_v40 = vld [vmem:[#allocation11 + $0x98] sm:$0xf0] }
 0x22c   :  { %2742 = vmatpush.bf16.msra.mxu1 %v4707_v43  ;;  %v4935_v43 = vor.u32 %v5642_v48, %v4932_v50  ;;  %v5602_v48 = vld [vmem:[#allocation10 + $0xd0] sm:$0xf0]  ;;  %v6169_v50 = vld [vmem:[%s6221_s8] sm:$0x7] }
 0x22d   :  { %2718 = vmatpush.bf16.msrb.mxu3 %v4775_v15  ;;  %2755 = vmatpush.bf16.msra.mxu2 %v4803_v37  ;;  %v1698_v57 = vperm.slane %v6169_v50, 0 }
 0x22f   :  { %2730 = vmatpush.bf16.msra.mxu0 %v4883_v58 }
 0x230   :  { %2743 = vmatpush.bf16.msra.mxu1 %v4695_v60  ;;  %v4920_v60 = vld [vmem:[#allocation10 + $0x204] sm:$0xf0] }
 0x231   :  { %2719 = vmatpush.bf16.msrb.mxu3 %v4763_v31  ;;  %2756 = vmatpush.bf16.msra.mxu2 %v4791_v51  ;;  %v4923_v62 = vor.u32 %v5639_v52, %v4920_v60  ;;  %v4735_v51 = vor.u32 %v5593_v47, %v4734_v45  ;;  %v4723_v52 = vor.u32 %v5590_v59, %v4722_v56  ;;  %v1699_v60 = vperm.slane %v6169_v50, 1  ;;  %v5014_v47 = vld [vmem:[#allocation11 + $0x78] sm:$0xf] }
 0x232   :  { %v4890_v59 = vld [vmem:[#allocation10 + $0x1b8] sm:$0xf] }
 0x233   :  { %2731 = vmatpush.bf16.msra.mxu0 %v4871_v54 }
 0x234   :  { %2744 = vmatpush.bf16.msra.mxu1 %v4683_v9  ;;  %v4764_v9 = vld [vmem:[#allocation10 + $0xcc] sm:$0xf0] }
 0x235   :  { %2764 = vmatpush.bf16.msra.mxu3 %v4947_v38  ;;  %2757 = vmatpush.bf16.msra.mxu2 %v4779_v61  ;;  %v4767_v12 = vor.u32 %v5600_v5, %v4764_v9  ;;  %v4747_v38 = vor.u32 %v5596_v35, %v4746_v23  ;;  %v4710_v61 = vld [vmem:[#allocation10 + $0x50] sm:$0xf]  ;;  %v5038_v23 = vld [vmem:[#allocation11 + $0xa8] sm:$0xf]  ;;  %v5670_v35 = vld [vmem:[#allocation11 + $0xb0] sm:$0xf0] }
 0x237   :  { %2732 = vmatpush.bf16.msra.mxu0 %v4859_v18  ;;  %v4687_v18 = vor.u32 %v5581_v19, %v4686_v13  ;;  %v4978_v13 = vld [vmem:[#allocation11 + $0x30] sm:$0xf]  ;;  %v5655_v19 = vld [vmem:[#allocation11 + $0x38] sm:$0xf0] }
 0x238   :  { %2745 = vmatpush.bf16.msra.mxu1 %v4671_v21  ;;  %v5633_v21 = vld [vmem:[#allocation10 + $0x1cc] sm:$0xf] }
 0x239   :  { %2765 = vmatpush.bf16.msra.mxu3 %v4935_v43  ;;  %2758 = vmatpush.bf16.msra.mxu2 %v4767_v12  ;;  %v4899_v24 = vor.u32 %v5633_v21, %v4896_v39  ;;  %v4771_v43 = vor.u32 %v5602_v48, %v4770_v49  ;;  %v5664_v49 = vld [vmem:[#allocation11 + $0x80] sm:$0xf0] }
 0x23b   :  { %2777 = vmatpush.bf16.msrb.mxu0 %v4759_v29  ;;  %v5578_v29 = vld [vmem:[#allocation10 + $0x10] sm:$0xf0] }
 0x23c   :  { %2790 = vmatpush.bf16.msrb.mxu1 %v4855_v30  ;;  %v4795_v30 = vor.u32 %v5608_v27, %v4794_v26  ;;  %v5644_v26 = vld [vmem:[#allocation10 + $0x220] sm:$0xf0]  ;;  %v4674_v27 = vld [vmem:[#allocation10 + $0x8] sm:$0xf] }
 0x23d   :  { %2766 = vmatpush.bf16.msra.mxu3 %v4923_v62  ;;  %v5587_v62 = vld [vmem:[#allocation10 + $0x58] sm:$0xf0]  ;;  %v4939_v7 = vor.u32 %v5644_v26, %v4938_v25  ;;  %v4966_v25 = vld [vmem:[#allocation11 + $0x18] sm:$0xf]  ;;  %v5652_v26 = vld [vmem:[#allocation11 + $0x20] sm:$0xf0] }
 0x23e   :  { %v4711_v0 = vor.u32 %v5587_v62, %v4710_v61  ;;  %v5134_v61 = vld [vmem:[#allocation11 + $0x168] sm:$0xf]  ;;  %v5694_v62 = vld [vmem:[#allocation11 + $0x170] sm:$0xf0] }
 0x23f   :  { %2778 = vmatpush.bf16.msrb.mxu0 %v4747_v38  ;;  %v5039_v38 = vor.u32 %v5670_v35, %v5038_v23  ;;  %v5136_v23 = vld [vmem:[#allocation11 + $0x174] sm:$0xf0] }
 0x240   :  { %2791 = vmatpush.bf16.msrb.mxu1 %v4843_v42  ;;  %v5627_v42 = vld [vmem:[#allocation10 + $0x19c] sm:$0xf] }
 0x241   :  { %2767 = vmatpush.bf16.msra.mxu3 %v4911_v14  ;;  %v4875_v46 = vor.u32 %v5627_v42, %v4872_v44  ;;  %v4914_v42 = vld [vmem:[#allocation10 + $0x1e8] sm:$0xf]  ;;  %v5638_v44 = vld [vmem:[#allocation10 + $0x1f0] sm:$0xf0] }
 0x243   :  { %2779 = vmatpush.bf16.msrb.mxu0 %v4735_v51  ;;  %v4915_v51 = vor.u32 %v5638_v44, %v4914_v42  ;;  %v5660_v42 = vld [vmem:[#allocation11 + $0x64] sm:$0xf]  ;;  %v5004_v44 = vld [vmem:[#allocation11 + $0x6c] sm:$0xf0] }
 0x244   :  { %2792 = vmatpush.bf16.msrb.mxu1 %v4831_v28  ;;  %v5624_v28 = vld [vmem:[#allocation10 + $0x184] sm:$0xf] }
 0x245   :  { %2768 = vmatpush.bf16.msra.mxu3 %v4899_v24  ;;  %v4863_v58 = vor.u32 %v5624_v28, %v4860_v55  ;;  %v5635_v28 = vld [vmem:[#allocation10 + $0x1d8] sm:$0xf0]  ;;  %v5015_v55 = vor.u32 %v5664_v49, %v5014_v47  ;;  %v4992_v47 = vld [vmem:[#allocation11 + $0x54] sm:$0xf0] }
 0x247   :  { %2780 = vmatpush.bf16.msrb.mxu0 %v4723_v52 }
 0x248   :  { %2793 = vmatpush.bf16.msrb.mxu1 %v4819_v1  ;;  %v4698_v1 = vld [vmem:[#allocation10 + $0x38] sm:$0xf] }
 0x249   :  { %2769 = vmatpush.bf16.msra.mxu3 %v4887_v34  ;;  %v4699_v9 = vor.u32 %v5584_v2, %v4698_v1  ;;  %v5641_v34 = vld [vmem:[#allocation10 + $0x208] sm:$0xf0]  ;;  %v4990_v1 = vld [vmem:[#allocation11 + $0x48] sm:$0xf]  ;;  %v5658_v2 = vld [vmem:[#allocation11 + $0x50] sm:$0xf0] }
 0x24b   :  { %2781 = vmatpush.bf16.msrb.mxu0 %v4711_v0 }
 0x24c   :  { %2794 = vmatpush.bf16.msrb.mxu1 %v4807_v16 }
 0x24d   :  { %2770 = vmatpush.bf16.msra.mxu3 %v4875_v46  ;;  %v5027_v46 = vor.u32 %v5667_v40, %v5026_v36  ;;  %v5663_v36 = vld [vmem:[#allocation11 + $0x7c] sm:$0xf] }
 0x24f   :  { %2782 = vmatpush.bf16.msrb.mxu0 %v4699_v9 }
 0x250   :  { %2795 = vmatpush.bf16.msrb.mxu1 %v4795_v30  ;;  %v4675_v30 = vor.u32 %v5578_v29, %v4674_v27 }
 0x251   :  { %2771 = vmatpush.bf16.msra.mxu3 %v4863_v58  ;;  %v5661_v58 = vld [vmem:[#allocation11 + $0x68] sm:$0xf0] }
 0x253   :  { %2783 = vmatpush.bf16.msrb.mxu0 %v4687_v18  ;;  %v5110_v18 = vld [vmem:[#allocation11 + $0x138] sm:$0xf] }
 0x254   :  { %2796 = vmatpush.bf16.msrb.mxu1 %v4783_v41  ;;  %v1700_v41 = vperm.slane %v6169_v50, 2 }
 0x257   :  { %2784 = vmatpush.bf16.msrb.mxu0 %v4675_v30  ;;  %v5666_v30 = vld [vmem:[#allocation11 + $0x94] sm:$0xf] }
 0x258   :  { %2797 = vmatpush.bf16.msrb.mxu1 %v4771_v43 }
 0x278   :  { %v6160_v6 = vpop.f32.mrf.mxu1  ;;  %v6162_v8 = vpop.f32.mrf.mxu0 }
 0x279   :  { %v2098_v63 = vadd.f32 %v6160_v6, %v1698_v57  ;;  %v2137_v4 = vadd.f32 %v6162_v8, %v1699_v60  ;;  %v5647_v6 = vld [vmem:[#allocation10 + $0x238] sm:$0xf0]  ;;  %v5002_v57 = vld [vmem:[#allocation11 + $0x60] sm:$0xf]  ;;  %v5632_v60 = vld [vmem:[#allocation10 + $0x1c0] sm:$0xf0] }
 0x27a   :  { %v6164_v15 = vpop.f32.mrf.mxu2  ;;  %v4951_v8 = vor.u32 %v5647_v6, %v4950_v17  ;;  %v5626_v6 = vld [vmem:[#allocation10 + $0x190] sm:$0xf0] }
 0x27b   :  { %v2111_v10 = vadd.f32 %v6164_v15, %v2098_v63  ;;  %v5003_v63 = vor.u32 %v5661_v58, %v5002_v57  ;;  %v4980_v57 = vld [vmem:[#allocation11 + $0x3c] sm:$0xf0]  ;;  %v5690_v58 = vld [vmem:[#allocation11 + $0x154] sm:$0xf] }
 0x280   :  { %v2099_v31 = vpop.f32.mrf.mxu1  ;;  %v2138_v32 = vpop.f32.mrf.mxu0 }
 0x282   :  { %v2112_v37 = vpop.f32.mrf.mxu2 }
 0x283   :  { %v4927_v37 = vor.u32 %v5641_v34, %v4926_v33  ;;  %v5649_v33 = vld [vmem:[#allocation11 + $0x8] sm:$0xf0] }
 0x284   :  { %v5693_v34 = vld [vmem:[#allocation11 + $0x16c] sm:$0xf] }
 0x285   :  { %v5139_v40 = vor.u32 %v5693_v34, %v5136_v23  ;;  %v5050_v23 = vld [vmem:[#allocation11 + $0xc0] sm:$0xf] }
 0x288   :  { %v2149_v53 = vpop.f32.mrf.mxu1  ;;  %v6171_v20 = vpop.f32.mrf.mxu0 }
 0x289   :  { %v2150_v11 = vadd.f32 %v2149_v53, %v2137_v4  ;;  %v4902_v53 = vld [vmem:[#allocation10 + $0x1d0] sm:$0xf] }
 0x28a   :  { %v4903_v50 = vor.u32 %v5635_v28, %v4902_v53  ;;  %v5230_v53 = vld [vmem:[#allocation11 + $0x228] sm:$0xf]  ;;  %v5718_v28 = vld [vmem:[#allocation11 + $0x230] sm:$0xf0] }
 0x290   :  { %v2151_v5 = vpop.f32.mrf.mxu1  ;;  %v2190_v54 = vpop.f32.mrf.mxu0 }
 0x291   :  { %v4891_v5 = vor.u32 %v5632_v60, %v4890_v59  ;;  %v5135_v54 = vor.u32 %v5694_v62, %v5134_v61  ;;  %v5682_v60 = vld [vmem:[#allocation11 + $0x110] sm:$0xf0]  ;;  %v5218_v62 = vld [vmem:[#allocation11 + $0x210] sm:$0xf] }
 0x292   :  { %v2123_v12 = vpop.f32.mrf.mxu3  ;;  %v2162_v14 = vpop.f32.mrf.mxu2 }
 0x293   :  { %v2124_v16 = vadd.f32 %v2123_v12, %v2111_v10  ;;  %v2163_v3 = vadd.f32 %v2162_v14, %v2150_v11  ;;  %v5629_v10 = vld [vmem:[#allocation10 + $0x1a8] sm:$0xf0]  ;;  %v5122_v11 = vld [vmem:[#allocation11 + $0x150] sm:$0xf]  ;;  %v5691_v12 = vld [vmem:[#allocation11 + $0x158] sm:$0xf0]  ;;  %v4991_v14 = vor.u32 %v5658_v2, %v4990_v1 }
 0x294   :  { %v5123_v17 = vor.u32 %v5691_v12, %v5122_v11  ;;  %v4968_v2 = vld [vmem:[#allocation11 + $0x24] sm:$0xf0]  ;;  %v5206_v12 = vld [vmem:[#allocation11 + $0x1f8] sm:$0xf] }
 0x295   :  { %v2205_v21 = vmax.f32 %v2124_v16, 0.0  ;;  %v2206_v39 = vmax.f32 %v2163_v3, 0.0  ;;  %v4866_v3 = vld [vmem:[#allocation10 + $0x188] sm:$0xf] }
 0x297   :  { %v6178_v22 = vpack.c.bf16 %v2205_v21, %v2205_v21  ;;  %v2209_v24 = vpack.c.bf16 %v2206_v39, %v2206_v39  ;;  %v5688_v21 = vld [vmem:[#allocation11 + $0x140] sm:$0xf0]  ;;  %v5669_v39 = vld [vmem:[#allocation11 + $0xac] sm:$0xf] }
 0x298   :  { %v2201_v15 = vpop.f32.mrf.mxu1  ;;  %v5111_v27 = vor.u32 %v5688_v21, %v5110_v18  ;;  %v5142_v21 = vld [vmem:[#allocation11 + $0x170] sm:$0xf] }
 0x299   :  { %2707 = vmatmul.bf16.vlgmr.msrb.gmra.mxu2 %v6178_v22  ;;  %2720 = vmatmul.bf16.vlgmr.msrb.gmra.mxu3 %v2209_v24 }
 0x29a   :  { %2746 = vmatmul.bf16.vlgmr.msra.gmra.mxu1 %v6178_v22  ;;  %v2125_v31 = vpop.f32.mrf.mxu3  ;;  %v2164_v32 = vpop.f32.mrf.mxu2  ;;  %2803 = vmatpush.bf16.msrb.mxu2 %v4951_v8  ;;  %v5040_v8 = vld [vmem:[#allocation11 + $0xb4] sm:$0xf0] }
 0x29b   :  { %3310 = vmatpush.bf16.msrb.mxu3 %v5039_v38  ;;  %v5043_v29 = vor.u32 %v5669_v39, %v5040_v8  ;;  %v5028_v31 = vld [vmem:[#allocation11 + $0x9c] sm:$0xf0]  ;;  %v4967_v32 = vor.u32 %v5652_v26, %v4966_v25  ;;  %v5695_v39 = vld [vmem:[#allocation11 + $0x178] sm:$0xf0]  ;;  %v5062_v8 = vld [vmem:[#allocation11 + $0xd8] sm:$0xf] }
 0x29c   :  { %v5031_v35 = vor.u32 %v5666_v30, %v5028_v31  ;;  %v5676_v25 = vld [vmem:[#allocation11 + $0xe0] sm:$0xf0]  ;;  %v5088_v31 = vld [vmem:[#allocation11 + $0x114] sm:$0xf0] }
 0x29d   :  { %v5063_v26 = vor.u32 %v5676_v25, %v5062_v8  ;;  %v5705_v8 = vld [vmem:[#allocation11 + $0x1cc] sm:$0xf] }
 0x29e   :  { %2804 = vmatpush.bf16.msrb.mxu2 %v4939_v7  ;;  %v4954_v7 = vld [vmem:[#allocation11] sm:$0xf] }
 0x29f   :  { %3311 = vmatpush.bf16.msrb.mxu3 %v5027_v46  ;;  %v4955_v38 = vor.u32 %v5649_v33, %v4954_v7  ;;  %v5657_v46 = vld [vmem:[#allocation11 + $0x4c] sm:$0xf]  ;;  %v5692_v7 = vld [vmem:[#allocation11 + $0x160] sm:$0xf0] }
 0x2a0   :  { %v2203_v45 = vpop.f32.mrf.mxu1  ;;  %v4995_v49 = vor.u32 %v5657_v46, %v4992_v47  ;;  %v5076_v46 = vld [vmem:[#allocation11 + $0xfc] sm:$0xf0] }
 0x2a1   :  { %v5007_v45 = vor.u32 %v5660_v42, %v5004_v44  ;;  %v5706_v42 = vld [vmem:[#allocation11 + $0x1d0] sm:$0xf0]  ;;  %v5118_v47 = vld [vmem:[#allocation11 + $0x140] sm:$0xf] }
 0x2a2   :  { %v2175_v48 = vpop.f32.mrf.mxu3  ;;  %2805 = vmatpush.bf16.msrb.mxu2 %v4927_v37  ;;  %v5016_v37 = vld [vmem:[#allocation11 + $0x84] sm:$0xf0]  ;;  %v5678_v44 = vld [vmem:[#allocation11 + $0xf4] sm:$0xf] }
 0x2a3   :  { %v2176_v43 = vadd.f32 %v2175_v48, %v1700_v41  ;;  %3312 = vmatpush.bf16.msrb.mxu3 %v5015_v55  ;;  %v5019_v41 = vor.u32 %v5663_v36, %v5016_v37  ;;  %v5098_v48 = vld [vmem:[#allocation11 + $0x120] sm:$0xf]  ;;  %v5654_v55 = vld [vmem:[#allocation11 + $0x34] sm:$0xf]  ;;  %v5717_v37 = vld [vmem:[#allocation11 + $0x22c] sm:$0xf] }
 0x2a5   :  { %v2189_v56 = vadd.f32 %v6171_v20, %v2176_v43  ;;  %v4878_v20 = vld [vmem:[#allocation10 + $0x1a0] sm:$0xf] }
 0x2a6   :  { %2806 = vmatpush.bf16.msrb.mxu2 %v4915_v51  ;;  %v4879_v16 = vor.u32 %v5629_v10, %v4878_v20  ;;  %v5685_v51 = vld [vmem:[#allocation11 + $0x128] sm:$0xf0]  ;;  %v5679_v10 = vld [vmem:[#allocation11 + $0xf8] sm:$0xf0] }
 0x2a7   :  { %v2202_v52 = vadd.f32 %v2201_v15, %v2189_v56  ;;  %3313 = vmatpush.bf16.msrb.mxu3 %v5003_v63  ;;  %v4867_v15 = vor.u32 %v5626_v6, %v4866_v3  ;;  %v5099_v43 = vor.u32 %v5685_v51, %v5098_v48  ;;  %v5231_v56 = vor.u32 %v5718_v28, %v5230_v53  ;;  %v5715_v63 = vld [vmem:[#allocation11 + $0x218] sm:$0xf0]  ;;  %v5684_v3 = vld [vmem:[#allocation11 + $0x124] sm:$0xf]  ;;  %v5220_v53 = vld [vmem:[#allocation11 + $0x21c] sm:$0xf0] }
 0x2a8   :  { %v5219_v1 = vor.u32 %v5715_v63, %v5218_v62  ;;  %v5079_v48 = vor.u32 %v5678_v44, %v5076_v46  ;;  %v5208_v62 = vld [vmem:[#allocation11 + $0x204] sm:$0xf0]  ;;  %v5699_v44 = vld [vmem:[#allocation11 + $0x19c] sm:$0xf] }
 0x2a9   :  { %v2207_v0 = vmax.f32 %v2202_v52, 0.0  ;;  %2759 = vmatmul.bf16.vlgmr.msra.gmra.mxu2 %v2209_v24  ;;  %v5086_v52 = vld [vmem:[#allocation11 + $0x108] sm:$0xf]  ;;  %3336 = vmatpush.bf16.msra.mxu1 %v5231_v56  ;;  %v5703_v56 = vld [vmem:[#allocation11 + $0x1b8] sm:$0xf0] }
 0x2aa   :  { %2798 = vmatmul.bf16.vlgmr.msrb.gmra.mxu1 %v2209_v24  ;;  %v2177_v4 = vpop.f32.mrf.mxu3  ;;  %2807 = vmatpush.bf16.msrb.mxu2 %v4903_v50  ;;  %v4979_v24 = vor.u32 %v5655_v19, %v4978_v13  ;;  %v5124_v50 = vld [vmem:[#allocation11 + $0x15c] sm:$0xf0]  ;;  %v5087_v61 = vor.u32 %v5682_v60, %v5086_v52  ;;  %v5648_v13 = vld [vmem:[#allocation11 + $0x4] sm:$0xf] }
 0x2ab   :  { %v2210_v9 = vpack.c.bf16 %v2207_v0, %v2207_v0  ;;  %3314 = vmatpush.bf16.msrb.mxu3 %v4991_v14  ;;  %v5127_v59 = vor.u32 %v5690_v58, %v5124_v50  ;;  %v5651_v0 = vld [vmem:[#allocation11 + $0x1c] sm:$0xf]  ;;  %v5712_v14 = vld [vmem:[#allocation11 + $0x200] sm:$0xf0]  ;;  %v5064_v50 = vld [vmem:[#allocation11 + $0xe4] sm:$0xf0] }
 0x2ac   :  { %v5687_v4 = vld [vmem:[#allocation11 + $0x13c] sm:$0xf]  ;;  %v4971_v20 = vor.u32 %v5651_v0, %v4968_v2  ;;  %v5207_v19 = vor.u32 %v5712_v14, %v5206_v12  ;;  %v5158_v0 = vld [vmem:[#allocation11 + $0x198] sm:$0xf]  ;;  %v5672_v2 = vld [vmem:[#allocation11 + $0xc4] sm:$0xf] }
 0x2ad   :  { %2733 = vmatmul.bf16.vlgmr.msra.gmra.mxu0 %v2210_v9  ;;  %2772 = vmatmul.bf16.vlgmr.msra.gmra.mxu3 %v2210_v9  ;;  %v5196_v12 = vld [vmem:[#allocation11 + $0x1ec] sm:$0xf0] }
 0x2ae   :  { %2808 = vmatpush.bf16.msrb.mxu2 %v4891_v5  ;;  %3323 = vmatpush.bf16.msra.mxu0 %v5135_v54  ;;  %v5112_v5 = vld [vmem:[#allocation11 + $0x144] sm:$0xf0] }
 0x2af   :  { %3315 = vmatpush.bf16.msrb.mxu3 %v4979_v24  ;;  %v5115_v54 = vor.u32 %v5687_v4, %v5112_v5  ;;  %3337 = vmatpush.bf16.msra.mxu1 %v5219_v1  ;;  %v5143_v24 = vor.u32 %v5695_v39, %v5142_v21  ;;  %v5700_v1 = vld [vmem:[#allocation11 + $0x1a0] sm:$0xf0]  ;;  %v5052_v5 = vld [vmem:[#allocation11 + $0xcc] sm:$0xf0] }
 0x2b0   :  { %v5159_v4 = vor.u32 %v5700_v1, %v5158_v0  ;;  %v5680_v21 = vld [vmem:[#allocation11 + $0x100] sm:$0xf0] }
 0x2b2   :  { %2809 = vmatpush.bf16.msrb.mxu2 %v4879_v16  ;;  %3324 = vmatpush.bf16.msra.mxu0 %v5123_v17  ;;  %v4956_v16 = vld [vmem:[#allocation11 + $0xc] sm:$0xf0] }
 0x2b3   :  { %3316 = vmatpush.bf16.msrb.mxu3 %v4967_v32  ;;  %v5100_v17 = vld [vmem:[#allocation11 + $0x12c] sm:$0xf0]  ;;  %v4959_v6 = vor.u32 %v5648_v13, %v4956_v16  ;;  %3338 = vmatpush.bf16.msra.mxu1 %v5207_v19  ;;  %v5130_v32 = vld [vmem:[#allocation11 + $0x158] sm:$0xf]  ;;  %v5146_v13 = vld [vmem:[#allocation11 + $0x180] sm:$0xf] }
 0x2b4   :  { %v5103_v18 = vor.u32 %v5684_v3, %v5100_v17  ;;  %v5131_v34 = vor.u32 %v5692_v7, %v5130_v32  ;;  %v5697_v19 = vld [vmem:[#allocation11 + $0x188] sm:$0xf0]  ;;  %v5046_v3 = vld [vmem:[#allocation11 + $0xb0] sm:$0xf]  ;;  %v5671_v17 = vld [vmem:[#allocation11 + $0xb8] sm:$0xf0] }
 0x2b5   :  { %v5147_v16 = vor.u32 %v5697_v19, %v5146_v13  ;;  %v5702_v7 = vld [vmem:[#allocation11 + $0x1b4] sm:$0xf] }
 0x2b6   :  { %2810 = vmatpush.bf16.msrb.mxu2 %v4867_v15  ;;  %3325 = vmatpush.bf16.msra.mxu0 %v5111_v27  ;;  %v5194_v15 = vld [vmem:[#allocation11 + $0x1e0] sm:$0xf]  ;;  %v5709_v27 = vld [vmem:[#allocation11 + $0x1e8] sm:$0xf0] }
 0x2b7   :  { %3317 = vmatpush.bf16.msrb.mxu3 %v4955_v38  ;;  %v5195_v30 = vor.u32 %v5709_v27, %v5194_v15  ;;  %v5232_v38 = vld [vmem:[#allocation11 + $0x234] sm:$0xf0]  ;;  %v5668_v27 = vld [vmem:[#allocation11 + $0xa0] sm:$0xf0] }
 0x2b8   :  { %v5034_v15 = vld [vmem:[#allocation11 + $0x98] sm:$0xf] }
 0x2b9   :  { %2811 = vmatmul.bf16.vlgmr.msrb.gmra.mxu2 %v2210_v9  ;;  %v5074_v9 = vld [vmem:[#allocation11 + $0xf0] sm:$0xf]  ;;  %3339 = vmatpush.bf16.msra.mxu1 %v5195_v30  ;;  %v5070_v30 = vld [vmem:[#allocation11 + $0xe0] sm:$0xf] }
 0x2ba   :  { %3349 = vmatpush.bf16.msra.mxu2 %v5043_v29  ;;  %3326 = vmatpush.bf16.msra.mxu0 %v5099_v43  ;;  %v5075_v11 = vor.u32 %v5679_v10, %v5074_v9  ;;  %v5681_v29 = vld [vmem:[#allocation11 + $0x10c] sm:$0xf]  ;;  %v5714_v43 = vld [vmem:[#allocation11 + $0x214] sm:$0xf]  ;;  %v5055_v9 = vor.u32 %v5672_v2, %v5052_v5 }
 0x2bb   :  { %3362 = vmatpush.bf16.msra.mxu3 %v5139_v40  ;;  %v5091_v33 = vor.u32 %v5681_v29, %v5088_v31  ;;  %v5235_v40 = vor.u32 %v5717_v37, %v5232_v38  ;;  %v5223_v28 = vor.u32 %v5714_v43, %v5220_v53  ;;  %v5035_v29 = vor.u32 %v5668_v27, %v5034_v15  ;;  %v5677_v31 = vld [vmem:[#allocation11 + $0xe8] sm:$0xf0]  ;;  %v5058_v38 = vld [vmem:[#allocation11 + $0xc8] sm:$0xf]  ;;  %v5214_v27 = vld [vmem:[#allocation11 + $0x200] sm:$0xf] }
 0x2bc   :  { %v5071_v32 = vor.u32 %v5677_v31, %v5070_v30  ;;  %v5665_v37 = vld [vmem:[#allocation11 + $0x88] sm:$0xf0] }
 0x2bd   :  { %2785 = vmatmul.bf16.vlgmr.msrb.gmra.mxu0 %v6178_v22  ;;  %v4983_v22 = vor.u32 %v5654_v55, %v4980_v57  ;;  %v5170_v55 = vld [vmem:[#allocation11 + $0x1b0] sm:$0xf]  ;;  %v5675_v57 = vld [vmem:[#allocation11 + $0xdc] sm:$0xf]  ;;  %v5653_v5 = vld [vmem:[#allocation11 + $0x28] sm:$0xf0] }
 0x2be   :  { %3350 = vmatpush.bf16.msra.mxu2 %v5031_v35  ;;  %3327 = vmatpush.bf16.msra.mxu0 %v5087_v61  ;;  %v5673_v35 = vld [vmem:[#allocation11 + $0xc8] sm:$0xf0]  ;;  %v5171_v58 = vor.u32 %v5703_v56, %v5170_v55  ;;  %v5067_v52 = vor.u32 %v5675_v57, %v5064_v50  ;;  %v5711_v61 = vld [vmem:[#allocation11 + $0x1fc] sm:$0xf]  ;;  %v5148_v55 = vld [vmem:[#allocation11 + $0x18c] sm:$0xf0] }
 0x2bf   :  { %3363 = vmatpush.bf16.msra.mxu3 %v5127_v59  ;;  %v5051_v36 = vor.u32 %v5673_v35, %v5050_v23  ;;  %v5686_v59 = vld [vmem:[#allocation11 + $0x130] sm:$0xf0]  ;;  %v5211_v63 = vor.u32 %v5711_v61, %v5208_v62  ;;  %v4998_v50 = vld [vmem:[#allocation11 + $0x50] sm:$0xf]  ;;  %v4986_v61 = vld [vmem:[#allocation11 + $0x38] sm:$0xf] }
 0x2c0   :  { %v5656_v62 = vld [vmem:[#allocation11 + $0x40] sm:$0xf0] }
 0x2c2   :  { %3351 = vmatpush.bf16.msra.mxu2 %v5019_v41  ;;  %3328 = vmatpush.bf16.msra.mxu0 %v5075_v11  ;;  %v5182_v41 = vld [vmem:[#allocation11 + $0x1c8] sm:$0xf]  ;;  %v5708_v11 = vld [vmem:[#allocation11 + $0x1e4] sm:$0xf] }
 0x2c3   :  { %3364 = vmatpush.bf16.msra.mxu3 %v5115_v54  ;;  %v5683_v54 = vld [vmem:[#allocation11 + $0x118] sm:$0xf0]  ;;  %v5199_v14 = vor.u32 %v5708_v11, %v5196_v12 }
 0x2c6   :  { %3352 = vmatpush.bf16.msra.mxu2 %v5007_v45  ;;  %3329 = vmatpush.bf16.msra.mxu0 %v5063_v26  ;;  %v5183_v45 = vor.u32 %v5706_v42, %v5182_v41  ;;  %v5674_v41 = vld [vmem:[#allocation11 + $0xd0] sm:$0xf0] }
 0x2c7   :  { %3365 = vmatpush.bf16.msra.mxu3 %v5103_v18  ;;  %v5047_v18 = vor.u32 %v5671_v17, %v5046_v3  ;;  %v5059_v42 = vor.u32 %v5674_v41, %v5058_v38  ;;  %v5226_v17 = vld [vmem:[#allocation11 + $0x218] sm:$0xf]  ;;  %v5190_v41 = vld [vmem:[#allocation11 + $0x1d0] sm:$0xf] }
 0x2c8   :  { %3340 = vmatpush.bf16.msra.mxu1 %v5183_v45  ;;  %v5160_v45 = vld [vmem:[#allocation11 + $0x1a4] sm:$0xf0] }
 0x2ca   :  { %3353 = vmatpush.bf16.msra.mxu2 %v4995_v49  ;;  %v5689_v49 = vld [vmem:[#allocation11 + $0x148] sm:$0xf0]  ;;  %3330 = vmatpush.bf16.msra.mxu0 %v5051_v36  ;;  %v5022_v36 = vld [vmem:[#allocation11 + $0x80] sm:$0xf] }
 0x2cb   :  { %3366 = vmatpush.bf16.msra.mxu3 %v5091_v33  ;;  %v5119_v51 = vor.u32 %v5689_v49, %v5118_v47  ;;  %v5172_v33 = vld [vmem:[#allocation11 + $0x1bc] sm:$0xf0]  ;;  %v5163_v47 = vor.u32 %v5699_v44, %v5160_v45  ;;  %v5725_v45 = vld [vmem:[#allocation13 + $0x28] sm:$0xff] }
 0x2cc   :  { %3341 = vmatpush.bf16.msra.mxu1 %v5171_v58  ;;  %v6190_v49 = vld [vmem:[%s6223_s10] sm:$0x7] }
 0x2cd   :  { %v2309_v43 = vperm.slane %v6190_v49, 0  ;;  %v2310_v0 = vperm.slane %v6190_v49, 1 }
 0x2ce   :  { %3354 = vmatpush.bf16.msra.mxu2 %v4983_v22  ;;  %3375 = vmatpush.bf16.msrb.mxu0 %v5235_v40  ;;  %v5106_v22 = vld [vmem:[#allocation11 + $0x128] sm:$0xf]  ;;  %v5023_v40 = vor.u32 %v5665_v37, %v5022_v36  ;;  %v5726_v36 = vld [vmem:[#allocation13 + $0x30] sm:$0xff] }
 0x2cf   :  { %3367 = vmatpush.bf16.msra.mxu3 %v5079_v48  ;;  %v5107_v60 = vor.u32 %v5686_v59, %v5106_v22  ;;  %v5010_v48 = vld [vmem:[#allocation11 + $0x68] sm:$0xf]  ;;  %v5659_v22 = vld [vmem:[#allocation11 + $0x58] sm:$0xf0] }
 0x2d0   :  { %3342 = vmatpush.bf16.msra.mxu1 %v5159_v4  ;;  %v4974_v4 = vld [vmem:[#allocation11 + $0x20] sm:$0xf] }
 0x2d2   :  { %3355 = vmatpush.bf16.msra.mxu2 %v4971_v20  ;;  %3376 = vmatpush.bf16.msrb.mxu0 %v5223_v28  ;;  %v5094_v20 = vld [vmem:[#allocation11 + $0x110] sm:$0xf]  ;;  %v5696_v28 = vld [vmem:[#allocation11 + $0x184] sm:$0xf] }
 0x2d3   :  { %3368 = vmatpush.bf16.msra.mxu3 %v5067_v52  ;;  %v5095_v10 = vor.u32 %v5683_v54, %v5094_v20  ;;  %v5151_v56 = vor.u32 %v5696_v28, %v5148_v55  ;;  %v4999_v52 = vor.u32 %v5659_v22, %v4998_v50  ;;  %v5238_v54 = vld [vmem:[#allocation11 + $0x230] sm:$0xf]  ;;  %v5735_v55 = vld [vmem:[#allocation13 + $0x78] sm:$0xff] }
 0x2d4   :  { %3343 = vmatpush.bf16.msra.mxu1 %v5147_v16 }
 0x2d6   :  { %3356 = vmatpush.bf16.msra.mxu2 %v4959_v6  ;;  %3377 = vmatpush.bf16.msrb.mxu0 %v5211_v63  ;;  %v5082_v6 = vld [vmem:[#allocation11 + $0xf8] sm:$0xf]  ;;  %v4987_v63 = vor.u32 %v5656_v62, %v4986_v61  ;;  %v5724_v62 = vld [vmem:[#allocation13 + $0x20] sm:$0xff] }
 0x2d7   :  { %3369 = vmatpush.bf16.msra.mxu3 %v5055_v9  ;;  %v5083_v39 = vor.u32 %v5680_v21, %v5082_v6  ;;  %v5719_v9 = vld [vmem:[#allocation11 + $0x238] sm:$0xf0]  ;;  %v5716_v6 = vld [vmem:[#allocation11 + $0x220] sm:$0xf0]  ;;  %v4962_v21 = vld [vmem:[#allocation11 + $0x8] sm:$0xf] }
 0x2d8   :  { %3388 = vmatpush.bf16.msrb.mxu1 %v5047_v18  ;;  %v5239_v13 = vor.u32 %v5719_v9, %v5238_v54  ;;  %v5730_v54 = vld [vmem:[#allocation13 + $0x50] sm:$0xff] }
 0x2d9   :  { %v5742_v9 = vld [vmem:[#allocation13 + $0xb0] sm:$0xff] }
 0x2da   :  { %3401 = vmatpush.bf16.msrb.mxu2 %v5143_v24  ;;  %3378 = vmatpush.bf16.msrb.mxu0 %v5199_v14  ;;  %v5184_v24 = vld [vmem:[#allocation11 + $0x1d4] sm:$0xf0] }
 0x2db   :  { %v5187_v26 = vor.u32 %v5705_v8, %v5184_v24 }
 0x2dc   :  { %3389 = vmatpush.bf16.msrb.mxu1 %v5035_v29  ;;  %v5713_v29 = vld [vmem:[#allocation11 + $0x208] sm:$0xf0] }
 0x2de   :  { %3402 = vmatpush.bf16.msrb.mxu2 %v5131_v34  ;;  %3379 = vmatpush.bf16.msrb.mxu0 %v5187_v26  ;;  %v5175_v34 = vor.u32 %v5702_v7, %v5172_v33  ;;  %v5215_v7 = vor.u32 %v5713_v29, %v5214_v27  ;;  %v2311_v33 = vperm.slane %v6190_v49, 2  ;;  %v5704_v49 = vld [vmem:[#allocation11 + $0x1c0] sm:$0xf0] }
 0x2e0   :  { %3390 = vmatpush.bf16.msrb.mxu1 %v5023_v40 }
 0x2e2   :  { %3403 = vmatpush.bf16.msrb.mxu2 %v5119_v51  ;;  %3380 = vmatpush.bf16.msrb.mxu0 %v5175_v34  ;;  %v5662_v51 = vld [vmem:[#allocation11 + $0x70] sm:$0xf0]  ;;  %v5202_v34 = vld [vmem:[#allocation11 + $0x1e8] sm:$0xf] }
 0x2e3   :  { %v5011_v53 = vor.u32 %v5662_v51, %v5010_v48  ;;  %v5178_v51 = vld [vmem:[#allocation11 + $0x1b8] sm:$0xf] }
 0x2e4   :  { %v5179_v28 = vor.u32 %v5704_v49, %v5178_v51 }
 0x2e5   :  { %3391 = vmatpush.bf16.msrb.mxu1 %v5011_v53 }
 0x2e6   :  { %3404 = vmatpush.bf16.msrb.mxu2 %v5107_v60  ;;  %3381 = vmatpush.bf16.msrb.mxu0 %v5163_v47 }
 0x2e9   :  { %3392 = vmatpush.bf16.msrb.mxu1 %v4999_v52  ;;  %v5154_v52 = vld [vmem:[#allocation11 + $0x188] sm:$0xf] }
 0x2ea   :  { %3405 = vmatpush.bf16.msrb.mxu2 %v5095_v10  ;;  %3382 = vmatpush.bf16.msrb.mxu0 %v5151_v56  ;;  %v4975_v10 = vor.u32 %v5653_v5, %v4974_v4  ;;  %v5731_v4 = vld [vmem:[#allocation13 + $0x58] sm:$0xff] }
 0x2eb   :  { %v5743_v5 = vld [vmem:[#allocation13 + $0xb8] sm:$0xff] }
 0x2ed   :  { %3393 = vmatpush.bf16.msrb.mxu1 %v4987_v63  ;;  %v5733_v63 = vld [vmem:[#allocation13 + $0x68] sm:$0xff] }
 0x2ee   :  { %3406 = vmatpush.bf16.msrb.mxu2 %v5083_v39  ;;  %v5650_v39 = vld [vmem:[#allocation11 + $0x10] sm:$0xf0] }
 0x2ef   :  { %v4963_v24 = vor.u32 %v5650_v39, %v4962_v21  ;;  %v2918_v21 = vld [vmem:[%s6225_s12] sm:$0x7] }
 0x2f0   :  { %v2920_v39 = vperm.slane %v2918_v21, 0  ;;  %v2921_v27 = vperm.slane %v2918_v21, 1 }
 0x2f1   :  { %3394 = vmatpush.bf16.msrb.mxu1 %v4975_v10  ;;  %v5720_v10 = vld [vmem:[#allocation13] sm:$0xff] }
 0x2f2   :  { %3407 = vmatpush.bf16.msrb.mxu2 %v5071_v32  ;;  %v5727_v32 = vld [vmem:[#allocation13 + $0x38] sm:$0xff] }
 0x2f5   :  { %3395 = vmatpush.bf16.msrb.mxu1 %v4963_v24 }
 0x2f6   :  { %3408 = vmatpush.bf16.msrb.mxu2 %v5059_v42  ;;  %v5707_v42 = vld [vmem:[#allocation11 + $0x1d8] sm:$0xf0] }
 0x2f7   :  { %v5191_v47 = vor.u32 %v5707_v42, %v5190_v41 }
 0x317   :  { %v6185_v25 = vpop.f32.mrf.mxu1 }
 0x318   :  { %v2748_v12 = vadd.f32 %v6185_v25, %v2310_v0  ;;  %v5227_v25 = vor.u32 %v5716_v6, %v5226_v17  ;;  %v5723_v0 = vld [vmem:[#allocation13 + $0x18] sm:$0xff] }
 0x31c   :  { %v2708_v23 = vpop.f32.mrf.mxu2  ;;  %v2721_v35 = vpop.f32.mrf.mxu3 }
 0x31d   :  { %v2709_v59 = vadd.f32 %v2708_v23, %v2309_v43  ;;  %v5710_v23 = vld [vmem:[#allocation11 + $0x1f0] sm:$0xf0] }
 0x31e   :  { %v5203_v38 = vor.u32 %v5710_v23, %v5202_v34 }
 0x31f   :  { %v2749_v46 = vpop.f32.mrf.mxu1  ;;  %v2722_v1 = vadd.f32 %v2721_v35, %v2709_v59  ;;  %v5734_v59 = vld [vmem:[#allocation13 + $0x70] sm:$0xff] }
 0x324   :  { %v2710_v57 = vpop.f32.mrf.mxu2  ;;  %v2723_v58 = vpop.f32.mrf.mxu3 }
 0x325   :  { %v5166_v57 = vld [vmem:[#allocation11 + $0x1a0] sm:$0xf]  ;;  %v5701_v58 = vld [vmem:[#allocation11 + $0x1a8] sm:$0xf0] }
 0x326   :  { %v5167_v22 = vor.u32 %v5701_v58, %v5166_v57 }
 0x327   :  { %v2799_v60 = vpop.f32.mrf.mxu1 }
 0x32a   :  { %v2734_v2 = vpop.f32.mrf.mxu0 }
 0x32b   :  { %v2735_v20 = vadd.f32 %v2734_v2, %v2722_v1  ;;  %v5732_v1 = vld [vmem:[#allocation13 + $0x60] sm:$0xff]  ;;  %v5722_v2 = vld [vmem:[#allocation13 + $0x10] sm:$0xff] }
 0x32c   :  { %v2760_v11 = vpop.f32.mrf.mxu2 }
 0x32d   :  { %v2816_v14 = vmax.f32 %v2735_v20, 0.0  ;;  %v2761_v16 = vadd.f32 %v2760_v11, %v2748_v12  ;;  %v5721_v20 = vld [vmem:[#allocation13 + $0x8] sm:$0xff] }
 0x32e   :  { %v5729_v11 = vld [vmem:[#allocation13 + $0x48] sm:$0xff] }
 0x32f   :  { %v6195_v19 = vpack.c.bf16 %v2816_v14, %v2816_v14  ;;  %v2801_v3 = vpop.f32.mrf.mxu1  ;;  %v5741_v12 = vld [vmem:[#allocation13 + $0xa8] sm:$0xff]  ;;  %v5728_v14 = vld [vmem:[#allocation13 + $0x40] sm:$0xff] }
 0x330   :  { %v2773_v18 = vpop.f32.mrf.mxu3 }
 0x331   :  { %v2774_v8 = vadd.f32 %v2773_v18, %v2761_v16  ;;  %3318 = vmatmul.bf16.vlgmr.msrb.gmra.mxu3 %v6195_v19  ;;  %3357 = vmatmul.bf16.vlgmr.msra.gmra.mxu2 %v6195_v19  ;;  %v5738_v16 = vld [vmem:[#allocation13 + $0x90] sm:$0xff]  ;;  %v5737_v18 = vld [vmem:[#allocation13 + $0x88] sm:$0xff] }
 0x332   :  { %v2736_v26 = vpop.f32.mrf.mxu0  ;;  %3414 = vmatpush.bf16.msrb.mxu3 %v5239_v13  ;;  %3655 = vmatpush.bf16.msra.mxu2 %v5743_v5  ;;  %v5740_v13 = vld [vmem:[#allocation13 + $0xa0] sm:$0xff] }
 0x333   :  { %v2817_v15 = vmax.f32 %v2774_v8, 0.0  ;;  %v5736_v8 = vld [vmem:[#allocation13 + $0x80] sm:$0xff] }
 0x334   :  { %v2762_v30 = vpop.f32.mrf.mxu2 }
 0x335   :  { %v2820_v31 = vpack.c.bf16 %v2817_v15, %v2817_v15 }
 0x336   :  { %3415 = vmatpush.bf16.msrb.mxu3 %v5227_v25  ;;  %3656 = vmatpush.bf16.msra.mxu2 %v5742_v9 }
 0x337   :  { %3331 = vmatmul.bf16.vlgmr.msra.gmra.mxu0 %v2820_v31 }
 0x338   :  { %v2775_v35 = vpop.f32.mrf.mxu3  ;;  %3629 = vmatpush.bf16.msra.mxu0 %v5727_v32 }
 0x33a   :  { %v2786_v37 = vpop.f32.mrf.mxu0  ;;  %3416 = vmatpush.bf16.msrb.mxu3 %v5215_v7  ;;  %3657 = vmatpush.bf16.msra.mxu2 %v5741_v12 }
 0x33b   :  { %v2787_v40 = vadd.f32 %v2786_v37, %v2311_v33 }
 0x33c   :  { %v2812_v44 = vpop.f32.mrf.mxu2  ;;  %3630 = vmatpush.bf16.msra.mxu0 %v5726_v36 }
 0x33d   :  { %v2800_v46 = vadd.f32 %v2799_v60, %v2787_v40  ;;  %v5698_v60 = vld [vmem:[#allocation11 + $0x190] sm:$0xf0] }
 0x33e   :  { %3417 = vmatpush.bf16.msrb.mxu3 %v5203_v38  ;;  %v5155_v61 = vor.u32 %v5698_v60, %v5154_v52  ;;  %3658 = vmatpush.bf16.msra.mxu2 %v5740_v13 }
 0x33f   :  { %v2813_v48 = vadd.f32 %v2812_v44, %v2800_v46  ;;  %v2922_v46 = vperm.slane %v2918_v21, 2 }
 0x340   :  { %3631 = vmatpush.bf16.msra.mxu0 %v5725_v45 }
 0x341   :  { %v2818_v43 = vmax.f32 %v2813_v48, 0.0  ;;  %3370 = vmatmul.bf16.vlgmr.msra.gmra.mxu3 %v2820_v31  ;;  %3409 = vmatmul.bf16.vlgmr.msrb.gmra.mxu2 %v2820_v31 }
 0x342   :  { %v2788_v53 = vpop.f32.mrf.mxu0  ;;  %3418 = vmatpush.bf16.msrb.mxu3 %v5191_v47 }
 0x343   :  { %v2821_v56 = vpack.c.bf16 %v2818_v43, %v2818_v43 }
 0x344   :  { %v2814_v50 = vpop.f32.mrf.mxu2  ;;  %3632 = vmatpush.bf16.msra.mxu0 %v5724_v62 }
 0x345   :  { %3344 = vmatmul.bf16.vlgmr.msra.gmra.mxu1 %v2821_v56 }
 0x346   :  { %3419 = vmatpush.bf16.msrb.mxu3 %v5179_v28  ;;  %3642 = vmatpush.bf16.msra.mxu1 %v5735_v55 }
 0x347   :  { %3383 = vmatmul.bf16.vlgmr.msrb.gmra.mxu0 %v2821_v56 }
 0x348   :  { %3633 = vmatpush.bf16.msra.mxu0 %v5723_v0 }
 0x34a   :  { %3420 = vmatpush.bf16.msrb.mxu3 %v5167_v22  ;;  %3643 = vmatpush.bf16.msra.mxu1 %v5734_v59  ;;  %v5756_v59 = vld [vmem:[%s6227_s14] ss:$0 sm:$0xff]  ;;  %s5974_s14 = smov [#allocation14]  }
 0x34b   :  { %s3689_s25 = sshll.u32 %s5974_s14, 4  ;;  %s3690_s25 = int_to_ptr.vmem [resolvable:$true] %s3689_s25 }
 0x34c   :  { %3634 = vmatpush.bf16.msra.mxu0 %v5722_v2 }
 0x34e   :  { %3421 = vmatpush.bf16.msrb.mxu3 %v5155_v61  ;;  %3644 = vmatpush.bf16.msra.mxu1 %v5733_v63 }
 0x350   :  { %3635 = vmatpush.bf16.msra.mxu0 %v5721_v20 }
 0x351   :  { %3422 = vmatmul.bf16.vlgmr.msrb.gmra.mxu3 %v2821_v56 }
 0x352   :  { %3645 = vmatpush.bf16.msra.mxu1 %v5732_v1 }
 0x354   :  { %3636 = vmatpush.bf16.msra.mxu0 %v5720_v10 }
 0x355   :  { %3396 = vmatmul.bf16.vlgmr.msrb.gmra.mxu1 %v6195_v19  ;;  %v5739_v19 = vld [vmem:[#allocation13 + $0x98] sm:$0xff] }
 0x356   :  { %3646 = vmatpush.bf16.msra.mxu1 %v5731_v4  ;;  %3659 = vmatpush.bf16.msra.mxu2 %v5739_v19 }
 0x35a   :  { %3647 = vmatpush.bf16.msra.mxu1 %v5730_v54  ;;  %3660 = vmatpush.bf16.msra.mxu2 %v5738_v16 }
 0x35e   :  { %3648 = vmatpush.bf16.msra.mxu1 %v5729_v11  ;;  %3661 = vmatpush.bf16.msra.mxu2 %v5737_v18 }
 0x362   :  { %3649 = vmatpush.bf16.msra.mxu1 %v5728_v14  ;;  %3662 = vmatpush.bf16.msra.mxu2 %v5736_v8 }
 0x3b4   :  { %v3319_v3 = vpop.f32.mrf.mxu3  ;;  %v3332_v17 = vpop.f32.mrf.mxu0 }
 0x3b5   :  { %v3358_v6 = vpop.f32.mrf.mxu2  ;;  %v3320_v25 = vadd.f32 %v3319_v3, %v2920_v39 }
 0x3b6   :  { %v3359_v31 = vadd.f32 %v3358_v6, %v2921_v27 }
 0x3b7   :  { %v3333_v29 = vadd.f32 %v3332_v17, %v3320_v25 }
 0x3bc   :  { %v3321_v24 = vpop.f32.mrf.mxu3  ;;  %v3334_v26 = vpop.f32.mrf.mxu0 }
 0x3bd   :  { %v3360_v15 = vpop.f32.mrf.mxu2 }
 0x3c2   :  { %v3345_v30 = vpop.f32.mrf.mxu1 }
 0x3c3   :  { %v3346_v32 = vadd.f32 %v3345_v30, %v3333_v29 }
 0x3c4   :  { %v3371_v7 = vpop.f32.mrf.mxu3  ;;  %v3384_v33 = vpop.f32.mrf.mxu0 }
 0x3c5   :  { %v3427_v34 = vmax.f32 %v3346_v32, 0.0  ;;  %v3372_v23 = vadd.f32 %v3371_v7, %v3359_v31  ;;  %v3410_v35 = vpop.f32.mrf.mxu2 }
 0x3c7   :  { %v3430_v36 = vpack.c.bf16 %v3427_v34, %v3427_v34  ;;  %v3385_v37 = vadd.f32 %v3384_v33, %v3372_v23 }
 0x3c9   :  { %v3428_v38 = vmax.f32 %v3385_v37, 0.0  ;;  %3637 = vmatmul.bf16.vlgmr.msra.gmra.mxu0 %v3430_v36 }
 0x3ca   :  { %v3347_v40 = vpop.f32.mrf.mxu1 }
 0x3cb   :  { %v3431_v41 = vpack.c.bf16 %v3428_v38, %v3428_v38 }
 0x3cc   :  { %v3373_v42 = vpop.f32.mrf.mxu3  ;;  %v3386_v44 = vpop.f32.mrf.mxu0 }
 0x3cd   :  { %v3412_v45 = vpop.f32.mrf.mxu2  ;;  %3650 = vmatmul.bf16.vlgmr.msra.gmra.mxu1 %v3431_v41 }
 0x3d2   :  { %v3397_v47 = vpop.f32.mrf.mxu1 }
 0x3d3   :  { %v3398_v48 = vadd.f32 %v3397_v47, %v2922_v46 }
 0x3d4   :  { %v3423_v51 = vpop.f32.mrf.mxu3 }
 0x3d5   :  { %v3411_v49 = vadd.f32 %v3410_v35, %v3398_v48 }
 0x3d7   :  { %v3424_v43 = vadd.f32 %v3423_v51, %v3411_v49 }
 0x3d9   :  { %v3429_v53 = vmax.f32 %v3424_v43, 0.0 }
 0x3da   :  { %v3399_v28 = vpop.f32.mrf.mxu1 }
 0x3db   :  { %v3432_v55 = vpack.c.bf16 %v3429_v53, %v3429_v53 }
 0x3dc   :  { %v3425_v56 = vpop.f32.mrf.mxu3 }
 0x3dd   :  { %3663 = vmatmul.bf16.vlgmr.msra.gmra.mxu2 %v3432_v55 }
 0x446   :  { %v3638_v57 = vpop.f32.mrf.mxu0 }
 0x447   :  { %v3639_v52 = vadd.f32 %v5756_v59, %v3638_v57 }
 0x44a   :  { %v3651_v58 = vpop.f32.mrf.mxu1 }
 0x44b   :  { %v3652_v60 = vadd.f32 %v3651_v58, %v3639_v52 }
 0x44e   :  { %v3640_v50 = vpop.f32.mrf.mxu0 }
 0x452   :  { %v3653_v22 = vpop.f32.mrf.mxu1 }
 0x460   :  { %v3664_v61 = vpop.f32.mrf.mxu2 }
 0x461   :  { %v3665_v62 = vadd.f32 %v3664_v61, %v3652_v60 }
 0x463   :  { %v3669_v63 = vsel %vm3668_vm0, %v3665_v62, -inf }
 0x464   :  { %3670 = vmax.xlane.f32.xlu0 %v3669_v63 }
 0x468   :  { %v3666_v0 = vpop.f32.mrf.mxu2 }
 0x4d7   :  { %v3671_v1 = vpop.xlane.xlu0 %3670 }
 0x4d8   :  { %v3672_v2 = vsub.f32 %v3665_v62, %v3671_v1 }
 0x4da   :  { %v3673_v4 = vmul.f32 1.442695, %v3672_v2 }
 0x4dc   :  { %5757 = vpow2.f32 %v3673_v4 }
 0x4e2   :  { %v5758_v5 = vpop.eup %5757 }
 0x4e3   :  { %v3675_v20 = vsel %vm3668_vm0, %v5758_v5, 0.0 }
 0x4e4   :  { %3676 = vadd.xlane.f32.xlu0 %v3675_v20 }
 0x557   :  { %v3677_v54 = vpop.xlane.xlu0 %3676 }
 0x558   :  { %5759 = vrcp.f32 %v3677_v54 }
 0x55e   :  { %v5760_v9 = vpop.eup %5759 }
 0x55f   :  { %v3679_v10 = vmul.f32 %v5760_v9, %v3677_v54 }
 0x561   :  { %v3680_v11 = vsub.f32 2.0, %v3679_v10 }
 0x563   :  { %v3681_v12 = vmul.f32 %v5760_v9, %v3680_v11 }
 0x565   :  { %v3682_v14 = vmul.f32 %v5758_v5, %v3681_v12 }
 0x567   :  { %3683 = vst.msk [vmem:[#allocation14] sm:$0xff] %vm3668_vm0, %v3682_v14 }
 0x568   :  { %3694 = dma.vmem_to_hbm [thread:$0]  %s3690_s25, 128, %s3692_s30, [#allocation4]  }
 0x569   :  { %5961 = dma.done.wait [#allocation4], 128  }
 0x56a   :  { %5962 = vsyncadd [#allocation4], 4294967168 }
 0x56b   :  { %3699 = vsyncpa [#allocation3], 1 }
 0x56c   :  { %3700 = vsyncpa [#allocation6], 1 }
 0x56d   :  { %3701 = vsyncpa [#allocation9], 1 }
 0x56e   :  { %3702 = vsyncpa [#allocation12], 1 }
 0x56f   :  { %3703 = vsyncpa [#allocation4], 1 }

</bundles_post_ra>
